<compile_context>
chip_gen: v6e
topology: v6e:2x2x1
jax: 0.10.0
libtpu: 0.0.40
codegen_flags: <defaults>
</compile_context>

<pallas_src>
import jax
import jax.numpy as jnp
from jax import lax
from jax.experimental import pallas as pl
from jax.experimental.pallas import tpu as pltpu

# ----------------------------------------------------------------------------
# Synthetic deterministic DAG (stands in for load_dag()); num_nodes = 4.
#   dag[-1] = [Node(0, 'tanh')]
#   dag[0]  = [Node(1, 'relu'), Node(2, 'sigmoid')]
#   dag[1]  = [Node(3, 'identity')]
#   dag[2]  = [Node(4, <leaf>)]   dag[3] = [Node(4, <leaf>)]
# BFS edge order (each edge owns one w_c and one w_h of shape (nhid, nhid)):
DAG_F0 = "tanh"
DAG_EDGES = [(0, 1, "relu"), (0, 2, "sigmoid"), (1, 3, "identity")]
LEAF_IDS = [2, 3]
NUM_EDGES = len(DAG_EDGES)

MAX_NORM = 25.0


def _sigmoid(z):
    return 1.0 / (1.0 + jnp.exp(-z))


def _act(name):
    name = name.lower()
    if name == "relu":
        return lambda z: jnp.maximum(z, 0.0)
    if name == "tanh":
        return jnp.tanh
    if name == "identity":
        return lambda z: z
    if name == "sigmoid":
        return _sigmoid
    raise ValueError(name)


def _group_edges(edges):
    """Group BFS-ordered edges by (consecutive) source node for matmul fusion."""
    groups = []  # [(src, [(edge_idx, dst, act), ...]), ...]
    for ei, (src, dst, act) in enumerate(edges):
        if groups and groups[-1][0] == src:
            groups[-1][1].append((ei, dst, act))
        else:
            groups.append((src, [(ei, dst, act)]))
    return groups


DAG_GROUPS = _group_edges(DAG_EDGES)


# ----------------------------------------------------------------------------
# Kernel: one invocation runs all T time steps with fused, lane-dense matmuls.
def _make_kernel(T, nhid, groups):
    n_groups = len(groups)
    f0 = _act(DAG_F0)
    inv_leaves = 1.0 / float(len(LEAF_IDS))
    max_sq = MAX_NORM * MAX_NORM

    def kernel(*refs):
        h0_ref, x_ref, wx_ref, bx_ref, wh_ref = refs[:5]
        gw_refs = refs[5:5 + n_groups]
        out_ref = refs[5 + n_groups]

        # Hoist weight loads out of the unrolled time loop.
        wx = wx_ref[...]        # (ninp, 2*nhid)   = [w_xc^T | w_xh^T]
        bx = bx_ref[...]        # (1, 2*nhid)      = [b_xc  | b_xh]
        wh = wh_ref[...]        # (nhid, 2*nhid)   = [w_hc^T | w_hh^T]
        gws = [g[...] for g in gw_refs]

        def step(t, h_prev):
            x_t = x_ref[t]                                    # (B, ninp)
            # Fused input + recurrent projections: (B, 2*nhid)
            z = (jnp.dot(x_t, wx, preferred_element_type=jnp.float32) + bx
                 + jnp.dot(h_prev, wh, preferred_element_type=jnp.float32))
            c0 = _sigmoid(z[:, :nhid])
            h = {0: c0 * f0(z[:, nhid:2 * nhid]) + (1.0 - c0) * h_prev}

            # DAG traversal, one fused lane-dense matmul per source node.
            for gi, (src, edges) in enumerate(groups):
                y = jnp.dot(h[src], gws[gi],
                            preferred_element_type=jnp.float32)  # (B, 2*len*nhid)
                for j, (_ei, dst, act_name) in enumerate(edges):
                    act = _act(act_name)
                    ce = _sigmoid(y[:, 2 * j * nhid:(2 * j + 1) * nhid])
                    he = act(y[:, (2 * j + 1) * nhid:(2 * j + 2) * nhid])
                    h[dst] = ce * he + (1.0 - ce) * h[src]

            # output = mean over leaf nodes
            output = h[LEAF_IDS[0]]
            for nid in LEAF_IDS[1:]:
                output = output + h[nid]
            output = output * inv_leaves

            # Norm clip (mask applied twice in PyTorch due to aliasing):
            # (25/norm)^2 == 625/ss -> squared form, no sqrt, no 25/0 hazard.
            ss = jnp.sum(output * output, axis=-1, keepdims=True)
            scale = jnp.where(ss > max_sq, max_sq / ss, 1.0)
            output = output * scale

            out_ref[t] = output.astype(out_ref.dtype)
            return output

        lax.fori_loop(0, T, step, h0_ref[...], unroll=True)

    return kernel


# ----------------------------------------------------------------------------
# One-time weight preparation (hoisted out of the per-call forward).
def prepare_fused_weights(params):
    nhid = params["w_hc"].shape[0]
    wx = jnp.concatenate([params["w_xc_w"].T, params["w_xh_w"].T], axis=1)
    bx = jnp.concatenate([params["w_xc_b"], params["w_xh_b"]]).reshape(1, 2 * nhid)
    wh = jnp.concatenate([params["w_hc"].T, params["w_hh"].T], axis=1)
    gws = []
    for _src, edges in DAG_GROUPS:
        cols = []
        for ei, _dst, _act in edges:
            cols.append(params["w_c"][ei].T)
            cols.append(params["w_h"][ei].T)
        gws.append(jnp.concatenate(cols, axis=1))     # (nhid, 2*len(edges)*nhid)
    return {"wx": wx, "bx": bx, "wh": wh, "gws": tuple(gws)}


def dag_cell_forward(x, h0, fused):
    """x: (T, B, ninp); h0: (B, nhid) -> (outputs (T*B, nhid), hidden (B, nhid))."""
    T, B, ninp = x.shape
    nhid = h0.shape[-1]
    kernel = _make_kernel(T, nhid, DAG_GROUPS)

    def full_spec(shape):
        nd = len(shape)
        return pl.BlockSpec(shape, lambda i, _nd=nd: (0,) * _nd)

    in_arrays = (h0, x, fused["wx"], fused["bx"], fused["wh"]) + tuple(fused["gws"])
    in_specs = [full_spec(a.shape) for a in in_arrays]

    out = pl.pallas_call(
        kernel,
        out_shape=jax.ShapeDtypeStruct((T, B, nhid), jnp.float32),
        grid_spec=pltpu.PrefetchScalarGridSpec(
            num_scalar_prefetch=0,
            grid=(1,),                        # single invocation; time loop in-kernel
            in_specs=in_specs,
            out_specs=full_spec((T, B, nhid)),
        ),
        compiler_params=pltpu.CompilerParams(
            dimension_semantics=("arbitrary",)),
    )(*in_arrays)

    outputs = out.reshape(T * B, nhid)     # torch.cat(outputs, dim=0)
    hidden = out[-1]                       # final hidden == last step's output
    return outputs, hidden


# ----------------------------------------------------------------------------
# Pure-JAX reference (mirrors the PyTorch forward step-by-step, unfused).
def dag_cell_reference(x, h0, params):
    T, B, _ = x.shape
    f0 = _act(DAG_F0)
    h_prev = h0
    outs = []
    for t in range(T):
        xt = x[t]
        c0 = _sigmoid(xt @ params["w_xc_w"].T + params["w_xc_b"]
                      + h_prev @ params["w_hc"].T)
        h = {0: c0 * f0(xt @ params["w_xh_w"].T + params["w_xh_b"]
                        + h_prev @ params["w_hh"].T) + (1.0 - c0) * h_prev}
        for e, (src, dst, act_name) in enumerate(DAG_EDGES):
            act = _act(act_name)
            ce = _sigmoid(h[src] @ params["w_c"][e].T)
            h[dst] = ce * act(h[src] @ params["w_h"][e].T) + (1.0 - ce) * h[src]
        output = jnp.mean(jnp.stack([h[i] for i in LEAF_IDS], axis=2), axis=2)
        norm = jnp.linalg.norm(output, axis=-1, keepdims=True)
        mask = jnp.where(norm > MAX_NORM, MAX_NORM / norm, 1.0)
        output = output * mask * mask
        h_prev = output
        outs.append(output)
    return jnp.concatenate(outs, axis=0), h_prev


# ----------------------------------------------------------------------------
def init_params(key, ninp, nhid, init_range=0.1):
    ks = jax.random.split(key, 8)
    u = lambda k, shape: jax.random.uniform(k, shape, jnp.float32,
                                            -init_range, init_range)
    return {
        "w_xc_w": u(ks[0], (nhid, ninp)),
        "w_xc_b": u(ks[1], (nhid,)),
        "w_xh_w": u(ks[2], (nhid, ninp)),
        "w_xh_b": u(ks[3], (nhid,)),
        "w_hc":   u(ks[4], (nhid, nhid)),
        "w_hh":   u(ks[5], (nhid, nhid)),
        "w_c":    u(ks[6], (NUM_EDGES, nhid, nhid)),
        "w_h":    u(ks[7], (NUM_EDGES, nhid, nhid)),
    }


if __name__ == "__main__":
    T, B, NINP, NHID = 8, 8, 32, 32
    key = jax.random.PRNGKey(0)
    k_x, k_h, k_p = jax.random.split(key, 3)

    x = jax.random.normal(k_x, (T, B, NINP), jnp.float32)
    h0 = jax.random.normal(k_h, (B, NHID), jnp.float32)
    params = init_params(k_p, NINP, NHID)

    fused = prepare_fused_weights(params)   # one-time weight prep (hoisted)

    outputs, hidden = dag_cell_forward(x, h0, fused)
    outputs = jax.block_until_ready(outputs)
    hidden = jax.block_until_ready(hidden)

    ref_out, ref_hid = dag_cell_reference(x, h0, params)
    assert outputs.shape == (T * B, NHID) and hidden.shape == (B, NHID)
    assert jnp.allclose(outputs, ref_out, atol=1e-5, rtol=1e-5)
    assert jnp.allclose(hidden, ref_hid, atol=1e-5, rtol=1e-5)

    print("KERNEL_OK")
</pallas_src>

<mosaic_0001>
module attributes {stable_mosaic.version = 11 : i64} {
  func.func @kernel(%arg0: i32, %arg1: memref<8x32xf32, #tpu.memory_space<vmem>>, %arg2: memref<8x8x32xf32, #tpu.memory_space<vmem>>, %arg3: memref<32x64xf32, #tpu.memory_space<vmem>>, %arg4: memref<1x64xf32, #tpu.memory_space<vmem>>, %arg5: memref<32x64xf32, #tpu.memory_space<vmem>>, %arg6: memref<32x128xf32, #tpu.memory_space<vmem>>, %arg7: memref<32x64xf32, #tpu.memory_space<vmem>>, %arg8: memref<8x8x32xf32, #tpu.memory_space<vmem>>) attributes {dimension_semantics = [#tpu.dimension_semantics<arbitrary>], iteration_bounds = array<i64: 1>, scalar_prefetch = 0 : i64, scratch_operands = 0 : i64, tpu.core_type = #tpu.core_type<tc>, window_params = [{pipeline_mode = #tpu.pipeline_mode<synchronous>, transform_indices = @transform_0, window_bounds = array<i64: 8, 32>}, {pipeline_mode = #tpu.pipeline_mode<synchronous>, transform_indices = @transform_1, window_bounds = array<i64: 8, 8, 32>}, {pipeline_mode = #tpu.pipeline_mode<synchronous>, transform_indices = @transform_2, window_bounds = array<i64: 32, 64>}, {pipeline_mode = #tpu.pipeline_mode<synchronous>, transform_indices = @transform_3, window_bounds = array<i64: 1, 64>}, {pipeline_mode = #tpu.pipeline_mode<synchronous>, transform_indices = @transform_4, window_bounds = array<i64: 32, 64>}, {pipeline_mode = #tpu.pipeline_mode<synchronous>, transform_indices = @transform_5, window_bounds = array<i64: 32, 128>}, {pipeline_mode = #tpu.pipeline_mode<synchronous>, transform_indices = @transform_6, window_bounds = array<i64: 32, 64>}, {pipeline_mode = #tpu.pipeline_mode<synchronous>, transform_indices = @transform_7, window_bounds = array<i64: 8, 8, 32>}]} {
    %c0 = arith.constant 0 : index
    %c0_0 = arith.constant 0 : index
    %0 = vector.load %arg3[%c0, %c0_0] : memref<32x64xf32, #tpu.memory_space<vmem>>, vector<32x64xf32>
    %c0_1 = arith.constant 0 : index
    %c0_2 = arith.constant 0 : index
    %1 = vector.load %arg4[%c0_1, %c0_2] : memref<1x64xf32, #tpu.memory_space<vmem>>, vector<1x64xf32>
    %c0_3 = arith.constant 0 : index
    %c0_4 = arith.constant 0 : index
    %2 = vector.load %arg5[%c0_3, %c0_4] : memref<32x64xf32, #tpu.memory_space<vmem>>, vector<32x64xf32>
    %c0_5 = arith.constant 0 : index
    %c0_6 = arith.constant 0 : index
    %3 = vector.load %arg6[%c0_5, %c0_6] : memref<32x128xf32, #tpu.memory_space<vmem>>, vector<32x128xf32>
    %c0_7 = arith.constant 0 : index
    %c0_8 = arith.constant 0 : index
    %4 = vector.load %arg7[%c0_7, %c0_8] : memref<32x64xf32, #tpu.memory_space<vmem>>, vector<32x64xf32>
    %c0_9 = arith.constant 0 : index
    %c0_10 = arith.constant 0 : index
    %5 = vector.load %arg1[%c0_9, %c0_10] : memref<8x32xf32, #tpu.memory_space<vmem>>, vector<8x32xf32>
    %c0_i32 = arith.constant 0 : i32
    %6 = arith.index_cast %c0_i32 : i32 to index
    %c0_11 = arith.constant 0 : index
    %c0_12 = arith.constant 0 : index
    %7 = vector.load %arg2[%6, %c0_11, %c0_12] : memref<8x8x32xf32, #tpu.memory_space<vmem>>, vector<1x8x32xf32>
    %8 = vector.shape_cast %7 : vector<1x8x32xf32> to vector<8x32xf32>
    %cst = arith.constant dense<0.000000e+00> : vector<8x64xf32>
    %9 = tpu.matmul %8, %0, %cst {dimension_numbers = #tpu.dot_dimension_numbers<[1], [0], [0], [1], [0, 0, 1, 1], [], []>} : vector<8x32xf32>, vector<32x64xf32>, vector<8x64xf32> -> vector<8x64xf32>
    %10 = vector.broadcast %1 : vector<1x64xf32> to vector<8x64xf32>
    %11 = arith.addf %9, %10 : vector<8x64xf32>
    %cst_13 = arith.constant dense<0.000000e+00> : vector<8x64xf32>
    %12 = tpu.matmul %5, %2, %cst_13 {dimension_numbers = #tpu.dot_dimension_numbers<[1], [0], [0], [1], [0, 0, 1, 1], [], []>} : vector<8x32xf32>, vector<32x64xf32>, vector<8x64xf32> -> vector<8x64xf32>
    %13 = arith.addf %11, %12 : vector<8x64xf32>
    %14 = vector.extract_strided_slice %13 {offsets = [0, 0], sizes = [8, 32], strides = [1, 1]} : vector<8x64xf32> to vector<8x32xf32>
    %cst_14 = arith.constant 0.000000e+00 : f32
    %15 = vector.broadcast %cst_14 : f32 to vector<8x32xf32>
    %16 = arith.subf %15, %14 : vector<8x32xf32>
    %17 = math.exp %16 : vector<8x32xf32>
    %cst_15 = arith.constant 1.000000e+00 : f32
    %18 = vector.broadcast %cst_15 : f32 to vector<8x32xf32>
    %19 = arith.addf %18, %17 : vector<8x32xf32>
    %cst_16 = arith.constant 1.000000e+00 : f32
    %20 = vector.broadcast %cst_16 : f32 to vector<8x32xf32>
    %21 = arith.divf %20, %19 : vector<8x32xf32>
    %22 = vector.extract_strided_slice %13 {offsets = [0, 32], sizes = [8, 32], strides = [1, 1]} : vector<8x64xf32> to vector<8x32xf32>
    %23 = math.tanh %22 : vector<8x32xf32>
    %24 = arith.mulf %21, %23 : vector<8x32xf32>
    %cst_17 = arith.constant 1.000000e+00 : f32
    %25 = vector.broadcast %cst_17 : f32 to vector<8x32xf32>
    %26 = arith.subf %25, %21 : vector<8x32xf32>
    %27 = arith.mulf %26, %5 : vector<8x32xf32>
    %28 = arith.addf %24, %27 : vector<8x32xf32>
    %cst_18 = arith.constant dense<0.000000e+00> : vector<8x128xf32>
    %29 = tpu.matmul %28, %3, %cst_18 {dimension_numbers = #tpu.dot_dimension_numbers<[1], [0], [0], [1], [0, 0, 1, 1], [], []>} : vector<8x32xf32>, vector<32x128xf32>, vector<8x128xf32> -> vector<8x128xf32>
    %30 = vector.extract_strided_slice %29 {offsets = [0, 0], sizes = [8, 32], strides = [1, 1]} : vector<8x128xf32> to vector<8x32xf32>
    %cst_19 = arith.constant 0.000000e+00 : f32
    %31 = vector.broadcast %cst_19 : f32 to vector<8x32xf32>
    %32 = arith.subf %31, %30 : vector<8x32xf32>
    %33 = math.exp %32 : vector<8x32xf32>
    %cst_20 = arith.constant 1.000000e+00 : f32
    %34 = vector.broadcast %cst_20 : f32 to vector<8x32xf32>
    %35 = arith.addf %34, %33 : vector<8x32xf32>
    %cst_21 = arith.constant 1.000000e+00 : f32
    %36 = vector.broadcast %cst_21 : f32 to vector<8x32xf32>
    %37 = arith.divf %36, %35 : vector<8x32xf32>
    %38 = vector.extract_strided_slice %29 {offsets = [0, 32], sizes = [8, 32], strides = [1, 1]} : vector<8x128xf32> to vector<8x32xf32>
    %cst_22 = arith.constant 0.000000e+00 : f32
    %39 = vector.broadcast %cst_22 : f32 to vector<8x32xf32>
    %40 = arith.maximumf %38, %39 : vector<8x32xf32>
    %41 = arith.mulf %37, %40 : vector<8x32xf32>
    %cst_23 = arith.constant 1.000000e+00 : f32
    %42 = vector.broadcast %cst_23 : f32 to vector<8x32xf32>
    %43 = arith.subf %42, %37 : vector<8x32xf32>
    %44 = arith.mulf %43, %28 : vector<8x32xf32>
    %45 = arith.addf %41, %44 : vector<8x32xf32>
    %46 = vector.extract_strided_slice %29 {offsets = [0, 64], sizes = [8, 32], strides = [1, 1]} : vector<8x128xf32> to vector<8x32xf32>
    %cst_24 = arith.constant 0.000000e+00 : f32
    %47 = vector.broadcast %cst_24 : f32 to vector<8x32xf32>
    %48 = arith.subf %47, %46 : vector<8x32xf32>
    %49 = math.exp %48 : vector<8x32xf32>
    %cst_25 = arith.constant 1.000000e+00 : f32
    %50 = vector.broadcast %cst_25 : f32 to vector<8x32xf32>
    %51 = arith.addf %50, %49 : vector<8x32xf32>
    %cst_26 = arith.constant 1.000000e+00 : f32
    %52 = vector.broadcast %cst_26 : f32 to vector<8x32xf32>
    %53 = arith.divf %52, %51 : vector<8x32xf32>
    %54 = vector.extract_strided_slice %29 {offsets = [0, 96], sizes = [8, 32], strides = [1, 1]} : vector<8x128xf32> to vector<8x32xf32>
    %cst_27 = arith.constant 0.000000e+00 : f32
    %55 = vector.broadcast %cst_27 : f32 to vector<8x32xf32>
    %56 = arith.subf %55, %54 : vector<8x32xf32>
    %57 = math.exp %56 : vector<8x32xf32>
    %cst_28 = arith.constant 1.000000e+00 : f32
    %58 = vector.broadcast %cst_28 : f32 to vector<8x32xf32>
    %59 = arith.addf %58, %57 : vector<8x32xf32>
    %cst_29 = arith.constant 1.000000e+00 : f32
    %60 = vector.broadcast %cst_29 : f32 to vector<8x32xf32>
    %61 = arith.divf %60, %59 : vector<8x32xf32>
    %62 = arith.mulf %53, %61 : vector<8x32xf32>
    %cst_30 = arith.constant 1.000000e+00 : f32
    %63 = vector.broadcast %cst_30 : f32 to vector<8x32xf32>
    %64 = arith.subf %63, %53 : vector<8x32xf32>
    %65 = arith.mulf %64, %28 : vector<8x32xf32>
    %66 = arith.addf %62, %65 : vector<8x32xf32>
    %cst_31 = arith.constant dense<0.000000e+00> : vector<8x64xf32>
    %67 = tpu.matmul %45, %4, %cst_31 {dimension_numbers = #tpu.dot_dimension_numbers<[1], [0], [0], [1], [0, 0, 1, 1], [], []>} : vector<8x32xf32>, vector<32x64xf32>, vector<8x64xf32> -> vector<8x64xf32>
    %68 = vector.extract_strided_slice %67 {offsets = [0, 0], sizes = [8, 32], strides = [1, 1]} : vector<8x64xf32> to vector<8x32xf32>
    %cst_32 = arith.constant 0.000000e+00 : f32
    %69 = vector.broadcast %cst_32 : f32 to vector<8x32xf32>
    %70 = arith.subf %69, %68 : vector<8x32xf32>
    %71 = math.exp %70 : vector<8x32xf32>
    %cst_33 = arith.constant 1.000000e+00 : f32
    %72 = vector.broadcast %cst_33 : f32 to vector<8x32xf32>
    %73 = arith.addf %72, %71 : vector<8x32xf32>
    %cst_34 = arith.constant 1.000000e+00 : f32
    %74 = vector.broadcast %cst_34 : f32 to vector<8x32xf32>
    %75 = arith.divf %74, %73 : vector<8x32xf32>
    %76 = vector.extract_strided_slice %67 {offsets = [0, 32], sizes = [8, 32], strides = [1, 1]} : vector<8x64xf32> to vector<8x32xf32>
    %77 = arith.mulf %75, %76 : vector<8x32xf32>
    %cst_35 = arith.constant 1.000000e+00 : f32
    %78 = vector.broadcast %cst_35 : f32 to vector<8x32xf32>
    %79 = arith.subf %78, %75 : vector<8x32xf32>
    %80 = arith.mulf %79, %45 : vector<8x32xf32>
    %81 = arith.addf %77, %80 : vector<8x32xf32>
    %82 = arith.addf %66, %81 : vector<8x32xf32>
    %cst_36 = arith.constant 5.000000e-01 : f32
    %83 = vector.broadcast %cst_36 : f32 to vector<8x32xf32>
    %84 = arith.mulf %82, %83 : vector<8x32xf32>
    %85 = arith.mulf %84, %84 : vector<8x32xf32>
    %cst_37 = arith.constant dense<0.000000e+00> : vector<8xf32>
    %86 = vector.multi_reduction <add>, %85, %cst_37 [1] : vector<8x32xf32> to vector<8xf32>
    %87 = vector.shape_cast %86 : vector<8xf32> to vector<8x1xf32>
    %cst_38 = arith.constant 6.250000e+02 : f32
    %88 = vector.broadcast %cst_38 : f32 to vector<8x1xf32>
    %89 = arith.cmpf ogt, %87, %88 : vector<8x1xf32>
    %cst_39 = arith.constant 6.250000e+02 : f32
    %90 = vector.broadcast %cst_39 : f32 to vector<8x1xf32>
    %91 = arith.divf %90, %87 : vector<8x1xf32>
    %cst_40 = arith.constant 1.000000e+00 : f32
    %92 = vector.broadcast %cst_40 : f32 to vector<8x1xf32>
    %93 = arith.select %89, %91, %92 : vector<8x1xi1>, vector<8x1xf32>
    %94 = vector.broadcast %93 : vector<8x1xf32> to vector<8x32xf32>
    %95 = arith.mulf %84, %94 : vector<8x32xf32>
    %96 = arith.index_cast %c0_i32 : i32 to index
    %c0_41 = arith.constant 0 : index
    %c0_42 = arith.constant 0 : index
    %97 = vector.load %arg8[%96, %c0_41, %c0_42] : memref<8x8x32xf32, #tpu.memory_space<vmem>>, vector<1x8x32xf32>
    %98 = vector.shape_cast %97 : vector<1x8x32xf32> to vector<8x32xf32>
    %99 = vector.shape_cast %95 : vector<8x32xf32> to vector<1x8x32xf32>
    tpu.vector_store %arg8[%96, %c0_41, %c0_42], %99 {strides = array<i32>} : memref<8x8x32xf32, #tpu.memory_space<vmem>>, vector<1x8x32xf32>,
    %c1_i32 = arith.constant 1 : i32
    %100 = arith.index_cast %c1_i32 : i32 to index
    %c0_43 = arith.constant 0 : index
    %c0_44 = arith.constant 0 : index
    %101 = vector.load %arg2[%100, %c0_43, %c0_44] : memref<8x8x32xf32, #tpu.memory_space<vmem>>, vector<1x8x32xf32>
    %102 = vector.shape_cast %101 : vector<1x8x32xf32> to vector<8x32xf32>
    %cst_45 = arith.constant dense<0.000000e+00> : vector<8x64xf32>
    %103 = tpu.matmul %102, %0, %cst_45 {dimension_numbers = #tpu.dot_dimension_numbers<[1], [0], [0], [1], [0, 0, 1, 1], [], []>} : vector<8x32xf32>, vector<32x64xf32>, vector<8x64xf32> -> vector<8x64xf32>
    %104 = vector.broadcast %1 : vector<1x64xf32> to vector<8x64xf32>
    %105 = arith.addf %103, %104 : vector<8x64xf32>
    %cst_46 = arith.constant dense<0.000000e+00> : vector<8x64xf32>
    %106 = tpu.matmul %95, %2, %cst_46 {dimension_numbers = #tpu.dot_dimension_numbers<[1], [0], [0], [1], [0, 0, 1, 1], [], []>} : vector<8x32xf32>, vector<32x64xf32>, vector<8x64xf32> -> vector<8x64xf32>
    %107 = arith.addf %105, %106 : vector<8x64xf32>
    %108 = vector.extract_strided_slice %107 {offsets = [0, 0], sizes = [8, 32], strides = [1, 1]} : vector<8x64xf32> to vector<8x32xf32>
    %cst_47 = arith.constant 0.000000e+00 : f32
    %109 = vector.broadcast %cst_47 : f32 to vector<8x32xf32>
    %110 = arith.subf %109, %108 : vector<8x32xf32>
    %111 = math.exp %110 : vector<8x32xf32>
    %cst_48 = arith.constant 1.000000e+00 : f32
    %112 = vector.broadcast %cst_48 : f32 to vector<8x32xf32>
    %113 = arith.addf %112, %111 : vector<8x32xf32>
    %cst_49 = arith.constant 1.000000e+00 : f32
    %114 = vector.broadcast %cst_49 : f32 to vector<8x32xf32>
    %115 = arith.divf %114, %113 : vector<8x32xf32>
    %116 = vector.extract_strided_slice %107 {offsets = [0, 32], sizes = [8, 32], strides = [1, 1]} : vector<8x64xf32> to vector<8x32xf32>
    %117 = math.tanh %116 : vector<8x32xf32>
    %118 = arith.mulf %115, %117 : vector<8x32xf32>
    %cst_50 = arith.constant 1.000000e+00 : f32
    %119 = vector.broadcast %cst_50 : f32 to vector<8x32xf32>
    %120 = arith.subf %119, %115 : vector<8x32xf32>
    %121 = arith.mulf %120, %95 : vector<8x32xf32>
    %122 = arith.addf %118, %121 : vector<8x32xf32>
    %cst_51 = arith.constant dense<0.000000e+00> : vector<8x128xf32>
    %123 = tpu.matmul %122, %3, %cst_51 {dimension_numbers = #tpu.dot_dimension_numbers<[1], [0], [0], [1], [0, 0, 1, 1], [], []>} : vector<8x32xf32>, vector<32x128xf32>, vector<8x128xf32> -> vector<8x128xf32>
    %124 = vector.extract_strided_slice %123 {offsets = [0, 0], sizes = [8, 32], strides = [1, 1]} : vector<8x128xf32> to vector<8x32xf32>
    %cst_52 = arith.constant 0.000000e+00 : f32
    %125 = vector.broadcast %cst_52 : f32 to vector<8x32xf32>
    %126 = arith.subf %125, %124 : vector<8x32xf32>
    %127 = math.exp %126 : vector<8x32xf32>
    %cst_53 = arith.constant 1.000000e+00 : f32
    %128 = vector.broadcast %cst_53 : f32 to vector<8x32xf32>
    %129 = arith.addf %128, %127 : vector<8x32xf32>
    %cst_54 = arith.constant 1.000000e+00 : f32
    %130 = vector.broadcast %cst_54 : f32 to vector<8x32xf32>
    %131 = arith.divf %130, %129 : vector<8x32xf32>
    %132 = vector.extract_strided_slice %123 {offsets = [0, 32], sizes = [8, 32], strides = [1, 1]} : vector<8x128xf32> to vector<8x32xf32>
    %cst_55 = arith.constant 0.000000e+00 : f32
    %133 = vector.broadcast %cst_55 : f32 to vector<8x32xf32>
    %134 = arith.maximumf %132, %133 : vector<8x32xf32>
    %135 = arith.mulf %131, %134 : vector<8x32xf32>
    %cst_56 = arith.constant 1.000000e+00 : f32
    %136 = vector.broadcast %cst_56 : f32 to vector<8x32xf32>
    %137 = arith.subf %136, %131 : vector<8x32xf32>
    %138 = arith.mulf %137, %122 : vector<8x32xf32>
    %139 = arith.addf %135, %138 : vector<8x32xf32>
    %140 = vector.extract_strided_slice %123 {offsets = [0, 64], sizes = [8, 32], strides = [1, 1]} : vector<8x128xf32> to vector<8x32xf32>
    %cst_57 = arith.constant 0.000000e+00 : f32
    %141 = vector.broadcast %cst_57 : f32 to vector<8x32xf32>
    %142 = arith.subf %141, %140 : vector<8x32xf32>
    %143 = math.exp %142 : vector<8x32xf32>
    %cst_58 = arith.constant 1.000000e+00 : f32
    %144 = vector.broadcast %cst_58 : f32 to vector<8x32xf32>
    %145 = arith.addf %144, %143 : vector<8x32xf32>
    %cst_59 = arith.constant 1.000000e+00 : f32
    %146 = vector.broadcast %cst_59 : f32 to vector<8x32xf32>
    %147 = arith.divf %146, %145 : vector<8x32xf32>
    %148 = vector.extract_strided_slice %123 {offsets = [0, 96], sizes = [8, 32], strides = [1, 1]} : vector<8x128xf32> to vector<8x32xf32>
    %cst_60 = arith.constant 0.000000e+00 : f32
    %149 = vector.broadcast %cst_60 : f32 to vector<8x32xf32>
    %150 = arith.subf %149, %148 : vector<8x32xf32>
    %151 = math.exp %150 : vector<8x32xf32>
    %cst_61 = arith.constant 1.000000e+00 : f32
    %152 = vector.broadcast %cst_61 : f32 to vector<8x32xf32>
    %153 = arith.addf %152, %151 : vector<8x32xf32>
    %cst_62 = arith.constant 1.000000e+00 : f32
    %154 = vector.broadcast %cst_62 : f32 to vector<8x32xf32>
    %155 = arith.divf %154, %153 : vector<8x32xf32>
    %156 = arith.mulf %147, %155 : vector<8x32xf32>
    %cst_63 = arith.constant 1.000000e+00 : f32
    %157 = vector.broadcast %cst_63 : f32 to vector<8x32xf32>
    %158 = arith.subf %157, %147 : vector<8x32xf32>
    %159 = arith.mulf %158, %122 : vector<8x32xf32>
    %160 = arith.addf %156, %159 : vector<8x32xf32>
    %cst_64 = arith.constant dense<0.000000e+00> : vector<8x64xf32>
    %161 = tpu.matmul %139, %4, %cst_64 {dimension_numbers = #tpu.dot_dimension_numbers<[1], [0], [0], [1], [0, 0, 1, 1], [], []>} : vector<8x32xf32>, vector<32x64xf32>, vector<8x64xf32> -> vector<8x64xf32>
    %162 = vector.extract_strided_slice %161 {offsets = [0, 0], sizes = [8, 32], strides = [1, 1]} : vector<8x64xf32> to vector<8x32xf32>
    %cst_65 = arith.constant 0.000000e+00 : f32
    %163 = vector.broadcast %cst_65 : f32 to vector<8x32xf32>
    %164 = arith.subf %163, %162 : vector<8x32xf32>
    %165 = math.exp %164 : vector<8x32xf32>
    %cst_66 = arith.constant 1.000000e+00 : f32
    %166 = vector.broadcast %cst_66 : f32 to vector<8x32xf32>
    %167 = arith.addf %166, %165 : vector<8x32xf32>
    %cst_67 = arith.constant 1.000000e+00 : f32
    %168 = vector.broadcast %cst_67 : f32 to vector<8x32xf32>
    %169 = arith.divf %168, %167 : vector<8x32xf32>
    %170 = vector.extract_strided_slice %161 {offsets = [0, 32], sizes = [8, 32], strides = [1, 1]} : vector<8x64xf32> to vector<8x32xf32>
    %171 = arith.mulf %169, %170 : vector<8x32xf32>
    %cst_68 = arith.constant 1.000000e+00 : f32
    %172 = vector.broadcast %cst_68 : f32 to vector<8x32xf32>
    %173 = arith.subf %172, %169 : vector<8x32xf32>
    %174 = arith.mulf %173, %139 : vector<8x32xf32>
    %175 = arith.addf %171, %174 : vector<8x32xf32>
    %176 = arith.addf %160, %175 : vector<8x32xf32>
    %cst_69 = arith.constant 5.000000e-01 : f32
    %177 = vector.broadcast %cst_69 : f32 to vector<8x32xf32>
    %178 = arith.mulf %176, %177 : vector<8x32xf32>
    %179 = arith.mulf %178, %178 : vector<8x32xf32>
    %cst_70 = arith.constant dense<0.000000e+00> : vector<8xf32>
    %180 = vector.multi_reduction <add>, %179, %cst_70 [1] : vector<8x32xf32> to vector<8xf32>
    %181 = vector.shape_cast %180 : vector<8xf32> to vector<8x1xf32>
    %cst_71 = arith.constant 6.250000e+02 : f32
    %182 = vector.broadcast %cst_71 : f32 to vector<8x1xf32>
    %183 = arith.cmpf ogt, %181, %182 : vector<8x1xf32>
    %cst_72 = arith.constant 6.250000e+02 : f32
    %184 = vector.broadcast %cst_72 : f32 to vector<8x1xf32>
    %185 = arith.divf %184, %181 : vector<8x1xf32>
    %cst_73 = arith.constant 1.000000e+00 : f32
    %186 = vector.broadcast %cst_73 : f32 to vector<8x1xf32>
    %187 = arith.select %183, %185, %186 : vector<8x1xi1>, vector<8x1xf32>
    %188 = vector.broadcast %187 : vector<8x1xf32> to vector<8x32xf32>
    %189 = arith.mulf %178, %188 : vector<8x32xf32>
    %190 = arith.index_cast %c1_i32 : i32 to index
    %c0_74 = arith.constant 0 : index
    %c0_75 = arith.constant 0 : index
    %191 = vector.load %arg8[%190, %c0_74, %c0_75] : memref<8x8x32xf32, #tpu.memory_space<vmem>>, vector<1x8x32xf32>
    %192 = vector.shape_cast %191 : vector<1x8x32xf32> to vector<8x32xf32>
    %193 = vector.shape_cast %189 : vector<8x32xf32> to vector<1x8x32xf32>
    tpu.vector_store %arg8[%190, %c0_74, %c0_75], %193 {strides = array<i32>} : memref<8x8x32xf32, #tpu.memory_space<vmem>>, vector<1x8x32xf32>,
    %c2_i32 = arith.constant 2 : i32
    %194 = arith.index_cast %c2_i32 : i32 to index
    %c0_76 = arith.constant 0 : index
    %c0_77 = arith.constant 0 : index
    %195 = vector.load %arg2[%194, %c0_76, %c0_77] : memref<8x8x32xf32, #tpu.memory_space<vmem>>, vector<1x8x32xf32>
    %196 = vector.shape_cast %195 : vector<1x8x32xf32> to vector<8x32xf32>
    %cst_78 = arith.constant dense<0.000000e+00> : vector<8x64xf32>
    %197 = tpu.matmul %196, %0, %cst_78 {dimension_numbers = #tpu.dot_dimension_numbers<[1], [0], [0], [1], [0, 0, 1, 1], [], []>} : vector<8x32xf32>, vector<32x64xf32>, vector<8x64xf32> -> vector<8x64xf32>
    %198 = vector.broadcast %1 : vector<1x64xf32> to vector<8x64xf32>
    %199 = arith.addf %197, %198 : vector<8x64xf32>
    %cst_79 = arith.constant dense<0.000000e+00> : vector<8x64xf32>
    %200 = tpu.matmul %189, %2, %cst_79 {dimension_numbers = #tpu.dot_dimension_numbers<[1], [0], [0], [1], [0, 0, 1, 1], [], []>} : vector<8x32xf32>, vector<32x64xf32>, vector<8x64xf32> -> vector<8x64xf32>
    %201 = arith.addf %199, %200 : vector<8x64xf32>
    %202 = vector.extract_strided_slice %201 {offsets = [0, 0], sizes = [8, 32], strides = [1, 1]} : vector<8x64xf32> to vector<8x32xf32>
    %cst_80 = arith.constant 0.000000e+00 : f32
    %203 = vector.broadcast %cst_80 : f32 to vector<8x32xf32>
    %204 = arith.subf %203, %202 : vector<8x32xf32>
    %205 = math.exp %204 : vector<8x32xf32>
    %cst_81 = arith.constant 1.000000e+00 : f32
    %206 = vector.broadcast %cst_81 : f32 to vector<8x32xf32>
    %207 = arith.addf %206, %205 : vector<8x32xf32>
    %cst_82 = arith.constant 1.000000e+00 : f32
    %208 = vector.broadcast %cst_82 : f32 to vector<8x32xf32>
    %209 = arith.divf %208, %207 : vector<8x32xf32>
    %210 = vector.extract_strided_slice %201 {offsets = [0, 32], sizes = [8, 32], strides = [1, 1]} : vector<8x64xf32> to vector<8x32xf32>
    %211 = math.tanh %210 : vector<8x32xf32>
    %212 = arith.mulf %209, %211 : vector<8x32xf32>
    %cst_83 = arith.constant 1.000000e+00 : f32
    %213 = vector.broadcast %cst_83 : f32 to vector<8x32xf32>
    %214 = arith.subf %213, %209 : vector<8x32xf32>
    %215 = arith.mulf %214, %189 : vector<8x32xf32>
    %216 = arith.addf %212, %215 : vector<8x32xf32>
    %cst_84 = arith.constant dense<0.000000e+00> : vector<8x128xf32>
    %217 = tpu.matmul %216, %3, %cst_84 {dimension_numbers = #tpu.dot_dimension_numbers<[1], [0], [0], [1], [0, 0, 1, 1], [], []>} : vector<8x32xf32>, vector<32x128xf32>, vector<8x128xf32> -> vector<8x128xf32>
    %218 = vector.extract_strided_slice %217 {offsets = [0, 0], sizes = [8, 32], strides = [1, 1]} : vector<8x128xf32> to vector<8x32xf32>
    %cst_85 = arith.constant 0.000000e+00 : f32
    %219 = vector.broadcast %cst_85 : f32 to vector<8x32xf32>
    %220 = arith.subf %219, %218 : vector<8x32xf32>
    %221 = math.exp %220 : vector<8x32xf32>
    %cst_86 = arith.constant 1.000000e+00 : f32
    %222 = vector.broadcast %cst_86 : f32 to vector<8x32xf32>
    %223 = arith.addf %222, %221 : vector<8x32xf32>
    %cst_87 = arith.constant 1.000000e+00 : f32
    %224 = vector.broadcast %cst_87 : f32 to vector<8x32xf32>
    %225 = arith.divf %224, %223 : vector<8x32xf32>
    %226 = vector.extract_strided_slice %217 {offsets = [0, 32], sizes = [8, 32], strides = [1, 1]} : vector<8x128xf32> to vector<8x32xf32>
    %cst_88 = arith.constant 0.000000e+00 : f32
    %227 = vector.broadcast %cst_88 : f32 to vector<8x32xf32>
    %228 = arith.maximumf %226, %227 : vector<8x32xf32>
    %229 = arith.mulf %225, %228 : vector<8x32xf32>
    %cst_89 = arith.constant 1.000000e+00 : f32
    %230 = vector.broadcast %cst_89 : f32 to vector<8x32xf32>
    %231 = arith.subf %230, %225 : vector<8x32xf32>
    %232 = arith.mulf %231, %216 : vector<8x32xf32>
    %233 = arith.addf %229, %232 : vector<8x32xf32>
    %234 = vector.extract_strided_slice %217 {offsets = [0, 64], sizes = [8, 32], strides = [1, 1]} : vector<8x128xf32> to vector<8x32xf32>
    %cst_90 = arith.constant 0.000000e+00 : f32
    %235 = vector.broadcast %cst_90 : f32 to vector<8x32xf32>
    %236 = arith.subf %235, %234 : vector<8x32xf32>
    %237 = math.exp %236 : vector<8x32xf32>
    %cst_91 = arith.constant 1.000000e+00 : f32
    %238 = vector.broadcast %cst_91 : f32 to vector<8x32xf32>
    %239 = arith.addf %238, %237 : vector<8x32xf32>
    %cst_92 = arith.constant 1.000000e+00 : f32
    %240 = vector.broadcast %cst_92 : f32 to vector<8x32xf32>
    %241 = arith.divf %240, %239 : vector<8x32xf32>
    %242 = vector.extract_strided_slice %217 {offsets = [0, 96], sizes = [8, 32], strides = [1, 1]} : vector<8x128xf32> to vector<8x32xf32>
    %cst_93 = arith.constant 0.000000e+00 : f32
    %243 = vector.broadcast %cst_93 : f32 to vector<8x32xf32>
    %244 = arith.subf %243, %242 : vector<8x32xf32>
    %245 = math.exp %244 : vector<8x32xf32>
    %cst_94 = arith.constant 1.000000e+00 : f32
    %246 = vector.broadcast %cst_94 : f32 to vector<8x32xf32>
    %247 = arith.addf %246, %245 : vector<8x32xf32>
    %cst_95 = arith.constant 1.000000e+00 : f32
    %248 = vector.broadcast %cst_95 : f32 to vector<8x32xf32>
    %249 = arith.divf %248, %247 : vector<8x32xf32>
    %250 = arith.mulf %241, %249 : vector<8x32xf32>
    %cst_96 = arith.constant 1.000000e+00 : f32
    %251 = vector.broadcast %cst_96 : f32 to vector<8x32xf32>
    %252 = arith.subf %251, %241 : vector<8x32xf32>
    %253 = arith.mulf %252, %216 : vector<8x32xf32>
    %254 = arith.addf %250, %253 : vector<8x32xf32>
    %cst_97 = arith.constant dense<0.000000e+00> : vector<8x64xf32>
    %255 = tpu.matmul %233, %4, %cst_97 {dimension_numbers = #tpu.dot_dimension_numbers<[1], [0], [0], [1], [0, 0, 1, 1], [], []>} : vector<8x32xf32>, vector<32x64xf32>, vector<8x64xf32> -> vector<8x64xf32>
    %256 = vector.extract_strided_slice %255 {offsets = [0, 0], sizes = [8, 32], strides = [1, 1]} : vector<8x64xf32> to vector<8x32xf32>
    %cst_98 = arith.constant 0.000000e+00 : f32
    %257 = vector.broadcast %cst_98 : f32 to vector<8x32xf32>
    %258 = arith.subf %257, %256 : vector<8x32xf32>
    %259 = math.exp %258 : vector<8x32xf32>
    %cst_99 = arith.constant 1.000000e+00 : f32
    %260 = vector.broadcast %cst_99 : f32 to vector<8x32xf32>
    %261 = arith.addf %260, %259 : vector<8x32xf32>
    %cst_100 = arith.constant 1.000000e+00 : f32
    %262 = vector.broadcast %cst_100 : f32 to vector<8x32xf32>
    %263 = arith.divf %262, %261 : vector<8x32xf32>
    %264 = vector.extract_strided_slice %255 {offsets = [0, 32], sizes = [8, 32], strides = [1, 1]} : vector<8x64xf32> to vector<8x32xf32>
    %265 = arith.mulf %263, %264 : vector<8x32xf32>
    %cst_101 = arith.constant 1.000000e+00 : f32
    %266 = vector.broadcast %cst_101 : f32 to vector<8x32xf32>
    %267 = arith.subf %266, %263 : vector<8x32xf32>
    %268 = arith.mulf %267, %233 : vector<8x32xf32>
    %269 = arith.addf %265, %268 : vector<8x32xf32>
    %270 = arith.addf %254, %269 : vector<8x32xf32>
    %cst_102 = arith.constant 5.000000e-01 : f32
    %271 = vector.broadcast %cst_102 : f32 to vector<8x32xf32>
    %272 = arith.mulf %270, %271 : vector<8x32xf32>
    %273 = arith.mulf %272, %272 : vector<8x32xf32>
    %cst_103 = arith.constant dense<0.000000e+00> : vector<8xf32>
    %274 = vector.multi_reduction <add>, %273, %cst_103 [1] : vector<8x32xf32> to vector<8xf32>
    %275 = vector.shape_cast %274 : vector<8xf32> to vector<8x1xf32>
    %cst_104 = arith.constant 6.250000e+02 : f32
    %276 = vector.broadcast %cst_104 : f32 to vector<8x1xf32>
    %277 = arith.cmpf ogt, %275, %276 : vector<8x1xf32>
    %cst_105 = arith.constant 6.250000e+02 : f32
    %278 = vector.broadcast %cst_105 : f32 to vector<8x1xf32>
    %279 = arith.divf %278, %275 : vector<8x1xf32>
    %cst_106 = arith.constant 1.000000e+00 : f32
    %280 = vector.broadcast %cst_106 : f32 to vector<8x1xf32>
    %281 = arith.select %277, %279, %280 : vector<8x1xi1>, vector<8x1xf32>
    %282 = vector.broadcast %281 : vector<8x1xf32> to vector<8x32xf32>
    %283 = arith.mulf %272, %282 : vector<8x32xf32>
    %284 = arith.index_cast %c2_i32 : i32 to index
    %c0_107 = arith.constant 0 : index
    %c0_108 = arith.constant 0 : index
    %285 = vector.load %arg8[%284, %c0_107, %c0_108] : memref<8x8x32xf32, #tpu.memory_space<vmem>>, vector<1x8x32xf32>
    %286 = vector.shape_cast %285 : vector<1x8x32xf32> to vector<8x32xf32>
    %287 = vector.shape_cast %283 : vector<8x32xf32> to vector<1x8x32xf32>
    tpu.vector_store %arg8[%284, %c0_107, %c0_108], %287 {strides = array<i32>} : memref<8x8x32xf32, #tpu.memory_space<vmem>>, vector<1x8x32xf32>,
    %c3_i32 = arith.constant 3 : i32
    %288 = arith.index_cast %c3_i32 : i32 to index
    %c0_109 = arith.constant 0 : index
    %c0_110 = arith.constant 0 : index
    %289 = vector.load %arg2[%288, %c0_109, %c0_110] : memref<8x8x32xf32, #tpu.memory_space<vmem>>, vector<1x8x32xf32>
    %290 = vector.shape_cast %289 : vector<1x8x32xf32> to vector<8x32xf32>
    %cst_111 = arith.constant dense<0.000000e+00> : vector<8x64xf32>
    %291 = tpu.matmul %290, %0, %cst_111 {dimension_numbers = #tpu.dot_dimension_numbers<[1], [0], [0], [1], [0, 0, 1, 1], [], []>} : vector<8x32xf32>, vector<32x64xf32>, vector<8x64xf32> -> vector<8x64xf32>
    %292 = vector.broadcast %1 : vector<1x64xf32> to vector<8x64xf32>
    %293 = arith.addf %291, %292 : vector<8x64xf32>
    %cst_112 = arith.constant dense<0.000000e+00> : vector<8x64xf32>
    %294 = tpu.matmul %283, %2, %cst_112 {dimension_numbers = #tpu.dot_dimension_numbers<[1], [0], [0], [1], [0, 0, 1, 1], [], []>} : vector<8x32xf32>, vector<32x64xf32>, vector<8x64xf32> -> vector<8x64xf32>
    %295 = arith.addf %293, %294 : vector<8x64xf32>
    %296 = vector.extract_strided_slice %295 {offsets = [0, 0], sizes = [8, 32], strides = [1, 1]} : vector<8x64xf32> to vector<8x32xf32>
    %cst_113 = arith.constant 0.000000e+00 : f32
    %297 = vector.broadcast %cst_113 : f32 to vector<8x32xf32>
    %298 = arith.subf %297, %296 : vector<8x32xf32>
    %299 = math.exp %298 : vector<8x32xf32>
    %cst_114 = arith.constant 1.000000e+00 : f32
    %300 = vector.broadcast %cst_114 : f32 to vector<8x32xf32>
    %301 = arith.addf %300, %299 : vector<8x32xf32>
    %cst_115 = arith.constant 1.000000e+00 : f32
    %302 = vector.broadcast %cst_115 : f32 to vector<8x32xf32>
    %303 = arith.divf %302, %301 : vector<8x32xf32>
    %304 = vector.extract_strided_slice %295 {offsets = [0, 32], sizes = [8, 32], strides = [1, 1]} : vector<8x64xf32> to vector<8x32xf32>
    %305 = math.tanh %304 : vector<8x32xf32>
    %306 = arith.mulf %303, %305 : vector<8x32xf32>
    %cst_116 = arith.constant 1.000000e+00 : f32
    %307 = vector.broadcast %cst_116 : f32 to vector<8x32xf32>
    %308 = arith.subf %307, %303 : vector<8x32xf32>
    %309 = arith.mulf %308, %283 : vector<8x32xf32>
    %310 = arith.addf %306, %309 : vector<8x32xf32>
    %cst_117 = arith.constant dense<0.000000e+00> : vector<8x128xf32>
    %311 = tpu.matmul %310, %3, %cst_117 {dimension_numbers = #tpu.dot_dimension_numbers<[1], [0], [0], [1], [0, 0, 1, 1], [], []>} : vector<8x32xf32>, vector<32x128xf32>, vector<8x128xf32> -> vector<8x128xf32>
    %312 = vector.extract_strided_slice %311 {offsets = [0, 0], sizes = [8, 32], strides = [1, 1]} : vector<8x128xf32> to vector<8x32xf32>
    %cst_118 = arith.constant 0.000000e+00 : f32
    %313 = vector.broadcast %cst_118 : f32 to vector<8x32xf32>
    %314 = arith.subf %313, %312 : vector<8x32xf32>
    %315 = math.exp %314 : vector<8x32xf32>
    %cst_119 = arith.constant 1.000000e+00 : f32
    %316 = vector.broadcast %cst_119 : f32 to vector<8x32xf32>
    %317 = arith.addf %316, %315 : vector<8x32xf32>
    %cst_120 = arith.constant 1.000000e+00 : f32
    %318 = vector.broadcast %cst_120 : f32 to vector<8x32xf32>
    %319 = arith.divf %318, %317 : vector<8x32xf32>
    %320 = vector.extract_strided_slice %311 {offsets = [0, 32], sizes = [8, 32], strides = [1, 1]} : vector<8x128xf32> to vector<8x32xf32>
    %cst_121 = arith.constant 0.000000e+00 : f32
    %321 = vector.broadcast %cst_121 : f32 to vector<8x32xf32>
    %322 = arith.maximumf %320, %321 : vector<8x32xf32>
    %323 = arith.mulf %319, %322 : vector<8x32xf32>
    %cst_122 = arith.constant 1.000000e+00 : f32
    %324 = vector.broadcast %cst_122 : f32 to vector<8x32xf32>
    %325 = arith.subf %324, %319 : vector<8x32xf32>
    %326 = arith.mulf %325, %310 : vector<8x32xf32>
    %327 = arith.addf %323, %326 : vector<8x32xf32>
    %328 = vector.extract_strided_slice %311 {offsets = [0, 64], sizes = [8, 32], strides = [1, 1]} : vector<8x128xf32> to vector<8x32xf32>
    %cst_123 = arith.constant 0.000000e+00 : f32
    %329 = vector.broadcast %cst_123 : f32 to vector<8x32xf32>
    %330 = arith.subf %329, %328 : vector<8x32xf32>
    %331 = math.exp %330 : vector<8x32xf32>
    %cst_124 = arith.constant 1.000000e+00 : f32
    %332 = vector.broadcast %cst_124 : f32 to vector<8x32xf32>
    %333 = arith.addf %332, %331 : vector<8x32xf32>
    %cst_125 = arith.constant 1.000000e+00 : f32
    %334 = vector.broadcast %cst_125 : f32 to vector<8x32xf32>
    %335 = arith.divf %334, %333 : vector<8x32xf32>
    %336 = vector.extract_strided_slice %311 {offsets = [0, 96], sizes = [8, 32], strides = [1, 1]} : vector<8x128xf32> to vector<8x32xf32>
    %cst_126 = arith.constant 0.000000e+00 : f32
    %337 = vector.broadcast %cst_126 : f32 to vector<8x32xf32>
    %338 = arith.subf %337, %336 : vector<8x32xf32>
    %339 = math.exp %338 : vector<8x32xf32>
    %cst_127 = arith.constant 1.000000e+00 : f32
    %340 = vector.broadcast %cst_127 : f32 to vector<8x32xf32>
    %341 = arith.addf %340, %339 : vector<8x32xf32>
    %cst_128 = arith.constant 1.000000e+00 : f32
    %342 = vector.broadcast %cst_128 : f32 to vector<8x32xf32>
    %343 = arith.divf %342, %341 : vector<8x32xf32>
    %344 = arith.mulf %335, %343 : vector<8x32xf32>
    %cst_129 = arith.constant 1.000000e+00 : f32
    %345 = vector.broadcast %cst_129 : f32 to vector<8x32xf32>
    %346 = arith.subf %345, %335 : vector<8x32xf32>
    %347 = arith.mulf %346, %310 : vector<8x32xf32>
    %348 = arith.addf %344, %347 : vector<8x32xf32>
    %cst_130 = arith.constant dense<0.000000e+00> : vector<8x64xf32>
    %349 = tpu.matmul %327, %4, %cst_130 {dimension_numbers = #tpu.dot_dimension_numbers<[1], [0], [0], [1], [0, 0, 1, 1], [], []>} : vector<8x32xf32>, vector<32x64xf32>, vector<8x64xf32> -> vector<8x64xf32>
    %350 = vector.extract_strided_slice %349 {offsets = [0, 0], sizes = [8, 32], strides = [1, 1]} : vector<8x64xf32> to vector<8x32xf32>
    %cst_131 = arith.constant 0.000000e+00 : f32
    %351 = vector.broadcast %cst_131 : f32 to vector<8x32xf32>
    %352 = arith.subf %351, %350 : vector<8x32xf32>
    %353 = math.exp %352 : vector<8x32xf32>
    %cst_132 = arith.constant 1.000000e+00 : f32
    %354 = vector.broadcast %cst_132 : f32 to vector<8x32xf32>
    %355 = arith.addf %354, %353 : vector<8x32xf32>
    %cst_133 = arith.constant 1.000000e+00 : f32
    %356 = vector.broadcast %cst_133 : f32 to vector<8x32xf32>
    %357 = arith.divf %356, %355 : vector<8x32xf32>
    %358 = vector.extract_strided_slice %349 {offsets = [0, 32], sizes = [8, 32], strides = [1, 1]} : vector<8x64xf32> to vector<8x32xf32>
    %359 = arith.mulf %357, %358 : vector<8x32xf32>
    %cst_134 = arith.constant 1.000000e+00 : f32
    %360 = vector.broadcast %cst_134 : f32 to vector<8x32xf32>
    %361 = arith.subf %360, %357 : vector<8x32xf32>
    %362 = arith.mulf %361, %327 : vector<8x32xf32>
    %363 = arith.addf %359, %362 : vector<8x32xf32>
    %364 = arith.addf %348, %363 : vector<8x32xf32>
    %cst_135 = arith.constant 5.000000e-01 : f32
    %365 = vector.broadcast %cst_135 : f32 to vector<8x32xf32>
    %366 = arith.mulf %364, %365 : vector<8x32xf32>
    %367 = arith.mulf %366, %366 : vector<8x32xf32>
    %cst_136 = arith.constant dense<0.000000e+00> : vector<8xf32>
    %368 = vector.multi_reduction <add>, %367, %cst_136 [1] : vector<8x32xf32> to vector<8xf32>
    %369 = vector.shape_cast %368 : vector<8xf32> to vector<8x1xf32>
    %cst_137 = arith.constant 6.250000e+02 : f32
    %370 = vector.broadcast %cst_137 : f32 to vector<8x1xf32>
    %371 = arith.cmpf ogt, %369, %370 : vector<8x1xf32>
    %cst_138 = arith.constant 6.250000e+02 : f32
    %372 = vector.broadcast %cst_138 : f32 to vector<8x1xf32>
    %373 = arith.divf %372, %369 : vector<8x1xf32>
    %cst_139 = arith.constant 1.000000e+00 : f32
    %374 = vector.broadcast %cst_139 : f32 to vector<8x1xf32>
    %375 = arith.select %371, %373, %374 : vector<8x1xi1>, vector<8x1xf32>
    %376 = vector.broadcast %375 : vector<8x1xf32> to vector<8x32xf32>
    %377 = arith.mulf %366, %376 : vector<8x32xf32>
    %378 = arith.index_cast %c3_i32 : i32 to index
    %c0_140 = arith.constant 0 : index
    %c0_141 = arith.constant 0 : index
    %379 = vector.load %arg8[%378, %c0_140, %c0_141] : memref<8x8x32xf32, #tpu.memory_space<vmem>>, vector<1x8x32xf32>
    %380 = vector.shape_cast %379 : vector<1x8x32xf32> to vector<8x32xf32>
    %381 = vector.shape_cast %377 : vector<8x32xf32> to vector<1x8x32xf32>
    tpu.vector_store %arg8[%378, %c0_140, %c0_141], %381 {strides = array<i32>} : memref<8x8x32xf32, #tpu.memory_space<vmem>>, vector<1x8x32xf32>,
    %c4_i32 = arith.constant 4 : i32
    %382 = arith.index_cast %c4_i32 : i32 to index
    %c0_142 = arith.constant 0 : index
    %c0_143 = arith.constant 0 : index
    %383 = vector.load %arg2[%382, %c0_142, %c0_143] : memref<8x8x32xf32, #tpu.memory_space<vmem>>, vector<1x8x32xf32>
    %384 = vector.shape_cast %383 : vector<1x8x32xf32> to vector<8x32xf32>
    %cst_144 = arith.constant dense<0.000000e+00> : vector<8x64xf32>
    %385 = tpu.matmul %384, %0, %cst_144 {dimension_numbers = #tpu.dot_dimension_numbers<[1], [0], [0], [1], [0, 0, 1, 1], [], []>} : vector<8x32xf32>, vector<32x64xf32>, vector<8x64xf32> -> vector<8x64xf32>
    %386 = vector.broadcast %1 : vector<1x64xf32> to vector<8x64xf32>
    %387 = arith.addf %385, %386 : vector<8x64xf32>
    %cst_145 = arith.constant dense<0.000000e+00> : vector<8x64xf32>
    %388 = tpu.matmul %377, %2, %cst_145 {dimension_numbers = #tpu.dot_dimension_numbers<[1], [0], [0], [1], [0, 0, 1, 1], [], []>} : vector<8x32xf32>, vector<32x64xf32>, vector<8x64xf32> -> vector<8x64xf32>
    %389 = arith.addf %387, %388 : vector<8x64xf32>
    %390 = vector.extract_strided_slice %389 {offsets = [0, 0], sizes = [8, 32], strides = [1, 1]} : vector<8x64xf32> to vector<8x32xf32>
    %cst_146 = arith.constant 0.000000e+00 : f32
    %391 = vector.broadcast %cst_146 : f32 to vector<8x32xf32>
    %392 = arith.subf %391, %390 : vector<8x32xf32>
    %393 = math.exp %392 : vector<8x32xf32>
    %cst_147 = arith.constant 1.000000e+00 : f32
    %394 = vector.broadcast %cst_147 : f32 to vector<8x32xf32>
    %395 = arith.addf %394, %393 : vector<8x32xf32>
    %cst_148 = arith.constant 1.000000e+00 : f32
    %396 = vector.broadcast %cst_148 : f32 to vector<8x32xf32>
    %397 = arith.divf %396, %395 : vector<8x32xf32>
    %398 = vector.extract_strided_slice %389 {offsets = [0, 32], sizes = [8, 32], strides = [1, 1]} : vector<8x64xf32> to vector<8x32xf32>
    %399 = math.tanh %398 : vector<8x32xf32>
    %400 = arith.mulf %397, %399 : vector<8x32xf32>
    %cst_149 = arith.constant 1.000000e+00 : f32
    %401 = vector.broadcast %cst_149 : f32 to vector<8x32xf32>
    %402 = arith.subf %401, %397 : vector<8x32xf32>
    %403 = arith.mulf %402, %377 : vector<8x32xf32>
    %404 = arith.addf %400, %403 : vector<8x32xf32>
    %cst_150 = arith.constant dense<0.000000e+00> : vector<8x128xf32>
    %405 = tpu.matmul %404, %3, %cst_150 {dimension_numbers = #tpu.dot_dimension_numbers<[1], [0], [0], [1], [0, 0, 1, 1], [], []>} : vector<8x32xf32>, vector<32x128xf32>, vector<8x128xf32> -> vector<8x128xf32>
    %406 = vector.extract_strided_slice %405 {offsets = [0, 0], sizes = [8, 32], strides = [1, 1]} : vector<8x128xf32> to vector<8x32xf32>
    %cst_151 = arith.constant 0.000000e+00 : f32
    %407 = vector.broadcast %cst_151 : f32 to vector<8x32xf32>
    %408 = arith.subf %407, %406 : vector<8x32xf32>
    %409 = math.exp %408 : vector<8x32xf32>
    %cst_152 = arith.constant 1.000000e+00 : f32
    %410 = vector.broadcast %cst_152 : f32 to vector<8x32xf32>
    %411 = arith.addf %410, %409 : vector<8x32xf32>
    %cst_153 = arith.constant 1.000000e+00 : f32
    %412 = vector.broadcast %cst_153 : f32 to vector<8x32xf32>
    %413 = arith.divf %412, %411 : vector<8x32xf32>
    %414 = vector.extract_strided_slice %405 {offsets = [0, 32], sizes = [8, 32], strides = [1, 1]} : vector<8x128xf32> to vector<8x32xf32>
    %cst_154 = arith.constant 0.000000e+00 : f32
    %415 = vector.broadcast %cst_154 : f32 to vector<8x32xf32>
    %416 = arith.maximumf %414, %415 : vector<8x32xf32>
    %417 = arith.mulf %413, %416 : vector<8x32xf32>
    %cst_155 = arith.constant 1.000000e+00 : f32
    %418 = vector.broadcast %cst_155 : f32 to vector<8x32xf32>
    %419 = arith.subf %418, %413 : vector<8x32xf32>
    %420 = arith.mulf %419, %404 : vector<8x32xf32>
    %421 = arith.addf %417, %420 : vector<8x32xf32>
    %422 = vector.extract_strided_slice %405 {offsets = [0, 64], sizes = [8, 32], strides = [1, 1]} : vector<8x128xf32> to vector<8x32xf32>
    %cst_156 = arith.constant 0.000000e+00 : f32
    %423 = vector.broadcast %cst_156 : f32 to vector<8x32xf32>
    %424 = arith.subf %423, %422 : vector<8x32xf32>
    %425 = math.exp %424 : vector<8x32xf32>
    %cst_157 = arith.constant 1.000000e+00 : f32
    %426 = vector.broadcast %cst_157 : f32 to vector<8x32xf32>
    %427 = arith.addf %426, %425 : vector<8x32xf32>
    %cst_158 = arith.constant 1.000000e+00 : f32
    %428 = vector.broadcast %cst_158 : f32 to vector<8x32xf32>
    %429 = arith.divf %428, %427 : vector<8x32xf32>
    %430 = vector.extract_strided_slice %405 {offsets = [0, 96], sizes = [8, 32], strides = [1, 1]} : vector<8x128xf32> to vector<8x32xf32>
    %cst_159 = arith.constant 0.000000e+00 : f32
    %431 = vector.broadcast %cst_159 : f32 to vector<8x32xf32>
    %432 = arith.subf %431, %430 : vector<8x32xf32>
    %433 = math.exp %432 : vector<8x32xf32>
    %cst_160 = arith.constant 1.000000e+00 : f32
    %434 = vector.broadcast %cst_160 : f32 to vector<8x32xf32>
    %435 = arith.addf %434, %433 : vector<8x32xf32>
    %cst_161 = arith.constant 1.000000e+00 : f32
    %436 = vector.broadcast %cst_161 : f32 to vector<8x32xf32>
    %437 = arith.divf %436, %435 : vector<8x32xf32>
    %438 = arith.mulf %429, %437 : vector<8x32xf32>
    %cst_162 = arith.constant 1.000000e+00 : f32
    %439 = vector.broadcast %cst_162 : f32 to vector<8x32xf32>
    %440 = arith.subf %439, %429 : vector<8x32xf32>
    %441 = arith.mulf %440, %404 : vector<8x32xf32>
    %442 = arith.addf %438, %441 : vector<8x32xf32>
    %cst_163 = arith.constant dense<0.000000e+00> : vector<8x64xf32>
    %443 = tpu.matmul %421, %4, %cst_163 {dimension_numbers = #tpu.dot_dimension_numbers<[1], [0], [0], [1], [0, 0, 1, 1], [], []>} : vector<8x32xf32>, vector<32x64xf32>, vector<8x64xf32> -> vector<8x64xf32>
    %444 = vector.extract_strided_slice %443 {offsets = [0, 0], sizes = [8, 32], strides = [1, 1]} : vector<8x64xf32> to vector<8x32xf32>
    %cst_164 = arith.constant 0.000000e+00 : f32
    %445 = vector.broadcast %cst_164 : f32 to vector<8x32xf32>
    %446 = arith.subf %445, %444 : vector<8x32xf32>
    %447 = math.exp %446 : vector<8x32xf32>
    %cst_165 = arith.constant 1.000000e+00 : f32
    %448 = vector.broadcast %cst_165 : f32 to vector<8x32xf32>
    %449 = arith.addf %448, %447 : vector<8x32xf32>
    %cst_166 = arith.constant 1.000000e+00 : f32
    %450 = vector.broadcast %cst_166 : f32 to vector<8x32xf32>
    %451 = arith.divf %450, %449 : vector<8x32xf32>
    %452 = vector.extract_strided_slice %443 {offsets = [0, 32], sizes = [8, 32], strides = [1, 1]} : vector<8x64xf32> to vector<8x32xf32>
    %453 = arith.mulf %451, %452 : vector<8x32xf32>
    %cst_167 = arith.constant 1.000000e+00 : f32
    %454 = vector.broadcast %cst_167 : f32 to vector<8x32xf32>
    %455 = arith.subf %454, %451 : vector<8x32xf32>
    %456 = arith.mulf %455, %421 : vector<8x32xf32>
    %457 = arith.addf %453, %456 : vector<8x32xf32>
    %458 = arith.addf %442, %457 : vector<8x32xf32>
    %cst_168 = arith.constant 5.000000e-01 : f32
    %459 = vector.broadcast %cst_168 : f32 to vector<8x32xf32>
    %460 = arith.mulf %458, %459 : vector<8x32xf32>
    %461 = arith.mulf %460, %460 : vector<8x32xf32>
    %cst_169 = arith.constant dense<0.000000e+00> : vector<8xf32>
    %462 = vector.multi_reduction <add>, %461, %cst_169 [1] : vector<8x32xf32> to vector<8xf32>
    %463 = vector.shape_cast %462 : vector<8xf32> to vector<8x1xf32>
    %cst_170 = arith.constant 6.250000e+02 : f32
    %464 = vector.broadcast %cst_170 : f32 to vector<8x1xf32>
    %465 = arith.cmpf ogt, %463, %464 : vector<8x1xf32>
    %cst_171 = arith.constant 6.250000e+02 : f32
    %466 = vector.broadcast %cst_171 : f32 to vector<8x1xf32>
    %467 = arith.divf %466, %463 : vector<8x1xf32>
    %cst_172 = arith.constant 1.000000e+00 : f32
    %468 = vector.broadcast %cst_172 : f32 to vector<8x1xf32>
    %469 = arith.select %465, %467, %468 : vector<8x1xi1>, vector<8x1xf32>
    %470 = vector.broadcast %469 : vector<8x1xf32> to vector<8x32xf32>
    %471 = arith.mulf %460, %470 : vector<8x32xf32>
    %472 = arith.index_cast %c4_i32 : i32 to index
    %c0_173 = arith.constant 0 : index
    %c0_174 = arith.constant 0 : index
    %473 = vector.load %arg8[%472, %c0_173, %c0_174] : memref<8x8x32xf32, #tpu.memory_space<vmem>>, vector<1x8x32xf32>
    %474 = vector.shape_cast %473 : vector<1x8x32xf32> to vector<8x32xf32>
    %475 = vector.shape_cast %471 : vector<8x32xf32> to vector<1x8x32xf32>
    tpu.vector_store %arg8[%472, %c0_173, %c0_174], %475 {strides = array<i32>} : memref<8x8x32xf32, #tpu.memory_space<vmem>>, vector<1x8x32xf32>,
    %c5_i32 = arith.constant 5 : i32
    %476 = arith.index_cast %c5_i32 : i32 to index
    %c0_175 = arith.constant 0 : index
    %c0_176 = arith.constant 0 : index
    %477 = vector.load %arg2[%476, %c0_175, %c0_176] : memref<8x8x32xf32, #tpu.memory_space<vmem>>, vector<1x8x32xf32>
    %478 = vector.shape_cast %477 : vector<1x8x32xf32> to vector<8x32xf32>
    %cst_177 = arith.constant dense<0.000000e+00> : vector<8x64xf32>
    %479 = tpu.matmul %478, %0, %cst_177 {dimension_numbers = #tpu.dot_dimension_numbers<[1], [0], [0], [1], [0, 0, 1, 1], [], []>} : vector<8x32xf32>, vector<32x64xf32>, vector<8x64xf32> -> vector<8x64xf32>
    %480 = vector.broadcast %1 : vector<1x64xf32> to vector<8x64xf32>
    %481 = arith.addf %479, %480 : vector<8x64xf32>
    %cst_178 = arith.constant dense<0.000000e+00> : vector<8x64xf32>
    %482 = tpu.matmul %471, %2, %cst_178 {dimension_numbers = #tpu.dot_dimension_numbers<[1], [0], [0], [1], [0, 0, 1, 1], [], []>} : vector<8x32xf32>, vector<32x64xf32>, vector<8x64xf32> -> vector<8x64xf32>
    %483 = arith.addf %481, %482 : vector<8x64xf32>
    %484 = vector.extract_strided_slice %483 {offsets = [0, 0], sizes = [8, 32], strides = [1, 1]} : vector<8x64xf32> to vector<8x32xf32>
    %cst_179 = arith.constant 0.000000e+00 : f32
    %485 = vector.broadcast %cst_179 : f32 to vector<8x32xf32>
    %486 = arith.subf %485, %484 : vector<8x32xf32>
    %487 = math.exp %486 : vector<8x32xf32>
    %cst_180 = arith.constant 1.000000e+00 : f32
    %488 = vector.broadcast %cst_180 : f32 to vector<8x32xf32>
    %489 = arith.addf %488, %487 : vector<8x32xf32>
    %cst_181 = arith.constant 1.000000e+00 : f32
    %490 = vector.broadcast %cst_181 : f32 to vector<8x32xf32>
    %491 = arith.divf %490, %489 : vector<8x32xf32>
    %492 = vector.extract_strided_slice %483 {offsets = [0, 32], sizes = [8, 32], strides = [1, 1]} : vector<8x64xf32> to vector<8x32xf32>
    %493 = math.tanh %492 : vector<8x32xf32>
    %494 = arith.mulf %491, %493 : vector<8x32xf32>
    %cst_182 = arith.constant 1.000000e+00 : f32
    %495 = vector.broadcast %cst_182 : f32 to vector<8x32xf32>
    %496 = arith.subf %495, %491 : vector<8x32xf32>
    %497 = arith.mulf %496, %471 : vector<8x32xf32>
    %498 = arith.addf %494, %497 : vector<8x32xf32>
    %cst_183 = arith.constant dense<0.000000e+00> : vector<8x128xf32>
    %499 = tpu.matmul %498, %3, %cst_183 {dimension_numbers = #tpu.dot_dimension_numbers<[1], [0], [0], [1], [0, 0, 1, 1], [], []>} : vector<8x32xf32>, vector<32x128xf32>, vector<8x128xf32> -> vector<8x128xf32>
    %500 = vector.extract_strided_slice %499 {offsets = [0, 0], sizes = [8, 32], strides = [1, 1]} : vector<8x128xf32> to vector<8x32xf32>
    %cst_184 = arith.constant 0.000000e+00 : f32
    %501 = vector.broadcast %cst_184 : f32 to vector<8x32xf32>
    %502 = arith.subf %501, %500 : vector<8x32xf32>
    %503 = math.exp %502 : vector<8x32xf32>
    %cst_185 = arith.constant 1.000000e+00 : f32
    %504 = vector.broadcast %cst_185 : f32 to vector<8x32xf32>
    %505 = arith.addf %504, %503 : vector<8x32xf32>
    %cst_186 = arith.constant 1.000000e+00 : f32
    %506 = vector.broadcast %cst_186 : f32 to vector<8x32xf32>
    %507 = arith.divf %506, %505 : vector<8x32xf32>
    %508 = vector.extract_strided_slice %499 {offsets = [0, 32], sizes = [8, 32], strides = [1, 1]} : vector<8x128xf32> to vector<8x32xf32>
    %cst_187 = arith.constant 0.000000e+00 : f32
    %509 = vector.broadcast %cst_187 : f32 to vector<8x32xf32>
    %510 = arith.maximumf %508, %509 : vector<8x32xf32>
    %511 = arith.mulf %507, %510 : vector<8x32xf32>
    %cst_188 = arith.constant 1.000000e+00 : f32
    %512 = vector.broadcast %cst_188 : f32 to vector<8x32xf32>
    %513 = arith.subf %512, %507 : vector<8x32xf32>
    %514 = arith.mulf %513, %498 : vector<8x32xf32>
    %515 = arith.addf %511, %514 : vector<8x32xf32>
    %516 = vector.extract_strided_slice %499 {offsets = [0, 64], sizes = [8, 32], strides = [1, 1]} : vector<8x128xf32> to vector<8x32xf32>
    %cst_189 = arith.constant 0.000000e+00 : f32
    %517 = vector.broadcast %cst_189 : f32 to vector<8x32xf32>
    %518 = arith.subf %517, %516 : vector<8x32xf32>
    %519 = math.exp %518 : vector<8x32xf32>
    %cst_190 = arith.constant 1.000000e+00 : f32
    %520 = vector.broadcast %cst_190 : f32 to vector<8x32xf32>
    %521 = arith.addf %520, %519 : vector<8x32xf32>
    %cst_191 = arith.constant 1.000000e+00 : f32
    %522 = vector.broadcast %cst_191 : f32 to vector<8x32xf32>
    %523 = arith.divf %522, %521 : vector<8x32xf32>
    %524 = vector.extract_strided_slice %499 {offsets = [0, 96], sizes = [8, 32], strides = [1, 1]} : vector<8x128xf32> to vector<8x32xf32>
    %cst_192 = arith.constant 0.000000e+00 : f32
    %525 = vector.broadcast %cst_192 : f32 to vector<8x32xf32>
    %526 = arith.subf %525, %524 : vector<8x32xf32>
    %527 = math.exp %526 : vector<8x32xf32>
    %cst_193 = arith.constant 1.000000e+00 : f32
    %528 = vector.broadcast %cst_193 : f32 to vector<8x32xf32>
    %529 = arith.addf %528, %527 : vector<8x32xf32>
    %cst_194 = arith.constant 1.000000e+00 : f32
    %530 = vector.broadcast %cst_194 : f32 to vector<8x32xf32>
    %531 = arith.divf %530, %529 : vector<8x32xf32>
    %532 = arith.mulf %523, %531 : vector<8x32xf32>
    %cst_195 = arith.constant 1.000000e+00 : f32
    %533 = vector.broadcast %cst_195 : f32 to vector<8x32xf32>
    %534 = arith.subf %533, %523 : vector<8x32xf32>
    %535 = arith.mulf %534, %498 : vector<8x32xf32>
    %536 = arith.addf %532, %535 : vector<8x32xf32>
    %cst_196 = arith.constant dense<0.000000e+00> : vector<8x64xf32>
    %537 = tpu.matmul %515, %4, %cst_196 {dimension_numbers = #tpu.dot_dimension_numbers<[1], [0], [0], [1], [0, 0, 1, 1], [], []>} : vector<8x32xf32>, vector<32x64xf32>, vector<8x64xf32> -> vector<8x64xf32>
    %538 = vector.extract_strided_slice %537 {offsets = [0, 0], sizes = [8, 32], strides = [1, 1]} : vector<8x64xf32> to vector<8x32xf32>
    %cst_197 = arith.constant 0.000000e+00 : f32
    %539 = vector.broadcast %cst_197 : f32 to vector<8x32xf32>
    %540 = arith.subf %539, %538 : vector<8x32xf32>
    %541 = math.exp %540 : vector<8x32xf32>
    %cst_198 = arith.constant 1.000000e+00 : f32
    %542 = vector.broadcast %cst_198 : f32 to vector<8x32xf32>
    %543 = arith.addf %542, %541 : vector<8x32xf32>
    %cst_199 = arith.constant 1.000000e+00 : f32
    %544 = vector.broadcast %cst_199 : f32 to vector<8x32xf32>
    %545 = arith.divf %544, %543 : vector<8x32xf32>
    %546 = vector.extract_strided_slice %537 {offsets = [0, 32], sizes = [8, 32], strides = [1, 1]} : vector<8x64xf32> to vector<8x32xf32>
    %547 = arith.mulf %545, %546 : vector<8x32xf32>
    %cst_200 = arith.constant 1.000000e+00 : f32
    %548 = vector.broadcast %cst_200 : f32 to vector<8x32xf32>
    %549 = arith.subf %548, %545 : vector<8x32xf32>
    %550 = arith.mulf %549, %515 : vector<8x32xf32>
    %551 = arith.addf %547, %550 : vector<8x32xf32>
    %552 = arith.addf %536, %551 : vector<8x32xf32>
    %cst_201 = arith.constant 5.000000e-01 : f32
    %553 = vector.broadcast %cst_201 : f32 to vector<8x32xf32>
    %554 = arith.mulf %552, %553 : vector<8x32xf32>
    %555 = arith.mulf %554, %554 : vector<8x32xf32>
    %cst_202 = arith.constant dense<0.000000e+00> : vector<8xf32>
    %556 = vector.multi_reduction <add>, %555, %cst_202 [1] : vector<8x32xf32> to vector<8xf32>
    %557 = vector.shape_cast %556 : vector<8xf32> to vector<8x1xf32>
    %cst_203 = arith.constant 6.250000e+02 : f32
    %558 = vector.broadcast %cst_203 : f32 to vector<8x1xf32>
    %559 = arith.cmpf ogt, %557, %558 : vector<8x1xf32>
    %cst_204 = arith.constant 6.250000e+02 : f32
    %560 = vector.broadcast %cst_204 : f32 to vector<8x1xf32>
    %561 = arith.divf %560, %557 : vector<8x1xf32>
    %cst_205 = arith.constant 1.000000e+00 : f32
    %562 = vector.broadcast %cst_205 : f32 to vector<8x1xf32>
    %563 = arith.select %559, %561, %562 : vector<8x1xi1>, vector<8x1xf32>
    %564 = vector.broadcast %563 : vector<8x1xf32> to vector<8x32xf32>
    %565 = arith.mulf %554, %564 : vector<8x32xf32>
    %566 = arith.index_cast %c5_i32 : i32 to index
    %c0_206 = arith.constant 0 : index
    %c0_207 = arith.constant 0 : index
    %567 = vector.load %arg8[%566, %c0_206, %c0_207] : memref<8x8x32xf32, #tpu.memory_space<vmem>>, vector<1x8x32xf32>
    %568 = vector.shape_cast %567 : vector<1x8x32xf32> to vector<8x32xf32>
    %569 = vector.shape_cast %565 : vector<8x32xf32> to vector<1x8x32xf32>
    tpu.vector_store %arg8[%566, %c0_206, %c0_207], %569 {strides = array<i32>} : memref<8x8x32xf32, #tpu.memory_space<vmem>>, vector<1x8x32xf32>,
    %c6_i32 = arith.constant 6 : i32
    %570 = arith.index_cast %c6_i32 : i32 to index
    %c0_208 = arith.constant 0 : index
    %c0_209 = arith.constant 0 : index
    %571 = vector.load %arg2[%570, %c0_208, %c0_209] : memref<8x8x32xf32, #tpu.memory_space<vmem>>, vector<1x8x32xf32>
    %572 = vector.shape_cast %571 : vector<1x8x32xf32> to vector<8x32xf32>
    %cst_210 = arith.constant dense<0.000000e+00> : vector<8x64xf32>
    %573 = tpu.matmul %572, %0, %cst_210 {dimension_numbers = #tpu.dot_dimension_numbers<[1], [0], [0], [1], [0, 0, 1, 1], [], []>} : vector<8x32xf32>, vector<32x64xf32>, vector<8x64xf32> -> vector<8x64xf32>
    %574 = vector.broadcast %1 : vector<1x64xf32> to vector<8x64xf32>
    %575 = arith.addf %573, %574 : vector<8x64xf32>
    %cst_211 = arith.constant dense<0.000000e+00> : vector<8x64xf32>
    %576 = tpu.matmul %565, %2, %cst_211 {dimension_numbers = #tpu.dot_dimension_numbers<[1], [0], [0], [1], [0, 0, 1, 1], [], []>} : vector<8x32xf32>, vector<32x64xf32>, vector<8x64xf32> -> vector<8x64xf32>
    %577 = arith.addf %575, %576 : vector<8x64xf32>
    %578 = vector.extract_strided_slice %577 {offsets = [0, 0], sizes = [8, 32], strides = [1, 1]} : vector<8x64xf32> to vector<8x32xf32>
    %cst_212 = arith.constant 0.000000e+00 : f32
    %579 = vector.broadcast %cst_212 : f32 to vector<8x32xf32>
    %580 = arith.subf %579, %578 : vector<8x32xf32>
    %581 = math.exp %580 : vector<8x32xf32>
    %cst_213 = arith.constant 1.000000e+00 : f32
    %582 = vector.broadcast %cst_213 : f32 to vector<8x32xf32>
    %583 = arith.addf %582, %581 : vector<8x32xf32>
    %cst_214 = arith.constant 1.000000e+00 : f32
    %584 = vector.broadcast %cst_214 : f32 to vector<8x32xf32>
    %585 = arith.divf %584, %583 : vector<8x32xf32>
    %586 = vector.extract_strided_slice %577 {offsets = [0, 32], sizes = [8, 32], strides = [1, 1]} : vector<8x64xf32> to vector<8x32xf32>
    %587 = math.tanh %586 : vector<8x32xf32>
    %588 = arith.mulf %585, %587 : vector<8x32xf32>
    %cst_215 = arith.constant 1.000000e+00 : f32
    %589 = vector.broadcast %cst_215 : f32 to vector<8x32xf32>
    %590 = arith.subf %589, %585 : vector<8x32xf32>
    %591 = arith.mulf %590, %565 : vector<8x32xf32>
    %592 = arith.addf %588, %591 : vector<8x32xf32>
    %cst_216 = arith.constant dense<0.000000e+00> : vector<8x128xf32>
    %593 = tpu.matmul %592, %3, %cst_216 {dimension_numbers = #tpu.dot_dimension_numbers<[1], [0], [0], [1], [0, 0, 1, 1], [], []>} : vector<8x32xf32>, vector<32x128xf32>, vector<8x128xf32> -> vector<8x128xf32>
    %594 = vector.extract_strided_slice %593 {offsets = [0, 0], sizes = [8, 32], strides = [1, 1]} : vector<8x128xf32> to vector<8x32xf32>
    %cst_217 = arith.constant 0.000000e+00 : f32
    %595 = vector.broadcast %cst_217 : f32 to vector<8x32xf32>
    %596 = arith.subf %595, %594 : vector<8x32xf32>
    %597 = math.exp %596 : vector<8x32xf32>
    %cst_218 = arith.constant 1.000000e+00 : f32
    %598 = vector.broadcast %cst_218 : f32 to vector<8x32xf32>
    %599 = arith.addf %598, %597 : vector<8x32xf32>
    %cst_219 = arith.constant 1.000000e+00 : f32
    %600 = vector.broadcast %cst_219 : f32 to vector<8x32xf32>
    %601 = arith.divf %600, %599 : vector<8x32xf32>
    %602 = vector.extract_strided_slice %593 {offsets = [0, 32], sizes = [8, 32], strides = [1, 1]} : vector<8x128xf32> to vector<8x32xf32>
    %cst_220 = arith.constant 0.000000e+00 : f32
    %603 = vector.broadcast %cst_220 : f32 to vector<8x32xf32>
    %604 = arith.maximumf %602, %603 : vector<8x32xf32>
    %605 = arith.mulf %601, %604 : vector<8x32xf32>
    %cst_221 = arith.constant 1.000000e+00 : f32
    %606 = vector.broadcast %cst_221 : f32 to vector<8x32xf32>
    %607 = arith.subf %606, %601 : vector<8x32xf32>
    %608 = arith.mulf %607, %592 : vector<8x32xf32>
    %609 = arith.addf %605, %608 : vector<8x32xf32>
    %610 = vector.extract_strided_slice %593 {offsets = [0, 64], sizes = [8, 32], strides = [1, 1]} : vector<8x128xf32> to vector<8x32xf32>
    %cst_222 = arith.constant 0.000000e+00 : f32
    %611 = vector.broadcast %cst_222 : f32 to vector<8x32xf32>
    %612 = arith.subf %611, %610 : vector<8x32xf32>
    %613 = math.exp %612 : vector<8x32xf32>
    %cst_223 = arith.constant 1.000000e+00 : f32
    %614 = vector.broadcast %cst_223 : f32 to vector<8x32xf32>
    %615 = arith.addf %614, %613 : vector<8x32xf32>
    %cst_224 = arith.constant 1.000000e+00 : f32
    %616 = vector.broadcast %cst_224 : f32 to vector<8x32xf32>
    %617 = arith.divf %616, %615 : vector<8x32xf32>
    %618 = vector.extract_strided_slice %593 {offsets = [0, 96], sizes = [8, 32], strides = [1, 1]} : vector<8x128xf32> to vector<8x32xf32>
    %cst_225 = arith.constant 0.000000e+00 : f32
    %619 = vector.broadcast %cst_225 : f32 to vector<8x32xf32>
    %620 = arith.subf %619, %618 : vector<8x32xf32>
    %621 = math.exp %620 : vector<8x32xf32>
    %cst_226 = arith.constant 1.000000e+00 : f32
    %622 = vector.broadcast %cst_226 : f32 to vector<8x32xf32>
    %623 = arith.addf %622, %621 : vector<8x32xf32>
    %cst_227 = arith.constant 1.000000e+00 : f32
    %624 = vector.broadcast %cst_227 : f32 to vector<8x32xf32>
    %625 = arith.divf %624, %623 : vector<8x32xf32>
    %626 = arith.mulf %617, %625 : vector<8x32xf32>
    %cst_228 = arith.constant 1.000000e+00 : f32
    %627 = vector.broadcast %cst_228 : f32 to vector<8x32xf32>
    %628 = arith.subf %627, %617 : vector<8x32xf32>
    %629 = arith.mulf %628, %592 : vector<8x32xf32>
    %630 = arith.addf %626, %629 : vector<8x32xf32>
    %cst_229 = arith.constant dense<0.000000e+00> : vector<8x64xf32>
    %631 = tpu.matmul %609, %4, %cst_229 {dimension_numbers = #tpu.dot_dimension_numbers<[1], [0], [0], [1], [0, 0, 1, 1], [], []>} : vector<8x32xf32>, vector<32x64xf32>, vector<8x64xf32> -> vector<8x64xf32>
    %632 = vector.extract_strided_slice %631 {offsets = [0, 0], sizes = [8, 32], strides = [1, 1]} : vector<8x64xf32> to vector<8x32xf32>
    %cst_230 = arith.constant 0.000000e+00 : f32
    %633 = vector.broadcast %cst_230 : f32 to vector<8x32xf32>
    %634 = arith.subf %633, %632 : vector<8x32xf32>
    %635 = math.exp %634 : vector<8x32xf32>
    %cst_231 = arith.constant 1.000000e+00 : f32
    %636 = vector.broadcast %cst_231 : f32 to vector<8x32xf32>
    %637 = arith.addf %636, %635 : vector<8x32xf32>
    %cst_232 = arith.constant 1.000000e+00 : f32
    %638 = vector.broadcast %cst_232 : f32 to vector<8x32xf32>
    %639 = arith.divf %638, %637 : vector<8x32xf32>
    %640 = vector.extract_strided_slice %631 {offsets = [0, 32], sizes = [8, 32], strides = [1, 1]} : vector<8x64xf32> to vector<8x32xf32>
    %641 = arith.mulf %639, %640 : vector<8x32xf32>
    %cst_233 = arith.constant 1.000000e+00 : f32
    %642 = vector.broadcast %cst_233 : f32 to vector<8x32xf32>
    %643 = arith.subf %642, %639 : vector<8x32xf32>
    %644 = arith.mulf %643, %609 : vector<8x32xf32>
    %645 = arith.addf %641, %644 : vector<8x32xf32>
    %646 = arith.addf %630, %645 : vector<8x32xf32>
    %cst_234 = arith.constant 5.000000e-01 : f32
    %647 = vector.broadcast %cst_234 : f32 to vector<8x32xf32>
    %648 = arith.mulf %646, %647 : vector<8x32xf32>
    %649 = arith.mulf %648, %648 : vector<8x32xf32>
    %cst_235 = arith.constant dense<0.000000e+00> : vector<8xf32>
    %650 = vector.multi_reduction <add>, %649, %cst_235 [1] : vector<8x32xf32> to vector<8xf32>
    %651 = vector.shape_cast %650 : vector<8xf32> to vector<8x1xf32>
    %cst_236 = arith.constant 6.250000e+02 : f32
    %652 = vector.broadcast %cst_236 : f32 to vector<8x1xf32>
    %653 = arith.cmpf ogt, %651, %652 : vector<8x1xf32>
    %cst_237 = arith.constant 6.250000e+02 : f32
    %654 = vector.broadcast %cst_237 : f32 to vector<8x1xf32>
    %655 = arith.divf %654, %651 : vector<8x1xf32>
    %cst_238 = arith.constant 1.000000e+00 : f32
    %656 = vector.broadcast %cst_238 : f32 to vector<8x1xf32>
    %657 = arith.select %653, %655, %656 : vector<8x1xi1>, vector<8x1xf32>
    %658 = vector.broadcast %657 : vector<8x1xf32> to vector<8x32xf32>
    %659 = arith.mulf %648, %658 : vector<8x32xf32>
    %660 = arith.index_cast %c6_i32 : i32 to index
    %c0_239 = arith.constant 0 : index
    %c0_240 = arith.constant 0 : index
    %661 = vector.load %arg8[%660, %c0_239, %c0_240] : memref<8x8x32xf32, #tpu.memory_space<vmem>>, vector<1x8x32xf32>
    %662 = vector.shape_cast %661 : vector<1x8x32xf32> to vector<8x32xf32>
    %663 = vector.shape_cast %659 : vector<8x32xf32> to vector<1x8x32xf32>
    tpu.vector_store %arg8[%660, %c0_239, %c0_240], %663 {strides = array<i32>} : memref<8x8x32xf32, #tpu.memory_space<vmem>>, vector<1x8x32xf32>,
    %c7_i32 = arith.constant 7 : i32
    %664 = arith.index_cast %c7_i32 : i32 to index
    %c0_241 = arith.constant 0 : index
    %c0_242 = arith.constant 0 : index
    %665 = vector.load %arg2[%664, %c0_241, %c0_242] : memref<8x8x32xf32, #tpu.memory_space<vmem>>, vector<1x8x32xf32>
    %666 = vector.shape_cast %665 : vector<1x8x32xf32> to vector<8x32xf32>
    %cst_243 = arith.constant dense<0.000000e+00> : vector<8x64xf32>
    %667 = tpu.matmul %666, %0, %cst_243 {dimension_numbers = #tpu.dot_dimension_numbers<[1], [0], [0], [1], [0, 0, 1, 1], [], []>} : vector<8x32xf32>, vector<32x64xf32>, vector<8x64xf32> -> vector<8x64xf32>
    %668 = vector.broadcast %1 : vector<1x64xf32> to vector<8x64xf32>
    %669 = arith.addf %667, %668 : vector<8x64xf32>
    %cst_244 = arith.constant dense<0.000000e+00> : vector<8x64xf32>
    %670 = tpu.matmul %659, %2, %cst_244 {dimension_numbers = #tpu.dot_dimension_numbers<[1], [0], [0], [1], [0, 0, 1, 1], [], []>} : vector<8x32xf32>, vector<32x64xf32>, vector<8x64xf32> -> vector<8x64xf32>
    %671 = arith.addf %669, %670 : vector<8x64xf32>
    %672 = vector.extract_strided_slice %671 {offsets = [0, 0], sizes = [8, 32], strides = [1, 1]} : vector<8x64xf32> to vector<8x32xf32>
    %cst_245 = arith.constant 0.000000e+00 : f32
    %673 = vector.broadcast %cst_245 : f32 to vector<8x32xf32>
    %674 = arith.subf %673, %672 : vector<8x32xf32>
    %675 = math.exp %674 : vector<8x32xf32>
    %cst_246 = arith.constant 1.000000e+00 : f32
    %676 = vector.broadcast %cst_246 : f32 to vector<8x32xf32>
    %677 = arith.addf %676, %675 : vector<8x32xf32>
    %cst_247 = arith.constant 1.000000e+00 : f32
    %678 = vector.broadcast %cst_247 : f32 to vector<8x32xf32>
    %679 = arith.divf %678, %677 : vector<8x32xf32>
    %680 = vector.extract_strided_slice %671 {offsets = [0, 32], sizes = [8, 32], strides = [1, 1]} : vector<8x64xf32> to vector<8x32xf32>
    %681 = math.tanh %680 : vector<8x32xf32>
    %682 = arith.mulf %679, %681 : vector<8x32xf32>
    %cst_248 = arith.constant 1.000000e+00 : f32
    %683 = vector.broadcast %cst_248 : f32 to vector<8x32xf32>
    %684 = arith.subf %683, %679 : vector<8x32xf32>
    %685 = arith.mulf %684, %659 : vector<8x32xf32>
    %686 = arith.addf %682, %685 : vector<8x32xf32>
    %cst_249 = arith.constant dense<0.000000e+00> : vector<8x128xf32>
    %687 = tpu.matmul %686, %3, %cst_249 {dimension_numbers = #tpu.dot_dimension_numbers<[1], [0], [0], [1], [0, 0, 1, 1], [], []>} : vector<8x32xf32>, vector<32x128xf32>, vector<8x128xf32> -> vector<8x128xf32>
    %688 = vector.extract_strided_slice %687 {offsets = [0, 0], sizes = [8, 32], strides = [1, 1]} : vector<8x128xf32> to vector<8x32xf32>
    %cst_250 = arith.constant 0.000000e+00 : f32
    %689 = vector.broadcast %cst_250 : f32 to vector<8x32xf32>
    %690 = arith.subf %689, %688 : vector<8x32xf32>
    %691 = math.exp %690 : vector<8x32xf32>
    %cst_251 = arith.constant 1.000000e+00 : f32
    %692 = vector.broadcast %cst_251 : f32 to vector<8x32xf32>
    %693 = arith.addf %692, %691 : vector<8x32xf32>
    %cst_252 = arith.constant 1.000000e+00 : f32
    %694 = vector.broadcast %cst_252 : f32 to vector<8x32xf32>
    %695 = arith.divf %694, %693 : vector<8x32xf32>
    %696 = vector.extract_strided_slice %687 {offsets = [0, 32], sizes = [8, 32], strides = [1, 1]} : vector<8x128xf32> to vector<8x32xf32>
    %cst_253 = arith.constant 0.000000e+00 : f32
    %697 = vector.broadcast %cst_253 : f32 to vector<8x32xf32>
    %698 = arith.maximumf %696, %697 : vector<8x32xf32>
    %699 = arith.mulf %695, %698 : vector<8x32xf32>
    %cst_254 = arith.constant 1.000000e+00 : f32
    %700 = vector.broadcast %cst_254 : f32 to vector<8x32xf32>
    %701 = arith.subf %700, %695 : vector<8x32xf32>
    %702 = arith.mulf %701, %686 : vector<8x32xf32>
    %703 = arith.addf %699, %702 : vector<8x32xf32>
    %704 = vector.extract_strided_slice %687 {offsets = [0, 64], sizes = [8, 32], strides = [1, 1]} : vector<8x128xf32> to vector<8x32xf32>
    %cst_255 = arith.constant 0.000000e+00 : f32
    %705 = vector.broadcast %cst_255 : f32 to vector<8x32xf32>
    %706 = arith.subf %705, %704 : vector<8x32xf32>
    %707 = math.exp %706 : vector<8x32xf32>
    %cst_256 = arith.constant 1.000000e+00 : f32
    %708 = vector.broadcast %cst_256 : f32 to vector<8x32xf32>
    %709 = arith.addf %708, %707 : vector<8x32xf32>
    %cst_257 = arith.constant 1.000000e+00 : f32
    %710 = vector.broadcast %cst_257 : f32 to vector<8x32xf32>
    %711 = arith.divf %710, %709 : vector<8x32xf32>
    %712 = vector.extract_strided_slice %687 {offsets = [0, 96], sizes = [8, 32], strides = [1, 1]} : vector<8x128xf32> to vector<8x32xf32>
    %cst_258 = arith.constant 0.000000e+00 : f32
    %713 = vector.broadcast %cst_258 : f32 to vector<8x32xf32>
    %714 = arith.subf %713, %712 : vector<8x32xf32>
    %715 = math.exp %714 : vector<8x32xf32>
    %cst_259 = arith.constant 1.000000e+00 : f32
    %716 = vector.broadcast %cst_259 : f32 to vector<8x32xf32>
    %717 = arith.addf %716, %715 : vector<8x32xf32>
    %cst_260 = arith.constant 1.000000e+00 : f32
    %718 = vector.broadcast %cst_260 : f32 to vector<8x32xf32>
    %719 = arith.divf %718, %717 : vector<8x32xf32>
    %720 = arith.mulf %711, %719 : vector<8x32xf32>
    %cst_261 = arith.constant 1.000000e+00 : f32
    %721 = vector.broadcast %cst_261 : f32 to vector<8x32xf32>
    %722 = arith.subf %721, %711 : vector<8x32xf32>
    %723 = arith.mulf %722, %686 : vector<8x32xf32>
    %724 = arith.addf %720, %723 : vector<8x32xf32>
    %cst_262 = arith.constant dense<0.000000e+00> : vector<8x64xf32>
    %725 = tpu.matmul %703, %4, %cst_262 {dimension_numbers = #tpu.dot_dimension_numbers<[1], [0], [0], [1], [0, 0, 1, 1], [], []>} : vector<8x32xf32>, vector<32x64xf32>, vector<8x64xf32> -> vector<8x64xf32>
    %726 = vector.extract_strided_slice %725 {offsets = [0, 0], sizes = [8, 32], strides = [1, 1]} : vector<8x64xf32> to vector<8x32xf32>
    %cst_263 = arith.constant 0.000000e+00 : f32
    %727 = vector.broadcast %cst_263 : f32 to vector<8x32xf32>
    %728 = arith.subf %727, %726 : vector<8x32xf32>
    %729 = math.exp %728 : vector<8x32xf32>
    %cst_264 = arith.constant 1.000000e+00 : f32
    %730 = vector.broadcast %cst_264 : f32 to vector<8x32xf32>
    %731 = arith.addf %730, %729 : vector<8x32xf32>
    %cst_265 = arith.constant 1.000000e+00 : f32
    %732 = vector.broadcast %cst_265 : f32 to vector<8x32xf32>
    %733 = arith.divf %732, %731 : vector<8x32xf32>
    %734 = vector.extract_strided_slice %725 {offsets = [0, 32], sizes = [8, 32], strides = [1, 1]} : vector<8x64xf32> to vector<8x32xf32>
    %735 = arith.mulf %733, %734 : vector<8x32xf32>
    %cst_266 = arith.constant 1.000000e+00 : f32
    %736 = vector.broadcast %cst_266 : f32 to vector<8x32xf32>
    %737 = arith.subf %736, %733 : vector<8x32xf32>
    %738 = arith.mulf %737, %703 : vector<8x32xf32>
    %739 = arith.addf %735, %738 : vector<8x32xf32>
    %740 = arith.addf %724, %739 : vector<8x32xf32>
    %cst_267 = arith.constant 5.000000e-01 : f32
    %741 = vector.broadcast %cst_267 : f32 to vector<8x32xf32>
    %742 = arith.mulf %740, %741 : vector<8x32xf32>
    %743 = arith.mulf %742, %742 : vector<8x32xf32>
    %cst_268 = arith.constant dense<0.000000e+00> : vector<8xf32>
    %744 = vector.multi_reduction <add>, %743, %cst_268 [1] : vector<8x32xf32> to vector<8xf32>
    %745 = vector.shape_cast %744 : vector<8xf32> to vector<8x1xf32>
    %cst_269 = arith.constant 6.250000e+02 : f32
    %746 = vector.broadcast %cst_269 : f32 to vector<8x1xf32>
    %747 = arith.cmpf ogt, %745, %746 : vector<8x1xf32>
    %cst_270 = arith.constant 6.250000e+02 : f32
    %748 = vector.broadcast %cst_270 : f32 to vector<8x1xf32>
    %749 = arith.divf %748, %745 : vector<8x1xf32>
    %cst_271 = arith.constant 1.000000e+00 : f32
    %750 = vector.broadcast %cst_271 : f32 to vector<8x1xf32>
    %751 = arith.select %747, %749, %750 : vector<8x1xi1>, vector<8x1xf32>
    %752 = vector.broadcast %751 : vector<8x1xf32> to vector<8x32xf32>
    %753 = arith.mulf %742, %752 : vector<8x32xf32>
    %754 = arith.index_cast %c7_i32 : i32 to index
    %c0_272 = arith.constant 0 : index
    %c0_273 = arith.constant 0 : index
    %755 = vector.load %arg8[%754, %c0_272, %c0_273] : memref<8x8x32xf32, #tpu.memory_space<vmem>>, vector<1x8x32xf32>
    %756 = vector.shape_cast %755 : vector<1x8x32xf32> to vector<8x32xf32>
    %757 = vector.shape_cast %753 : vector<8x32xf32> to vector<1x8x32xf32>
    tpu.vector_store %arg8[%754, %c0_272, %c0_273], %757 {strides = array<i32>} : memref<8x8x32xf32, #tpu.memory_space<vmem>>, vector<1x8x32xf32>,
    %c8_i32 = arith.constant 8 : i32
    return
  }
  func.func @transform_0(%arg0: i32) -> (i32, i32) {
    %c0_i32 = arith.constant 0 : i32
    %c0_i32_0 = arith.constant 0 : i32
    %c0_i32_1 = arith.constant 0 : i32
    return %c0_i32, %c0_i32_0 : i32, i32
  }
  func.func @transform_1(%arg0: i32) -> (i32, i32, i32) {
    %c0_i32 = arith.constant 0 : i32
    %c0_i32_0 = arith.constant 0 : i32
    %c0_i32_1 = arith.constant 0 : i32
    %c0_i32_2 = arith.constant 0 : i32
    return %c0_i32, %c0_i32_0, %c0_i32_1 : i32, i32, i32
  }
  func.func @transform_2(%arg0: i32) -> (i32, i32) {
    %c0_i32 = arith.constant 0 : i32
    %c0_i32_0 = arith.constant 0 : i32
    %c0_i32_1 = arith.constant 0 : i32
    return %c0_i32, %c0_i32_0 : i32, i32
  }
  func.func @transform_3(%arg0: i32) -> (i32, i32) {
    %c0_i32 = arith.constant 0 : i32
    %c0_i32_0 = arith.constant 0 : i32
    %c0_i32_1 = arith.constant 0 : i32
    return %c0_i32, %c0_i32_0 : i32, i32
  }
  func.func @transform_4(%arg0: i32) -> (i32, i32) {
    %c0_i32 = arith.constant 0 : i32
    %c0_i32_0 = arith.constant 0 : i32
    %c0_i32_1 = arith.constant 0 : i32
    return %c0_i32, %c0_i32_0 : i32, i32
  }
  func.func @transform_5(%arg0: i32) -> (i32, i32) {
    %c0_i32 = arith.constant 0 : i32
    %c0_i32_0 = arith.constant 0 : i32
    %c0_i32_1 = arith.constant 0 : i32
    return %c0_i32, %c0_i32_0 : i32, i32
  }
  func.func @transform_6(%arg0: i32) -> (i32, i32) {
    %c0_i32 = arith.constant 0 : i32
    %c0_i32_0 = arith.constant 0 : i32
    %c0_i32_1 = arith.constant 0 : i32
    return %c0_i32, %c0_i32_0 : i32, i32
  }
  func.func @transform_7(%arg0: i32) -> (i32, i32, i32) {
    %c0_i32 = arith.constant 0 : i32
    %c0_i32_0 = arith.constant 0 : i32
    %c0_i32_1 = arith.constant 0 : i32
    %c0_i32_2 = arith.constant 0 : i32
    return %c0_i32, %c0_i32_0, %c0_i32_1 : i32, i32, i32
  }
}

</mosaic_0001>

<bundles_post_ra>
// kernel: tpu_custom_call.1
= control target key start
LH: loop header
LB: loop body
LE: loop exit
PB: predicated region body
PF: predicated region fallthrough
CT: control target
= control target key end

     0   :  { %12 = vsyncpa [#allocation3], 0  ;;  %s4594_s0 = inlined_call_operand.hbm [shape: f32[8,32], index: 0, kind: input, shape index: {}]   ;;  %s4595_s1 = inlined_call_operand.hbm [shape: f32[8,8,32], index: 1, kind: input, shape index: {}]   ;;  %s4596_s2 = inlined_call_operand.hbm [shape: f32[32,64], index: 2, kind: input, shape index: {}]   ;;  %s4597_s3 = inlined_call_operand.vmem [shape: f32[1,64], index: 3, kind: input, shape index: {}]   ;;  %s4598_s4 = inlined_call_operand.hbm [shape: f32[32,64], index: 4, kind: input, shape index: {}]   ;;  %s4599_s5 = inlined_call_operand.hbm [shape: f32[32,128], index: 5, kind: input, shape index: {}]   ;;  %s4600_s6 = inlined_call_operand.hbm [shape: f32[32,64], index: 6, kind: input, shape index: {}]   ;;  %s4601_s7 = inlined_call_operand.hbm [shape: f32[8,8,32], index: 7, kind: output, shape index: {}]  }
   0x1   :  { %13 = vsyncpa [#allocation6], 0 }
   0x2   :  { %14 = vsyncpa [#allocation9], 0 }
   0x3   :  { %15 = vsyncpa [#allocation12], 0 }
   0x4   :  { %16 = vsyncpa [#allocation4], 0  ;;  %s3988_s24 = smov [#allocation5]  }
   0x5   :  { %s32_s25 = sshll.u32 %s3988_s24, 4  ;;  %s33_s25 = int_to_ptr.vmem [resolvable:$true] %s32_s25 }
   0x6   :  { %s3846_s26 = scalar_lea.vmem %s33_s25, 1024  ;;  %p3851_p1 = scmp.lt.s32.totalorder %s33_s25, %s33_s25 }
   0x7   :  { %p3847_p0 = scmp.ne.s32.totalorder %s33_s25, %s3846_s26  ;;  %p3852_p2 = scmp.lt.s32.totalorder %s3846_s26, %s3846_s26 }
   0x9   :  { %p3853_p3 = por %p3852_p2, %p3851_p1 }
   0xb   :  { %p3854_p4 = pnand %p3853_p3, %p3847_p0 }
   0xd   :  { %3857 = shalt.err (!%p3854_p4)
}
   0xe   :  { %s3989_s27 = smov 128   ;;  %s3990_s28 = smov 8  }
   0xf   :  { %38 = dma.hbm_to_vmem [thread:$0]  %s4595_s1, 1024, %s33_s25, [#allocation6], %s3989_s27, %s3989_s27, %s3990_s28  }
  0x10   :  { %s3991_s8 = smov [#allocation8]   ;;  %s3992_s10 = smov [#allocation2]  }
  0x11   :  { %s58_s9 = sshll.u32 %s3991_s8, 4  ;;  %s23_s11 = sshll.u32 %s3992_s10, 4  ;;  %s59_s9 = int_to_ptr.vmem [resolvable:$true] %s58_s9  ;;  %s24_s11 = int_to_ptr.vmem [resolvable:$true] %s23_s11 }
  0x12   :  { %s3866_s12 = scalar_lea.vmem %s59_s9, 512  ;;  %p3871_p6 = scmp.lt.s32.totalorder %s59_s9, %s59_s9 }
  0x13   :  { %p3867_p5 = scmp.ne.s32.totalorder %s59_s9, %s3866_s12  ;;  %p3872_p7 = scmp.lt.s32.totalorder %s3866_s12, %s3866_s12 }
  0x15   :  { %p3873_p8 = por %p3872_p7, %p3871_p6 }
  0x17   :  { %p3874_p9 = pnand %p3873_p8, %p3867_p5 }
  0x19   :  { %3877 = shalt.err (!%p3874_p9)
}
  0x1a   :  { %64 = dma.hbm_to_vmem [thread:$0]  %s4598_s4, 512, %s59_s9, [#allocation9], %s3989_s27, %s3989_s27, %s3990_s28  }
  0x1b   :  { %s3886_s1 = scalar_lea.vmem %s24_s11, 128  ;;  %p3891_p11 = scmp.lt.s32.totalorder %s24_s11, %s24_s11 }
  0x1c   :  { %p3887_p10 = scmp.ne.s32.totalorder %s24_s11, %s3886_s1  ;;  %p3892_p12 = scmp.lt.s32.totalorder %s3886_s1, %s3886_s1 }
  0x1e   :  { %p3893_p13 = por %p3892_p12, %p3891_p11 }
  0x20   :  { %p3894_p0 = pnand %p3893_p13, %p3887_p10 }
  0x22   :  { %3897 = shalt.err (!%p3894_p0)
}
  0x23   :  { %26 = dma.hbm_to_vmem [thread:$0]  %s4594_s0, 128, %s24_s11, [#allocation3]  }
  0x24   :  { %s3993_s17 = smov [#allocation7]   ;;  %s3994_s19 = smov [#allocation10]  }
  0x25   :  { %s44_s18 = sshll.u32 %s3993_s17, 4  ;;  %s70_s20 = sshll.u32 %s3994_s19, 4  ;;  %s45_s18 = int_to_ptr.vmem [resolvable:$true] %s44_s18  ;;  %s71_s20 = int_to_ptr.vmem [resolvable:$true] %s70_s20 }
  0x26   :  { %s3906_s21 = scalar_lea.vmem %s45_s18, 512  ;;  %p3911_p2 = scmp.lt.s32.totalorder %s45_s18, %s45_s18 }
  0x27   :  { %p3907_p1 = scmp.ne.s32.totalorder %s45_s18, %s3906_s21  ;;  %p3912_p3 = scmp.lt.s32.totalorder %s3906_s21, %s3906_s21 }
  0x29   :  { %p3913_p4 = por %p3912_p3, %p3911_p2 }
  0x2b   :  { %p3914_p5 = pnand %p3913_p4, %p3907_p1 }
  0x2d   :  { %3917 = shalt.err (!%p3914_p5)
}
  0x2e   :  { %50 = dma.hbm_to_vmem [thread:$0]  %s4596_s2, 512, %s45_s18, [#allocation6], %s3989_s27, %s3989_s27, %s3990_s28  }
  0x2f   :  { %s3926_s0 = scalar_lea.vmem %s71_s20, 512  ;;  %p3931_p7 = scmp.lt.s32.totalorder %s71_s20, %s71_s20 }
  0x30   :  { %p3927_p6 = scmp.ne.s32.totalorder %s71_s20, %s3926_s0  ;;  %p3932_p8 = scmp.lt.s32.totalorder %s3926_s0, %s3926_s0 }
  0x32   :  { %p3933_p9 = por %p3932_p8, %p3931_p7 }
  0x34   :  { %p3934_p10 = pnand %p3933_p9, %p3927_p6 }
  0x36   :  { %3937 = shalt.err (!%p3934_p10)
}
  0x37   :  { %76 = dma.hbm_to_vmem [thread:$0]  %s4599_s5, 512, %s71_s20, [#allocation9], %s3989_s27, %s3989_s27, %s3990_s28  }
  0x38   :  { %s3995_s25 = smov [#allocation11]  }
  0x39   :  { %s82_s26 = sshll.u32 %s3995_s25, 4  ;;  %s83_s26 = int_to_ptr.vmem [resolvable:$true] %s82_s26 }
  0x3a   :  { %s3946_s29 = scalar_lea.vmem %s83_s26, 512  ;;  %p3951_p12 = scmp.lt.s32.totalorder %s83_s26, %s83_s26 }
  0x3b   :  { %p3947_p11 = scmp.ne.s32.totalorder %s83_s26, %s3946_s29  ;;  %p3952_p13 = scmp.lt.s32.totalorder %s3946_s29, %s3946_s29 }
  0x3d   :  { %p3953_p0 = por %p3952_p13, %p3951_p12 }
  0x3f   :  { %p3954_p1 = pnand %p3953_p0, %p3947_p11 }
  0x41   :  { %3957 = shalt.err (!%p3954_p1)
}
  0x42   :  { %88 = dma.hbm_to_vmem [thread:$0]  %s4600_s6, 512, %s83_s26, [#allocation12], %s3989_s27, %s3989_s27, %s3990_s28  }
  0x43   :  { %3978 = dma.done.wait [#allocation3], 128  }
  0x44   :  { %3979 = vsyncadd [#allocation3], 4294967168 }
  0x45   :  { %3980 = dma.done.wait [#allocation6], 1536  }
  0x46   :  { %3981 = vsyncadd [#allocation6], 4294965760 }
  0x47   :  { %3982 = dma.done.wait [#allocation9], 1024  }
  0x48   :  { %3983 = vsyncadd [#allocation9], 4294966272 }
  0x49   :  { %3984 = dma.done.wait [#allocation12], 512  }
  0x4a   :  { %3985 = vsyncadd [#allocation12], 4294966784  ;;  %v3996_v0 = vmov 0.0   ;;  %vm3997_vm0 = vmmov 0   ;;  %v4080_v1 = vld [vmem:[#allocation7 + $0x18] sm:$0xff]  ;;  %v4084_v3 = vld [vmem:[#allocation7 + $0x10] sm:$0xff] }
  0x4b   :  { %3328 = vmatprep.subr.mxu0 %v3996_v0  ;;  %3339 = vmatprep.subr.mxu1 %v3996_v0  ;;  %v4082_v2 = vld [vmem:[#allocation8 + $0x18] sm:$0xff]  ;;  %v4088_v4 = vld [vmem:[#allocation8 + $0x10] sm:$0xff]  ;;  %v4092_v5 = vld [vmem:[#allocation7 + $0x8] sm:$0xff]  ;;  %vm132_vm1 = vcmask 261120   ;;  %s3998_s8 = smov 96   ;;  %s3999_s9 = smov 64  }
  0x4c   :  { %3336 = vmatprep.mubr.msk.f32.mxu0 %vm3997_vm0, %v3996_v0  ;;  %3347 = vmatprep.mubr.msk.f32.mxu1 %vm3997_vm0, %v3996_v0  ;;  %v4094_v6 = vld [vmem:[#allocation8 + $0x8] sm:$0xff]  ;;  %v4100_v7 = vld [vmem:[#allocation7] sm:$0xff]  ;;  %v124_v10 = vld [vmem:[#allocation2] sm:$0xff] }
  0x4d   :  { %3329 = vmatpush3.msra.mxu0 %v4080_v1  ;;  %3340 = vmatpush3.msra.mxu1 %v4082_v2  ;;  %v4102_v8 = vld [vmem:[#allocation8] sm:$0xff]  ;;  %v4118_v11 = vld [vmem:[#allocation10 + $0x18] sm:$0xff]  ;;  %v4120_v12 = vld [vmem:[#allocation10 + $0x10] sm:$0xff] }
  0x4e   :  { %3330 = vmatprep.subr.mxu0 %v3996_v0  ;;  %3341 = vmatprep.subr.mxu1 %v3996_v0  ;;  %v125_v9 = vld [vmem:[#allocation5] sm:$0xff]  ;;  %v4129_v13 = vld [vmem:[%s4597_s3] ss:$0 sm:$0xff]  ;;  %v4132_v20 = vld [vmem:[#allocation10 + $0x8] sm:$0xff] }
  0x4f   :  { %3331 = vmatpush3.msra.mxu0 %v4084_v3  ;;  %3342 = vmatpush3.msra.mxu1 %v4088_v4  ;;  %v4136_v21 = vld [vmem:[#allocation10] sm:$0xff]  ;;  %v4152_v33 = vld [vmem:[#allocation11 + $0x18] sm:$0xff]  ;;  %v4154_v34 = vld [vmem:[#allocation11 + $0x10] sm:$0xff] }
  0x50   :  { %3332 = vmatprep.subr.mxu0 %v3996_v0  ;;  %3343 = vmatprep.subr.mxu1 %v3996_v0  ;;  %v4160_v35 = vld [vmem:[#allocation11 + $0x8] sm:$0xff]  ;;  %v4164_v36 = vld [vmem:[#allocation11] sm:$0xff] }
  0x51   :  { %3333 = vmatpush3.msra.mxu0 %v4092_v5  ;;  %3344 = vmatpush3.msra.mxu1 %v4094_v6 }
  0x52   :  { %3334 = vmatprep.subr.mxu0 %v3996_v0  ;;  %3345 = vmatprep.subr.mxu1 %v3996_v0 }
  0x53   :  { %3335 = vmatpush3.msra.mxu0 %v4100_v7  ;;  %3346 = vmatpush3.msra.mxu1 %v4102_v8 }
  0x54   :  { %3337 = vmatmul.mubr.msk.f32.vlgmr.msra.gmra.mxu0 %vm132_vm1, %v125_v9  ;;  %3348 = vmatmul.mubr.msk.f32.vlgmr.msra.gmra.mxu1 %vm132_vm1, %v124_v10 }
  0x55   :  { %3350 = vmatprep.subr.mxu0 %v3996_v0  ;;  %3358 = vmatprep.mubr.msk.f32.mxu0 %vm3997_vm0, %v3996_v0 }
  0x56   :  { %3361 = vmatprep.subr.mxu1 %v3996_v0  ;;  %3369 = vmatprep.mubr.msk.f32.mxu1 %vm3997_vm0, %v3996_v0 }
  0x57   :  { %3351 = vmatpush3.msra.mxu0 %v4118_v11  ;;  %3362 = vmatpush3.msra.mxu1 %v4152_v33 }
  0x58   :  { %3352 = vmatprep.subr.mxu0 %v3996_v0  ;;  %3363 = vmatprep.subr.mxu1 %v3996_v0 }
  0x59   :  { %3353 = vmatpush3.msra.mxu0 %v4120_v12  ;;  %3364 = vmatpush3.msra.mxu1 %v4154_v34 }
  0x5a   :  { %3354 = vmatprep.subr.mxu0 %v3996_v0  ;;  %3365 = vmatprep.subr.mxu1 %v3996_v0 }
  0x5b   :  { %3355 = vmatpush3.msra.mxu0 %v4132_v20  ;;  %3366 = vmatpush3.msra.mxu1 %v4160_v35 }
  0x5c   :  { %3356 = vmatprep.subr.mxu0 %v3996_v0  ;;  %3367 = vmatprep.subr.mxu1 %v3996_v0 }
  0x5d   :  { %3357 = vmatpush3.msra.mxu0 %v4136_v21  ;;  %3368 = vmatpush3.msra.mxu1 %v4164_v36 }
  0x5e   :  { %3372 = vmatprep.subr.mxu0 %v3996_v0  ;;  %3383 = vmatprep.subr.mxu1 %v3996_v0 }
 0x114   :  { %v202_v14 = vpop.f32.mrf.mxu0  ;;  %v275_v15 = vpop.f32.mrf.mxu1 }
 0x115   :  { %v203_v16 = vadd.f32 %v4129_v13, %v202_v14 }
 0x116   :  { %v3338_v17 = vpop.f32.mrf.mxu0  ;;  %v3349_v18 = vpop.f32.mrf.mxu1 }
 0x117   :  { %v279_v19 = vadd.f32 %v275_v15, %v203_v16 }
 0x119   :  { %3693 = vtanh.f32 %v279_v19  ;;  %v280_v23 = vsub.f32 0.0, %v279_v19 }
 0x11b   :  { %v281_v24 = vmul.f32 1.442695, %v280_v23  ;;  %v505_v23 = vld [vmem:[#allocation5 + $0x8] sm:$0xff] }
 0x11d   :  { %3695 = vpow2.f32 %v281_v24 }
 0x126   :  { %v3694_v22 = vpop.eup %3693 }
 0x127   :  { %288 = vrot.lane.b32.xlu0 %v3694_v22, %s3998_s8 }
 0x12a   :  { %v3696_v25 = vpop.eup %3695 }
 0x12b   :  { %v283_v26 = vadd.f32 1.0, %v3696_v25 }
 0x12d   :  { %3697 = vrcp.f32 %v283_v26 }
 0x13a   :  { %v3698_v27 = vpop.eup %3697 }
 0x13b   :  { %v292_v28 = vsub.f32 1.0, %v3698_v27 }
 0x13d   :  { %v293_v31 = vmul.f32 %v292_v28, %v124_v10 }
 0x199   :  { %v289_v29 = vpop.permute.xlu0 %288 }
 0x19a   :  { %v291_v30 = vmul.f32 %v3698_v27, %v289_v29 }
 0x19c   :  { %v294_v32 = vadd.f32 %v293_v31, %v291_v30 }
 0x19e   :  { %3359 = vmatmul.mubr.msk.f32.vlgmr.msra.gmra.mxu0 %vm132_vm1, %v294_v32 }
 0x19f   :  { %3373 = vmatpush3.msra.mxu0 %v4080_v1  ;;  %3380 = vmatprep.mubr.msk.f32.mxu0 %vm3997_vm0, %v3996_v0 }
 0x1a0   :  { %3374 = vmatprep.subr.mxu0 %v3996_v0 }
 0x1a1   :  { %3375 = vmatpush3.msra.mxu0 %v4084_v3 }
 0x1a2   :  { %3376 = vmatprep.subr.mxu0 %v3996_v0 }
 0x1a3   :  { %3377 = vmatpush3.msra.mxu0 %v4092_v5 }
 0x1a4   :  { %3378 = vmatprep.subr.mxu0 %v3996_v0 }
 0x1a5   :  { %3379 = vmatpush3.msra.mxu0 %v4100_v7 }
 0x1a6   :  { %3394 = vmatprep.subr.mxu0 %v3996_v0  ;;  %3381 = vmatmul.mubr.msk.f32.vlgmr.msra.gmra.mxu0 %vm132_vm1, %v505_v23 }
 0x1a7   :  { %3395 = vmatpush3.msra.mxu0 %v4118_v11  ;;  %3402 = vmatprep.mubr.msk.f32.mxu0 %vm3997_vm0, %v3996_v0 }
 0x1a8   :  { %3396 = vmatprep.subr.mxu0 %v3996_v0 }
 0x1a9   :  { %3397 = vmatpush3.msra.mxu0 %v4120_v12 }
 0x1aa   :  { %3398 = vmatprep.subr.mxu0 %v3996_v0 }
 0x1ab   :  { %3399 = vmatpush3.msra.mxu0 %v4132_v20 }
 0x1ac   :  { %3400 = vmatprep.subr.mxu0 %v3996_v0 }
 0x1ad   :  { %3401 = vmatpush3.msra.mxu0 %v4136_v21 }
 0x1ae   :  { %3416 = vmatprep.subr.mxu0 %v3996_v0 }
 0x25e   :  { %v364_v37 = vpop.f32.mrf.mxu0 }
 0x25f   :  { %v374_v38 = vmax.f32 %v364_v37, 0.0  ;;  %v368_v40 = vsub.f32 0.0, %v364_v37 }
 0x260   :  { %v3360_v39 = vpop.f32.mrf.mxu0 }
 0x261   :  { %376 = vrot.lane.b32.xlu0 %v374_v38, %s3998_s8  ;;  %v369_v41 = vmul.f32 1.442695, %v368_v40 }
 0x263   :  { %3699 = vpow2.f32 %v369_v41 }
 0x265   :  { %388 = vrot.lane.b32.xlu0 %v294_v32, %s3999_s9 }
 0x266   :  { %v575_v29 = vpop.f32.mrf.mxu0 }
 0x268   :  { %v3382_v30 = vpop.f32.mrf.mxu0 }
 0x270   :  { %v3700_v42 = vpop.eup %3699 }
 0x271   :  { %v371_v43 = vadd.f32 1.0, %v3700_v42 }
 0x273   :  { %3701 = vrcp.f32 %v371_v43 }
 0x280   :  { %v3702_v44 = vpop.eup %3701 }
 0x281   :  { %v380_v45 = vsub.f32 1.0, %v3702_v44 }
 0x283   :  { %v381_v48 = vmul.f32 %v380_v45, %v294_v32  ;;  %v576_v32 = vadd.f32 %v4129_v13, %v575_v29 }
 0x2d3   :  { %v377_v46 = vpop.permute.xlu0 %376 }
 0x2d4   :  { %v379_v47 = vmul.f32 %v3702_v44, %v377_v46 }
 0x2d6   :  { %v382_v49 = vadd.f32 %v381_v48, %v379_v47 }
 0x2d7   :  { %v389_v63 = vpop.permute.xlu0 %388 }
 0x2d8   :  { %3370 = vmatmul.mubr.msk.f32.vlgmr.msra.gmra.mxu1 %vm132_vm1, %v382_v49  ;;  %v391_v10 = vmul.f32 %v389_v63, %v380_v45 }
 0x2d9   :  { %3384 = vmatpush3.msra.mxu1 %v4082_v2  ;;  %3391 = vmatprep.mubr.msk.f32.mxu1 %vm3997_vm0, %v3996_v0 }
 0x2da   :  { %3385 = vmatprep.subr.mxu1 %v3996_v0 }
 0x2db   :  { %3386 = vmatpush3.msra.mxu1 %v4088_v4 }
 0x2dc   :  { %3387 = vmatprep.subr.mxu1 %v3996_v0 }
 0x2dd   :  { %3388 = vmatpush3.msra.mxu1 %v4094_v6 }
 0x2de   :  { %3389 = vmatprep.subr.mxu1 %v3996_v0 }
 0x2df   :  { %3390 = vmatpush3.msra.mxu1 %v4102_v8 }
 0x2e0   :  { %3405 = vmatprep.subr.mxu1 %v3996_v0 }
 0x398   :  { %v462_v50 = vpop.f32.mrf.mxu1 }
 0x399   :  { %473 = vrot.lane.b32.xlu1 %v462_v50, %s3998_s8  ;;  %v466_v52 = vsub.f32 0.0, %v462_v50 }
 0x39a   :  { %v3371_v51 = vpop.f32.mrf.mxu1 }
 0x39b   :  { %v467_v53 = vmul.f32 1.442695, %v466_v52 }
 0x39d   :  { %384 = vrot.lane.b32.xlu1 %v3702_v44, %s3998_s8  ;;  %3703 = vpow2.f32 %v467_v53 }
 0x3aa   :  { %v3704_v54 = vpop.eup %3703 }
 0x3ab   :  { %v469_v55 = vadd.f32 1.0, %v3704_v54 }
 0x3ad   :  { %3705 = vrcp.f32 %v469_v55 }
 0x3ba   :  { %v3706_v56 = vpop.eup %3705 }
 0x3bb   :  { %v477_v57 = vsub.f32 1.0, %v3706_v56 }
 0x3bd   :  { %v478_v60 = vmul.f32 %v477_v57, %v382_v49 }
 0x40b   :  { %v474_v58 = vpop.permute.xlu1 %473 }
 0x40c   :  { %v476_v59 = vmul.f32 %v3706_v56, %v474_v58 }
 0x40e   :  { %v479_v61 = vadd.f32 %v478_v60, %v476_v59 }
 0x40f   :  { %v385_v62 = vpop.permute.xlu1 %384 }
 0x410   :  { %481 = vrot.lane.b32.xlu1 %v479_v61, %s3999_s9  ;;  %v387_v9 = vmul.f32 %v3702_v44, %v385_v62 }
 0x412   :  { %v392_v14 = vadd.f32 %v391_v10, %v387_v9 }
 0x482   :  { %v482_v15 = vpop.permute.xlu1 %481 }
 0x483   :  { %v484_v16 = vadd.f32 %v482_v15, %v392_v14 }
 0x485   :  { %v485_v17 = vmul.f32 0.5, %v484_v16 }
 0x487   :  { %v486_v18 = vmul.f32 %v485_v17, %v485_v17 }
 0x489   :  { %488 = vrot.lane.b32.xlu0 %v486_v18, %s3999_s9 }
 0x4fb   :  { %v489_v19 = vpop.permute.xlu0 %488 }
 0x4fc   :  { %v491_v22 = vsel %vm132_vm1, %v489_v19, 0.0 }
 0x4fd   :  { %492 = vadd.xlane.f32.xlu1 %v491_v22 }
 0x586   :  { %v493_v24 = vpop.xlane.xlu1 %492 }
 0x587   :  { %3707 = vrcp.f32 %v493_v24  ;;  %vm494_vm2 = vcmp.gt.f32.partialorder %v493_v24, 625.0 }
 0x594   :  { %v3708_v25 = vpop.eup %3707 }
 0x595   :  { %v496_v26 = vmul.f32 625.0, %v3708_v25 }
 0x597   :  { %v497_v27 = vsel %vm494_vm2, %v496_v26, 1.0 }
 0x598   :  { %v498_v28 = vmul.f32 %v497_v27, %v485_v17 }
 0x59a   :  { %500 = vrot.lane.b32.xlu0 %v498_v28, %s3999_s9 }
 0x60c   :  { %v501_v31 = vpop.permute.xlu0 %500 }
 0x60d   :  { %503 = vst.msk [vmem:[#allocation13] sm:$0xff] %vm132_vm1, %v501_v31  ;;  %3392 = vmatmul.mubr.msk.f32.vlgmr.msra.gmra.mxu1 %vm132_vm1, %v501_v31 }
 0x60e   :  { %3406 = vmatpush3.msra.mxu1 %v4152_v33  ;;  %3413 = vmatprep.mubr.msk.f32.mxu1 %vm3997_vm0, %v3996_v0 }
 0x60f   :  { %3407 = vmatprep.subr.mxu1 %v3996_v0 }
 0x610   :  { %3408 = vmatpush3.msra.mxu1 %v4154_v34 }
 0x611   :  { %3409 = vmatprep.subr.mxu1 %v3996_v0 }
 0x612   :  { %3410 = vmatpush3.msra.mxu1 %v4160_v35 }
 0x613   :  { %3411 = vmatprep.subr.mxu1 %v3996_v0 }
 0x614   :  { %3412 = vmatpush3.msra.mxu1 %v4164_v36 }
 0x615   :  { %3427 = vmatprep.subr.mxu1 %v3996_v0 }
 0x6cd   :  { %v647_v37 = vpop.f32.mrf.mxu1 }
 0x6ce   :  { %v651_v38 = vadd.f32 %v647_v37, %v576_v32 }
 0x6cf   :  { %v3393_v39 = vpop.f32.mrf.mxu1 }
 0x6d0   :  { %3709 = vtanh.f32 %v651_v38  ;;  %v652_v41 = vsub.f32 0.0, %v651_v38 }
 0x6d2   :  { %v653_v42 = vmul.f32 1.442695, %v652_v41  ;;  %v878_v41 = vld [vmem:[#allocation5 + $0x10] sm:$0xff] }
 0x6d4   :  { %3711 = vpow2.f32 %v653_v42 }
 0x6dd   :  { %v3710_v40 = vpop.eup %3709 }
 0x6de   :  { %660 = vrot.lane.b32.xlu0 %v3710_v40, %s3998_s8 }
 0x6e1   :  { %v3712_v43 = vpop.eup %3711 }
 0x6e2   :  { %v655_v44 = vadd.f32 1.0, %v3712_v43 }
 0x6e4   :  { %3713 = vrcp.f32 %v655_v44 }
 0x6f1   :  { %v3714_v45 = vpop.eup %3713 }
 0x6f2   :  { %v664_v46 = vsub.f32 1.0, %v3714_v45 }
 0x6f4   :  { %v665_v49 = vmul.f32 %v664_v46, %v501_v31 }
 0x750   :  { %v661_v47 = vpop.permute.xlu0 %660 }
 0x751   :  { %v663_v48 = vmul.f32 %v3714_v45, %v661_v47 }
 0x753   :  { %v666_v50 = vadd.f32 %v665_v49, %v663_v48 }
 0x755   :  { %3403 = vmatmul.mubr.msk.f32.vlgmr.msra.gmra.mxu0 %vm132_vm1, %v666_v50 }
 0x756   :  { %3417 = vmatpush3.msra.mxu0 %v4080_v1  ;;  %3424 = vmatprep.mubr.msk.f32.mxu0 %vm3997_vm0, %v3996_v0 }
 0x757   :  { %3418 = vmatprep.subr.mxu0 %v3996_v0 }
 0x758   :  { %3419 = vmatpush3.msra.mxu0 %v4084_v3 }
 0x759   :  { %3420 = vmatprep.subr.mxu0 %v3996_v0 }
 0x75a   :  { %3421 = vmatpush3.msra.mxu0 %v4092_v5 }
 0x75b   :  { %3422 = vmatprep.subr.mxu0 %v3996_v0 }
 0x75c   :  { %3423 = vmatpush3.msra.mxu0 %v4100_v7 }
 0x75d   :  { %3438 = vmatprep.subr.mxu0 %v3996_v0  ;;  %3425 = vmatmul.mubr.msk.f32.vlgmr.msra.gmra.mxu0 %vm132_vm1, %v878_v41 }
 0x75e   :  { %3439 = vmatpush3.msra.mxu0 %v4118_v11  ;;  %3446 = vmatprep.mubr.msk.f32.mxu0 %vm3997_vm0, %v3996_v0 }
 0x75f   :  { %3440 = vmatprep.subr.mxu0 %v3996_v0 }
 0x760   :  { %3441 = vmatpush3.msra.mxu0 %v4120_v12 }
 0x761   :  { %3442 = vmatprep.subr.mxu0 %v3996_v0 }
 0x762   :  { %3443 = vmatpush3.msra.mxu0 %v4132_v20 }
 0x763   :  { %3444 = vmatprep.subr.mxu0 %v3996_v0 }
 0x764   :  { %3445 = vmatpush3.msra.mxu0 %v4136_v21 }
 0x765   :  { %3460 = vmatprep.subr.mxu0 %v3996_v0 }
 0x815   :  { %v736_v51 = vpop.f32.mrf.mxu0 }
 0x816   :  { %v746_v52 = vmax.f32 %v736_v51, 0.0  ;;  %v740_v54 = vsub.f32 0.0, %v736_v51 }
 0x817   :  { %v3404_v53 = vpop.f32.mrf.mxu0 }
 0x818   :  { %748 = vrot.lane.b32.xlu0 %v746_v52, %s3998_s8  ;;  %v741_v55 = vmul.f32 1.442695, %v740_v54 }
 0x81a   :  { %3715 = vpow2.f32 %v741_v55 }
 0x81d   :  { %v948_v47 = vpop.f32.mrf.mxu0 }
 0x81f   :  { %v3426_v48 = vpop.f32.mrf.mxu0 }
 0x827   :  { %v3716_v56 = vpop.eup %3715 }
 0x828   :  { %v743_v57 = vadd.f32 1.0, %v3716_v56 }
 0x82a   :  { %3717 = vrcp.f32 %v743_v57 }
 0x837   :  { %v3718_v58 = vpop.eup %3717 }
 0x838   :  { %v752_v59 = vsub.f32 1.0, %v3718_v58 }
 0x83a   :  { %v753_v62 = vmul.f32 %v752_v59, %v666_v50 }
 0x88a   :  { %v749_v60 = vpop.permute.xlu0 %748 }
 0x88b   :  { %v751_v61 = vmul.f32 %v3718_v58, %v749_v60 }
 0x88d   :  { %v754_v63 = vadd.f32 %v753_v62, %v751_v61 }
 0x88f   :  { %3414 = vmatmul.mubr.msk.f32.vlgmr.msra.gmra.mxu1 %vm132_vm1, %v754_v63 }
 0x890   :  { %3428 = vmatpush3.msra.mxu1 %v4082_v2  ;;  %3435 = vmatprep.mubr.msk.f32.mxu1 %vm3997_vm0, %v3996_v0 }
 0x891   :  { %3429 = vmatprep.subr.mxu1 %v3996_v0 }
 0x892   :  { %3430 = vmatpush3.msra.mxu1 %v4088_v4 }
 0x893   :  { %3431 = vmatprep.subr.mxu1 %v3996_v0 }
 0x894   :  { %3432 = vmatpush3.msra.mxu1 %v4094_v6 }
 0x895   :  { %3433 = vmatprep.subr.mxu1 %v3996_v0 }
 0x896   :  { %3434 = vmatpush3.msra.mxu1 %v4102_v8 }
 0x897   :  { %3449 = vmatprep.subr.mxu1 %v3996_v0 }
 0x94f   :  { %v834_v9 = vpop.f32.mrf.mxu1 }
 0x950   :  { %845 = vrot.lane.b32.xlu0 %v834_v9, %s3998_s8  ;;  %v838_v14 = vsub.f32 0.0, %v834_v9 }
 0x951   :  { %v3415_v10 = vpop.f32.mrf.mxu1 }
 0x952   :  { %v839_v15 = vmul.f32 1.442695, %v838_v14 }
 0x954   :  { %756 = vrot.lane.b32.xlu0 %v3718_v58, %s3998_s8  ;;  %3719 = vpow2.f32 %v839_v15 }
 0x958   :  { %760 = vrot.lane.b32.xlu0 %v666_v50, %s3999_s9  ;;  %v949_v50 = vadd.f32 %v4129_v13, %v948_v47 }
 0x961   :  { %v3720_v16 = vpop.eup %3719 }
 0x962   :  { %v841_v17 = vadd.f32 1.0, %v3720_v16 }
 0x964   :  { %3721 = vrcp.f32 %v841_v17 }
 0x971   :  { %v3722_v18 = vpop.eup %3721 }
 0x972   :  { %v849_v19 = vsub.f32 1.0, %v3722_v18 }
 0x974   :  { %v850_v24 = vmul.f32 %v849_v19, %v754_v63 }
 0x9c2   :  { %v846_v22 = vpop.permute.xlu0 %845 }
 0x9c3   :  { %v848_v23 = vmul.f32 %v3722_v18, %v846_v22 }
 0x9c5   :  { %v851_v25 = vadd.f32 %v850_v24, %v848_v23 }
 0x9c6   :  { %v757_v26 = vpop.permute.xlu0 %756 }
 0x9c7   :  { %853 = vrot.lane.b32.xlu0 %v851_v25, %s3999_s9  ;;  %v759_v29 = vmul.f32 %v3718_v58, %v757_v26 }
 0x9ca   :  { %v761_v27 = vpop.permute.xlu0 %760 }
 0x9cb   :  { %v763_v28 = vmul.f32 %v761_v27, %v752_v59 }
 0x9cd   :  { %v764_v30 = vadd.f32 %v763_v28, %v759_v29 }
 0xa39   :  { %v854_v31 = vpop.permute.xlu0 %853 }
 0xa3a   :  { %v856_v32 = vadd.f32 %v854_v31, %v764_v30 }
 0xa3c   :  { %v857_v37 = vmul.f32 0.5, %v856_v32 }
 0xa3e   :  { %v858_v38 = vmul.f32 %v857_v37, %v857_v37 }
 0xa40   :  { %860 = vrot.lane.b32.xlu0 %v858_v38, %s3999_s9 }
 0xab2   :  { %v861_v39 = vpop.permute.xlu0 %860 }
 0xab3   :  { %v863_v40 = vsel %vm132_vm1, %v861_v39, 0.0 }
 0xab4   :  { %864 = vadd.xlane.f32.xlu0 %v863_v40 }
 0xb3d   :  { %v865_v42 = vpop.xlane.xlu0 %864 }
 0xb3e   :  { %3723 = vrcp.f32 %v865_v42  ;;  %vm866_vm3 = vcmp.gt.f32.partialorder %v865_v42, 625.0 }
 0xb4b   :  { %v3724_v43 = vpop.eup %3723 }
 0xb4c   :  { %v868_v44 = vmul.f32 625.0, %v3724_v43 }
 0xb4e   :  { %v869_v45 = vsel %vm866_vm3, %v868_v44, 1.0 }
 0xb4f   :  { %v870_v46 = vmul.f32 %v869_v45, %v857_v37 }
 0xb51   :  { %872 = vrot.lane.b32.xlu1 %v870_v46, %s3999_s9 }
 0xbc3   :  { %v873_v49 = vpop.permute.xlu1 %872 }
 0xbc4   :  { %876 = vst.msk [vmem:[#allocation13 + $0x8] sm:$0xff] %vm132_vm1, %v873_v49  ;;  %3436 = vmatmul.mubr.msk.f32.vlgmr.msra.gmra.mxu1 %vm132_vm1, %v873_v49 }
 0xbc5   :  { %3450 = vmatpush3.msra.mxu1 %v4152_v33  ;;  %3457 = vmatprep.mubr.msk.f32.mxu1 %vm3997_vm0, %v3996_v0 }
 0xbc6   :  { %3451 = vmatprep.subr.mxu1 %v3996_v0 }
 0xbc7   :  { %3452 = vmatpush3.msra.mxu1 %v4154_v34 }
 0xbc8   :  { %3453 = vmatprep.subr.mxu1 %v3996_v0 }
 0xbc9   :  { %3454 = vmatpush3.msra.mxu1 %v4160_v35 }
 0xbca   :  { %3455 = vmatprep.subr.mxu1 %v3996_v0 }
 0xbcb   :  { %3456 = vmatpush3.msra.mxu1 %v4164_v36 }
 0xbcc   :  { %3471 = vmatprep.subr.mxu1 %v3996_v0 }
 0xc84   :  { %v1020_v51 = vpop.f32.mrf.mxu1 }
 0xc85   :  { %v1024_v52 = vadd.f32 %v1020_v51, %v949_v50 }
 0xc86   :  { %v3437_v53 = vpop.f32.mrf.mxu1 }
 0xc87   :  { %3725 = vtanh.f32 %v1024_v52  ;;  %v1025_v55 = vsub.f32 0.0, %v1024_v52 }
 0xc89   :  { %v1026_v56 = vmul.f32 1.442695, %v1025_v55  ;;  %v1251_v55 = vld [vmem:[#allocation5 + $0x18] sm:$0xff] }
 0xc8b   :  { %3727 = vpow2.f32 %v1026_v56 }
 0xc94   :  { %v3726_v54 = vpop.eup %3725 }
 0xc95   :  { %1033 = vrot.lane.b32.xlu1 %v3726_v54, %s3998_s8 }
 0xc98   :  { %v3728_v57 = vpop.eup %3727 }
 0xc99   :  { %v1028_v58 = vadd.f32 1.0, %v3728_v57 }
 0xc9b   :  { %3729 = vrcp.f32 %v1028_v58 }
 0xca8   :  { %v3730_v59 = vpop.eup %3729 }
 0xca9   :  { %v1037_v60 = vsub.f32 1.0, %v3730_v59 }
 0xcab   :  { %v1038_v63 = vmul.f32 %v1037_v60, %v873_v49 }
 0xd07   :  { %v1034_v61 = vpop.permute.xlu1 %1033 }
 0xd08   :  { %v1036_v62 = vmul.f32 %v3730_v59, %v1034_v61 }
 0xd0a   :  { %v1039_v9 = vadd.f32 %v1038_v63, %v1036_v62 }
 0xd0c   :  { %1133 = vrot.lane.b32.xlu0 %v1039_v9, %s3999_s9  ;;  %3447 = vmatmul.mubr.msk.f32.vlgmr.msra.gmra.mxu0 %vm132_vm1, %v1039_v9 }
 0xd0d   :  { %3461 = vmatpush3.msra.mxu0 %v4080_v1  ;;  %3468 = vmatprep.mubr.msk.f32.mxu0 %vm3997_vm0, %v3996_v0 }
 0xd0e   :  { %3462 = vmatprep.subr.mxu0 %v3996_v0 }
 0xd0f   :  { %3463 = vmatpush3.msra.mxu0 %v4084_v3 }
 0xd10   :  { %3464 = vmatprep.subr.mxu0 %v3996_v0 }
 0xd11   :  { %3465 = vmatpush3.msra.mxu0 %v4092_v5 }
 0xd12   :  { %3466 = vmatprep.subr.mxu0 %v3996_v0 }
 0xd13   :  { %3467 = vmatpush3.msra.mxu0 %v4100_v7 }
 0xd14   :  { %3482 = vmatprep.subr.mxu0 %v3996_v0  ;;  %3469 = vmatmul.mubr.msk.f32.vlgmr.msra.gmra.mxu0 %vm132_vm1, %v1251_v55 }
 0xd15   :  { %3483 = vmatpush3.msra.mxu0 %v4118_v11  ;;  %3490 = vmatprep.mubr.msk.f32.mxu0 %vm3997_vm0, %v3996_v0 }
 0xd16   :  { %3484 = vmatprep.subr.mxu0 %v3996_v0 }
 0xd17   :  { %3485 = vmatpush3.msra.mxu0 %v4120_v12 }
 0xd18   :  { %3486 = vmatprep.subr.mxu0 %v3996_v0 }
 0xd19   :  { %3487 = vmatpush3.msra.mxu0 %v4132_v20 }
 0xd1a   :  { %3488 = vmatprep.subr.mxu0 %v3996_v0 }
 0xd1b   :  { %3489 = vmatpush3.msra.mxu0 %v4136_v21 }
 0xd1c   :  { %3504 = vmatprep.subr.mxu0 %v3996_v0 }
 0xd7e   :  { %v1134_v46 = vpop.permute.xlu0 %1133 }
 0xdcc   :  { %v1109_v10 = vpop.f32.mrf.mxu0 }
 0xdcd   :  { %v1119_v14 = vmax.f32 %v1109_v10, 0.0  ;;  %v1113_v16 = vsub.f32 0.0, %v1109_v10 }
 0xdce   :  { %v3448_v15 = vpop.f32.mrf.mxu0 }
 0xdcf   :  { %1121 = vrot.lane.b32.xlu1 %v1119_v14, %s3998_s8  ;;  %v1114_v17 = vmul.f32 1.442695, %v1113_v16 }
 0xdd1   :  { %3731 = vpow2.f32 %v1114_v17 }
 0xdd4   :  { %v1321_v61 = vpop.f32.mrf.mxu0 }
 0xdd6   :  { %v3470_v62 = vpop.f32.mrf.mxu0 }
 0xdde   :  { %v3732_v18 = vpop.eup %3731 }
 0xddf   :  { %v1116_v19 = vadd.f32 1.0, %v3732_v18 }
 0xde1   :  { %3733 = vrcp.f32 %v1116_v19 }
 0xdee   :  { %v3734_v22 = vpop.eup %3733 }
 0xdef   :  { %v1125_v23 = vsub.f32 1.0, %v3734_v22 }
 0xdf1   :  { %v1126_v26 = vmul.f32 %v1125_v23, %v1039_v9  ;;  %v1136_v47 = vmul.f32 %v1134_v46, %v1125_v23  ;;  %v1322_v9 = vadd.f32 %v4129_v13, %v1321_v61  ;;  %v1624_v61 = vld [vmem:[#allocation5 + $0x20] sm:$0xff] }
 0xe41   :  { %v1122_v24 = vpop.permute.xlu1 %1121 }
 0xe42   :  { %v1124_v25 = vmul.f32 %v3734_v22, %v1122_v24 }
 0xe44   :  { %v1127_v27 = vadd.f32 %v1126_v26, %v1124_v25 }
 0xe46   :  { %3458 = vmatmul.mubr.msk.f32.vlgmr.msra.gmra.mxu1 %vm132_vm1, %v1127_v27 }
 0xe47   :  { %3472 = vmatpush3.msra.mxu1 %v4082_v2  ;;  %3479 = vmatprep.mubr.msk.f32.mxu1 %vm3997_vm0, %v3996_v0 }
 0xe48   :  { %3473 = vmatprep.subr.mxu1 %v3996_v0 }
 0xe49   :  { %3474 = vmatpush3.msra.mxu1 %v4088_v4 }
 0xe4a   :  { %3475 = vmatprep.subr.mxu1 %v3996_v0 }
 0xe4b   :  { %3476 = vmatpush3.msra.mxu1 %v4094_v6 }
 0xe4c   :  { %3477 = vmatprep.subr.mxu1 %v3996_v0 }
 0xe4d   :  { %3478 = vmatpush3.msra.mxu1 %v4102_v8 }
 0xe4e   :  { %3493 = vmatprep.subr.mxu1 %v3996_v0 }
 0xf06   :  { %v1207_v28 = vpop.f32.mrf.mxu1 }
 0xf07   :  { %1218 = vrot.lane.b32.xlu1 %v1207_v28, %s3998_s8  ;;  %v1211_v30 = vsub.f32 0.0, %v1207_v28 }
 0xf08   :  { %v3459_v29 = vpop.f32.mrf.mxu1 }
 0xf09   :  { %v1212_v31 = vmul.f32 1.442695, %v1211_v30 }
 0xf0b   :  { %1129 = vrot.lane.b32.xlu1 %v3734_v22, %s3998_s8  ;;  %3735 = vpow2.f32 %v1212_v31 }
 0xf18   :  { %v3736_v32 = vpop.eup %3735 }
 0xf19   :  { %v1214_v37 = vadd.f32 1.0, %v3736_v32 }
 0xf1b   :  { %3737 = vrcp.f32 %v1214_v37 }
 0xf28   :  { %v3738_v38 = vpop.eup %3737 }
 0xf29   :  { %v1222_v39 = vsub.f32 1.0, %v3738_v38 }
 0xf2b   :  { %v1223_v42 = vmul.f32 %v1222_v39, %v1127_v27 }
 0xf79   :  { %v1219_v40 = vpop.permute.xlu1 %1218 }
 0xf7a   :  { %v1221_v41 = vmul.f32 %v3738_v38, %v1219_v40 }
 0xf7c   :  { %v1224_v43 = vadd.f32 %v1223_v42, %v1221_v41 }
 0xf7d   :  { %v1130_v44 = vpop.permute.xlu1 %1129 }
 0xf7e   :  { %1226 = vrot.lane.b32.xlu1 %v1224_v43, %s3999_s9  ;;  %v1132_v45 = vmul.f32 %v3734_v22, %v1130_v44 }
 0xf80   :  { %v1137_v48 = vadd.f32 %v1136_v47, %v1132_v45 }
 0xff0   :  { %v1227_v49 = vpop.permute.xlu1 %1226 }
 0xff1   :  { %v1229_v50 = vadd.f32 %v1227_v49, %v1137_v48 }
 0xff3   :  { %v1230_v51 = vmul.f32 0.5, %v1229_v50 }
 0xff5   :  { %v1231_v52 = vmul.f32 %v1230_v51, %v1230_v51 }
 0xff7   :  { %1233 = vrot.lane.b32.xlu1 %v1231_v52, %s3999_s9 }
0x1069   :  { %v1234_v53 = vpop.permute.xlu1 %1233 }
0x106a   :  { %v1236_v54 = vsel %vm132_vm1, %v1234_v53, 0.0 }
0x106b   :  { %1237 = vadd.xlane.f32.xlu1 %v1236_v54 }
0x10f4   :  { %v1238_v56 = vpop.xlane.xlu1 %1237 }
0x10f5   :  { %3739 = vrcp.f32 %v1238_v56  ;;  %vm1239_vm4 = vcmp.gt.f32.partialorder %v1238_v56, 625.0 }
0x1102   :  { %v3740_v57 = vpop.eup %3739 }
0x1103   :  { %v1241_v58 = vmul.f32 625.0, %v3740_v57 }
0x1105   :  { %v1242_v59 = vsel %vm1239_vm4, %v1241_v58, 1.0 }
0x1106   :  { %v1243_v60 = vmul.f32 %v1242_v59, %v1230_v51 }
0x1108   :  { %1245 = vrot.lane.b32.xlu0 %v1243_v60, %s3999_s9 }
0x117a   :  { %v1246_v63 = vpop.permute.xlu0 %1245 }
0x117b   :  { %1249 = vst.msk [vmem:[#allocation13 + $0x10] sm:$0xff] %vm132_vm1, %v1246_v63  ;;  %3480 = vmatmul.mubr.msk.f32.vlgmr.msra.gmra.mxu1 %vm132_vm1, %v1246_v63 }
0x117c   :  { %3494 = vmatpush3.msra.mxu1 %v4152_v33  ;;  %3501 = vmatprep.mubr.msk.f32.mxu1 %vm3997_vm0, %v3996_v0 }
0x117d   :  { %3495 = vmatprep.subr.mxu1 %v3996_v0 }
0x117e   :  { %3496 = vmatpush3.msra.mxu1 %v4154_v34 }
0x117f   :  { %3497 = vmatprep.subr.mxu1 %v3996_v0 }
0x1180   :  { %3498 = vmatpush3.msra.mxu1 %v4160_v35 }
0x1181   :  { %3499 = vmatprep.subr.mxu1 %v3996_v0 }
0x1182   :  { %3500 = vmatpush3.msra.mxu1 %v4164_v36 }
0x1183   :  { %3515 = vmatprep.subr.mxu1 %v3996_v0 }
0x123b   :  { %v1393_v10 = vpop.f32.mrf.mxu1 }
0x123c   :  { %v1397_v14 = vadd.f32 %v1393_v10, %v1322_v9 }
0x123d   :  { %v3481_v15 = vpop.f32.mrf.mxu1 }
0x123e   :  { %3741 = vtanh.f32 %v1397_v14  ;;  %v1398_v17 = vsub.f32 0.0, %v1397_v14 }
0x1240   :  { %v1399_v18 = vmul.f32 1.442695, %v1398_v17 }
0x1242   :  { %3743 = vpow2.f32 %v1399_v18 }
0x124b   :  { %v3742_v16 = vpop.eup %3741 }
0x124c   :  { %1406 = vrot.lane.b32.xlu0 %v3742_v16, %s3998_s8 }
0x124f   :  { %v3744_v19 = vpop.eup %3743 }
0x1250   :  { %v1401_v22 = vadd.f32 1.0, %v3744_v19 }
0x1252   :  { %3745 = vrcp.f32 %v1401_v22 }
0x125f   :  { %v3746_v23 = vpop.eup %3745 }
0x1260   :  { %v1410_v24 = vsub.f32 1.0, %v3746_v23 }
0x1262   :  { %v1411_v27 = vmul.f32 %v1410_v24, %v1246_v63 }
0x12be   :  { %v1407_v25 = vpop.permute.xlu0 %1406 }
0x12bf   :  { %v1409_v26 = vmul.f32 %v3746_v23, %v1407_v25 }
0x12c1   :  { %v1412_v28 = vadd.f32 %v1411_v27, %v1409_v26  ;;  %v4385_v27 = vld [vmem:[#allocation7 + $0x10] sm:$0xff] }
0x12c3   :  { %3491 = vmatmul.mubr.msk.f32.vlgmr.msra.gmra.mxu0 %vm132_vm1, %v1412_v28 }
0x12c4   :  { %3505 = vmatpush3.msra.mxu0 %v4080_v1  ;;  %3512 = vmatprep.mubr.msk.f32.mxu0 %vm3997_vm0, %v3996_v0 }
0x12c5   :  { %3506 = vmatprep.subr.mxu0 %v3996_v0 }
0x12c6   :  { %3507 = vmatpush3.msra.mxu0 %v4084_v3 }
0x12c7   :  { %3508 = vmatprep.subr.mxu0 %v3996_v0 }
0x12c8   :  { %3509 = vmatpush3.msra.mxu0 %v4092_v5 }
0x12c9   :  { %3510 = vmatprep.subr.mxu0 %v3996_v0 }
0x12ca   :  { %3511 = vmatpush3.msra.mxu0 %v4100_v7 }
0x12cb   :  { %3526 = vmatprep.subr.mxu0 %v3996_v0  ;;  %3513 = vmatmul.mubr.msk.f32.vlgmr.msra.gmra.mxu0 %vm132_vm1, %v1624_v61 }
0x12cc   :  { %3527 = vmatpush3.msra.mxu0 %v4118_v11  ;;  %3534 = vmatprep.mubr.msk.f32.mxu0 %vm3997_vm0, %v3996_v0 }
0x12cd   :  { %3528 = vmatprep.subr.mxu0 %v3996_v0 }
0x12ce   :  { %3529 = vmatpush3.msra.mxu0 %v4120_v12 }
0x12cf   :  { %3530 = vmatprep.subr.mxu0 %v3996_v0 }
0x12d0   :  { %3531 = vmatpush3.msra.mxu0 %v4132_v20 }
0x12d1   :  { %3532 = vmatprep.subr.mxu0 %v3996_v0 }
0x12d2   :  { %3533 = vmatpush3.msra.mxu0 %v4136_v21 }
0x12d3   :  { %3548 = vmatprep.subr.mxu0 %v3996_v0 }
0x1383   :  { %v1482_v29 = vpop.f32.mrf.mxu0 }
0x1384   :  { %v1492_v30 = vmax.f32 %v1482_v29, 0.0  ;;  %v1486_v31 = vsub.f32 0.0, %v1482_v29  ;;  %v4393_v29 = vld [vmem:[#allocation7] sm:$0xff] }
0x1385   :  { %v3492_v1 = vpop.f32.mrf.mxu0 }
0x1386   :  { %1494 = vrot.lane.b32.xlu0 %v1492_v30, %s3998_s8  ;;  %v1487_v32 = vmul.f32 1.442695, %v1486_v31 }
0x1388   :  { %3747 = vpow2.f32 %v1487_v32 }
0x138b   :  { %v1694_v12 = vpop.f32.mrf.mxu0 }
0x138c   :  { %v1695_v20 = vadd.f32 %v4129_v13, %v1694_v12  ;;  %v4379_v13 = vld [vmem:[#allocation7 + $0x18] sm:$0xff] }
0x138d   :  { %v3514_v14 = vpop.f32.mrf.mxu0  ;;  %v4423_v12 = vld [vmem:[#allocation10 + $0x18] sm:$0xff] }
0x138e   :  { %v4429_v14 = vld [vmem:[#allocation10 + $0x10] sm:$0xff] }
0x1395   :  { %v3748_v37 = vpop.eup %3747 }
0x1396   :  { %v1489_v3 = vadd.f32 1.0, %v3748_v37 }
0x1398   :  { %3749 = vrcp.f32 %v1489_v3 }
0x13a5   :  { %v3750_v38 = vpop.eup %3749 }
0x13a6   :  { %v1498_v39 = vsub.f32 1.0, %v3750_v38 }
0x13a8   :  { %v1499_v41 = vmul.f32 %v1498_v39, %v1412_v28 }
0x13f8   :  { %v1495_v5 = vpop.permute.xlu0 %1494 }
0x13f9   :  { %v1497_v40 = vmul.f32 %v3750_v38, %v1495_v5 }
0x13fb   :  { %v1500_v42 = vadd.f32 %v1499_v41, %v1497_v40 }
0x13fd   :  { %3502 = vmatmul.mubr.msk.f32.vlgmr.msra.gmra.mxu1 %vm132_vm1, %v1500_v42 }
0x13fe   :  { %3516 = vmatpush3.msra.mxu1 %v4082_v2  ;;  %3523 = vmatprep.mubr.msk.f32.mxu1 %vm3997_vm0, %v3996_v0 }
0x13ff   :  { %3517 = vmatprep.subr.mxu1 %v3996_v0 }
0x1400   :  { %3518 = vmatpush3.msra.mxu1 %v4088_v4 }
0x1401   :  { %3519 = vmatprep.subr.mxu1 %v3996_v0 }
0x1402   :  { %3520 = vmatpush3.msra.mxu1 %v4094_v6 }
0x1403   :  { %3521 = vmatprep.subr.mxu1 %v3996_v0 }
0x1404   :  { %3522 = vmatpush3.msra.mxu1 %v4102_v8 }
0x1405   :  { %3537 = vmatprep.subr.mxu1 %v3996_v0 }
0x14bd   :  { %v1580_v7 = vpop.f32.mrf.mxu1 }
0x14be   :  { %1591 = vrot.lane.b32.xlu0 %v1580_v7, %s3998_s8  ;;  %v1584_v43 = vsub.f32 0.0, %v1580_v7 }
0x14bf   :  { %v3503_v2 = vpop.f32.mrf.mxu1 }
0x14c0   :  { %v1585_v4 = vmul.f32 1.442695, %v1584_v43  ;;  %v4399_v2 = vld [vmem:[#allocation8 + $0x18] sm:$0xff]  ;;  %v4405_v43 = vld [vmem:[#allocation8 + $0x10] sm:$0xff] }
0x14c2   :  { %1502 = vrot.lane.b32.xlu0 %v3750_v38, %s3998_s8  ;;  %3751 = vpow2.f32 %v1585_v4  ;;  %v4409_v4 = vld [vmem:[#allocation8 + $0x8] sm:$0xff] }
0x14c6   :  { %1506 = vrot.lane.b32.xlu0 %v1412_v28, %s3999_s9  ;;  %v4389_v28 = vld [vmem:[#allocation7 + $0x8] sm:$0xff] }
0x14cf   :  { %v3752_v44 = vpop.eup %3751 }
0x14d0   :  { %v1587_v45 = vadd.f32 1.0, %v3752_v44  ;;  %v4413_v44 = vld [vmem:[#allocation8] sm:$0xff] }
0x14d2   :  { %3753 = vrcp.f32 %v1587_v45 }
0x14df   :  { %v3754_v6 = vpop.eup %3753 }
0x14e0   :  { %v1595_v46 = vsub.f32 1.0, %v3754_v6 }
0x14e2   :  { %v1596_v48 = vmul.f32 %v1595_v46, %v1500_v42 }
0x1530   :  { %v1592_v47 = vpop.permute.xlu0 %1591 }
0x1531   :  { %v1594_v8 = vmul.f32 %v3754_v6, %v1592_v47 }
0x1533   :  { %v1597_v49 = vadd.f32 %v1596_v48, %v1594_v8 }
0x1534   :  { %v1503_v50 = vpop.permute.xlu0 %1502 }
0x1535   :  { %1599 = vrot.lane.b32.xlu0 %v1597_v49, %s3999_s9  ;;  %v1505_v53 = vmul.f32 %v3750_v38, %v1503_v50 }
0x1538   :  { %v1507_v51 = vpop.permute.xlu0 %1506 }
0x1539   :  { %v1509_v52 = vmul.f32 %v1507_v51, %v1498_v39 }
0x153b   :  { %v1510_v54 = vadd.f32 %v1509_v52, %v1505_v53 }
0x15a7   :  { %v1600_v55 = vpop.permute.xlu0 %1599 }
0x15a8   :  { %v1602_v56 = vadd.f32 %v1600_v55, %v1510_v54 }
0x15aa   :  { %v1603_v57 = vmul.f32 0.5, %v1602_v56 }
0x15ac   :  { %v1604_v58 = vmul.f32 %v1603_v57, %v1603_v57 }
0x15ae   :  { %1606 = vrot.lane.b32.xlu1 %v1604_v58, %s3999_s9 }
0x1620   :  { %v1607_v59 = vpop.permute.xlu1 %1606 }
0x1621   :  { %v1609_v60 = vsel %vm132_vm1, %v1607_v59, 0.0 }
0x1622   :  { %1610 = vadd.xlane.f32.xlu0 %v1609_v60 }
0x16ab   :  { %v1611_v62 = vpop.xlane.xlu0 %1610 }
0x16ac   :  { %3755 = vrcp.f32 %v1611_v62  ;;  %vm1612_vm5 = vcmp.gt.f32.partialorder %v1611_v62, 625.0 }
0x16b9   :  { %v3756_v11 = vpop.eup %3755 }
0x16ba   :  { %v1614_v63 = vmul.f32 625.0, %v3756_v11 }
0x16bc   :  { %v1615_v9 = vsel %vm1612_vm5, %v1614_v63, 1.0 }
0x16bd   :  { %v1616_v10 = vmul.f32 %v1615_v9, %v1603_v57 }
0x16bf   :  { %1618 = vrot.lane.b32.xlu1 %v1616_v10, %s3999_s9  ;;  %v1997_v10 = vld [vmem:[#allocation5 + $0x28] sm:$0xff] }
0x1731   :  { %v1619_v15 = vpop.permute.xlu1 %1618 }
0x1732   :  { %1622 = vst.msk [vmem:[#allocation13 + $0x18] sm:$0xff] %vm132_vm1, %v1619_v15  ;;  %3524 = vmatmul.mubr.msk.f32.vlgmr.msra.gmra.mxu1 %vm132_vm1, %v1619_v15 }
0x1733   :  { %3538 = vmatpush3.msra.mxu1 %v4152_v33  ;;  %3545 = vmatprep.mubr.msk.f32.mxu1 %vm3997_vm0, %v3996_v0 }
0x1734   :  { %3539 = vmatprep.subr.mxu1 %v3996_v0 }
0x1735   :  { %3540 = vmatpush3.msra.mxu1 %v4154_v34 }
0x1736   :  { %3541 = vmatprep.subr.mxu1 %v3996_v0 }
0x1737   :  { %3542 = vmatpush3.msra.mxu1 %v4160_v35 }
0x1738   :  { %3543 = vmatprep.subr.mxu1 %v3996_v0 }
0x1739   :  { %3544 = vmatpush3.msra.mxu1 %v4164_v36 }
0x173a   :  { %3559 = vmatprep.subr.mxu1 %v3996_v0 }
0x17f2   :  { %v1766_v21 = vpop.f32.mrf.mxu1 }
0x17f3   :  { %v1770_v33 = vadd.f32 %v1766_v21, %v1695_v20  ;;  %v4437_v20 = vld [vmem:[#allocation10] sm:$0xff] }
0x17f4   :  { %v3525_v16 = vpop.f32.mrf.mxu1 }
0x17f5   :  { %3757 = vtanh.f32 %v1770_v33  ;;  %v1771_v34 = vsub.f32 0.0, %v1770_v33 }
0x17f7   :  { %v1772_v18 = vmul.f32 1.442695, %v1771_v34 }
0x17f9   :  { %3759 = vpow2.f32 %v1772_v18 }
0x1802   :  { %v3758_v17 = vpop.eup %3757 }
0x1803   :  { %1779 = vrot.lane.b32.xlu1 %v3758_v17, %s3998_s8 }
0x1806   :  { %v3760_v19 = vpop.eup %3759 }
0x1807   :  { %v1774_v35 = vadd.f32 1.0, %v3760_v19 }
0x1809   :  { %3761 = vrcp.f32 %v1774_v35 }
0x1816   :  { %v3762_v22 = vpop.eup %3761 }
0x1817   :  { %v1783_v23 = vsub.f32 1.0, %v3762_v22 }
0x1819   :  { %v1784_v25 = vmul.f32 %v1783_v23, %v1619_v15  ;;  %v4433_v15 = vld [vmem:[#allocation10 + $0x8] sm:$0xff]  ;;  %v4450_v23 = vld [vmem:[#allocation11 + $0x10] sm:$0xff] }
0x1875   :  { %v1780_v36 = vpop.permute.xlu1 %1779 }
0x1876   :  { %v1782_v24 = vmul.f32 %v3762_v22, %v1780_v36  ;;  %v4444_v22 = vld [vmem:[#allocation11 + $0x18] sm:$0xff]  ;;  %v4454_v36 = vld [vmem:[#allocation11 + $0x8] sm:$0xff] }
0x1878   :  { %v1785_v26 = vadd.f32 %v1784_v25, %v1782_v24  ;;  %v4458_v24 = vld [vmem:[#allocation11] sm:$0xff]  ;;  %v4465_v25 = vld [vmem:[%s4597_s3] ss:$0 sm:$0xff]  ;;  %s4000_s3 = smov [#allocation13]  }
0x1879   :  { %s3120_s12 = sshll.u32 %s4000_s3, 4  ;;  %s3121_s12 = int_to_ptr.vmem [resolvable:$true] %s3120_s12 }
0x187a   :  { %1879 = vrot.lane.b32.xlu0 %v1785_v26, %s3999_s9  ;;  %3535 = vmatmul.mubr.msk.f32.vlgmr.msra.gmra.mxu0 %vm132_vm1, %v1785_v26  ;;  %s3958_s13 = scalar_lea.vmem %s3121_s12, 1024  ;;  %p3963_p3 = scmp.lt.s32.totalorder %s3121_s12, %s3121_s12 }
0x187b   :  { %3549 = vmatpush3.msra.mxu0 %v4379_v13  ;;  %3556 = vmatprep.mubr.msk.f32.mxu0 %vm3997_vm0, %v3996_v0  ;;  %p3959_p2 = scmp.ne.s32.totalorder %s3121_s12, %s3958_s13  ;;  %p3964_p4 = scmp.lt.s32.totalorder %s3958_s13, %s3958_s13 }
0x187c   :  { %3550 = vmatprep.subr.mxu0 %v3996_v0 }
0x187d   :  { %3551 = vmatpush3.msra.mxu0 %v4385_v27  ;;  %p3965_p5 = por %p3964_p4, %p3963_p3 }
0x187e   :  { %3552 = vmatprep.subr.mxu0 %v3996_v0 }
0x187f   :  { %3553 = vmatpush3.msra.mxu0 %v4389_v28  ;;  %p3966_p6 = pnand %p3965_p5, %p3959_p2 }
0x1880   :  { %3554 = vmatprep.subr.mxu0 %v3996_v0 }
0x1881   :  { %3555 = vmatpush3.msra.mxu0 %v4393_v29 }
0x1882   :  { %3570 = vmatprep.subr.mxu0 %v3996_v0  ;;  %3557 = vmatmul.mubr.msk.f32.vlgmr.msra.gmra.mxu0 %vm132_vm1, %v1997_v10 }
0x1883   :  { %3571 = vmatpush3.msra.mxu0 %v4423_v12  ;;  %3578 = vmatprep.mubr.msk.f32.mxu0 %vm3997_vm0, %v3996_v0 }
0x1884   :  { %3572 = vmatprep.subr.mxu0 %v3996_v0 }
0x1885   :  { %3573 = vmatpush3.msra.mxu0 %v4429_v14 }
0x1886   :  { %3574 = vmatprep.subr.mxu0 %v3996_v0 }
0x1887   :  { %3575 = vmatpush3.msra.mxu0 %v4433_v15 }
0x1888   :  { %3576 = vmatprep.subr.mxu0 %v3996_v0 }
0x1889   :  { %3577 = vmatpush3.msra.mxu0 %v4437_v20 }
0x188a   :  { %3592 = vmatprep.subr.mxu0 %v3996_v0 }
0x18ec   :  { %v1880_v57 = vpop.permute.xlu0 %1879 }
0x193a   :  { %v1855_v30 = vpop.f32.mrf.mxu0 }
0x193b   :  { %v1865_v1 = vmax.f32 %v1855_v30, 0.0  ;;  %v1859_v32 = vsub.f32 0.0, %v1855_v30 }
0x193c   :  { %v3536_v31 = vpop.f32.mrf.mxu0 }
0x193d   :  { %1867 = vrot.lane.b32.xlu1 %v1865_v1, %s3998_s8  ;;  %v1860_v37 = vmul.f32 1.442695, %v1859_v32 }
0x193f   :  { %3763 = vpow2.f32 %v1860_v37 }
0x1942   :  { %v2067_v18 = vpop.f32.mrf.mxu0 }
0x1944   :  { %v3558_v19 = vpop.f32.mrf.mxu0 }
0x194c   :  { %v3764_v3 = vpop.eup %3763 }
0x194d   :  { %v1862_v38 = vadd.f32 1.0, %v3764_v3 }
0x194f   :  { %3765 = vrcp.f32 %v1862_v38 }
0x195c   :  { %v3766_v39 = vpop.eup %3765 }
0x195d   :  { %v1871_v5 = vsub.f32 1.0, %v3766_v39 }
0x195f   :  { %v1872_v42 = vmul.f32 %v1871_v5, %v1785_v26  ;;  %v1882_v58 = vmul.f32 %v1880_v57, %v1871_v5  ;;  %v2068_v26 = vadd.f32 %v4465_v25, %v2067_v18 }
0x19af   :  { %v1868_v40 = vpop.permute.xlu1 %1867 }
0x19b0   :  { %v1870_v41 = vmul.f32 %v3766_v39, %v1868_v40 }
0x19b2   :  { %v1873_v7 = vadd.f32 %v1872_v42, %v1870_v41 }
0x19b4   :  { %3546 = vmatmul.mubr.msk.f32.vlgmr.msra.gmra.mxu1 %vm132_vm1, %v1873_v7 }
0x19b5   :  { %3560 = vmatpush3.msra.mxu1 %v4399_v2  ;;  %3567 = vmatprep.mubr.msk.f32.mxu1 %vm3997_vm0, %v3996_v0 }
0x19b6   :  { %3561 = vmatprep.subr.mxu1 %v3996_v0 }
0x19b7   :  { %3562 = vmatpush3.msra.mxu1 %v4405_v43 }
0x19b8   :  { %3563 = vmatprep.subr.mxu1 %v3996_v0 }
0x19b9   :  { %3564 = vmatpush3.msra.mxu1 %v4409_v4 }
0x19ba   :  { %3565 = vmatprep.subr.mxu1 %v3996_v0 }
0x19bb   :  { %3566 = vmatpush3.msra.mxu1 %v4413_v44 }
0x19bc   :  { %3581 = vmatprep.subr.mxu1 %v3996_v0 }
0x1a74   :  { %v1953_v45 = vpop.f32.mrf.mxu1 }
0x1a75   :  { %1964 = vrot.lane.b32.xlu1 %v1953_v45, %s3998_s8  ;;  %v1957_v46 = vsub.f32 0.0, %v1953_v45 }
0x1a76   :  { %v3547_v6 = vpop.f32.mrf.mxu1 }
0x1a77   :  { %v1958_v47 = vmul.f32 1.442695, %v1957_v46 }
0x1a79   :  { %1875 = vrot.lane.b32.xlu1 %v3766_v39, %s3998_s8  ;;  %3767 = vpow2.f32 %v1958_v47 }
0x1a86   :  { %v3768_v8 = vpop.eup %3767 }
0x1a87   :  { %v1960_v48 = vadd.f32 1.0, %v3768_v8 }
0x1a89   :  { %3769 = vrcp.f32 %v1960_v48 }
0x1a96   :  { %v3770_v49 = vpop.eup %3769 }
0x1a97   :  { %v1968_v50 = vsub.f32 1.0, %v3770_v49 }
0x1a99   :  { %v1969_v53 = vmul.f32 %v1968_v50, %v1873_v7 }
0x1ae7   :  { %v1965_v51 = vpop.permute.xlu1 %1964 }
0x1ae8   :  { %v1967_v52 = vmul.f32 %v3770_v49, %v1965_v51 }
0x1aea   :  { %v1970_v54 = vadd.f32 %v1969_v53, %v1967_v52 }
0x1aeb   :  { %v1876_v55 = vpop.permute.xlu1 %1875 }
0x1aec   :  { %1972 = vrot.lane.b32.xlu1 %v1970_v54, %s3999_s9  ;;  %v1878_v56 = vmul.f32 %v3766_v39, %v1876_v55 }
0x1aee   :  { %v1883_v59 = vadd.f32 %v1882_v58, %v1878_v56 }
0x1b5e   :  { %v1973_v60 = vpop.permute.xlu1 %1972 }
0x1b5f   :  { %v1975_v61 = vadd.f32 %v1973_v60, %v1883_v59 }
0x1b61   :  { %v1976_v62 = vmul.f32 0.5, %v1975_v61 }
0x1b63   :  { %v1977_v11 = vmul.f32 %v1976_v62, %v1976_v62 }
0x1b65   :  { %1979 = vrot.lane.b32.xlu1 %v1977_v11, %s3999_s9 }
0x1bd7   :  { %v1980_v63 = vpop.permute.xlu1 %1979 }
0x1bd8   :  { %v1982_v9 = vsel %vm132_vm1, %v1980_v63, 0.0 }
0x1bd9   :  { %1983 = vadd.xlane.f32.xlu1 %v1982_v9 }
0x1c62   :  { %v1984_v21 = vpop.xlane.xlu1 %1983 }
0x1c63   :  { %3771 = vrcp.f32 %v1984_v21  ;;  %vm1985_vm6 = vcmp.gt.f32.partialorder %v1984_v21, 625.0 }
0x1c70   :  { %v3772_v33 = vpop.eup %3771 }
0x1c71   :  { %v1987_v16 = vmul.f32 625.0, %v3772_v33 }
0x1c73   :  { %v1988_v17 = vsel %vm1985_vm6, %v1987_v16, 1.0 }
0x1c74   :  { %v1989_v34 = vmul.f32 %v1988_v17, %v1976_v62 }
0x1c76   :  { %1991 = vrot.lane.b32.xlu0 %v1989_v34, %s3999_s9 }
0x1ce8   :  { %v1992_v35 = vpop.permute.xlu0 %1991 }
0x1ce9   :  { %1995 = vst.msk [vmem:[#allocation13 + $0x20] sm:$0xff] %vm132_vm1, %v1992_v35  ;;  %3568 = vmatmul.mubr.msk.f32.vlgmr.msra.gmra.mxu1 %vm132_vm1, %v1992_v35 }
0x1cea   :  { %3582 = vmatpush3.msra.mxu1 %v4444_v22  ;;  %3589 = vmatprep.mubr.msk.f32.mxu1 %vm3997_vm0, %v3996_v0 }
0x1ceb   :  { %3583 = vmatprep.subr.mxu1 %v3996_v0 }
0x1cec   :  { %3584 = vmatpush3.msra.mxu1 %v4450_v23 }
0x1ced   :  { %3585 = vmatprep.subr.mxu1 %v3996_v0 }
0x1cee   :  { %3586 = vmatpush3.msra.mxu1 %v4454_v36 }
0x1cef   :  { %3587 = vmatprep.subr.mxu1 %v3996_v0 }
0x1cf0   :  { %3588 = vmatpush3.msra.mxu1 %v4458_v24 }
0x1cf1   :  { %3603 = vmatprep.subr.mxu1 %v3996_v0 }
0x1da9   :  { %v2139_v30 = vpop.f32.mrf.mxu1 }
0x1daa   :  { %v2143_v1 = vadd.f32 %v2139_v30, %v2068_v26 }
0x1dab   :  { %v3569_v31 = vpop.f32.mrf.mxu1 }
0x1dac   :  { %3773 = vtanh.f32 %v2143_v1  ;;  %v2144_v37 = vsub.f32 0.0, %v2143_v1 }
0x1dae   :  { %v2145_v3 = vmul.f32 1.442695, %v2144_v37  ;;  %v2370_v37 = vld [vmem:[#allocation5 + $0x30] sm:$0xff] }
0x1db0   :  { %3775 = vpow2.f32 %v2145_v3 }
0x1db9   :  { %v3774_v32 = vpop.eup %3773 }
0x1dba   :  { %2152 = vrot.lane.b32.xlu0 %v3774_v32, %s3998_s8 }
0x1dbd   :  { %v3776_v38 = vpop.eup %3775 }
0x1dbe   :  { %v2147_v39 = vadd.f32 1.0, %v3776_v38 }
0x1dc0   :  { %3777 = vrcp.f32 %v2147_v39 }
0x1dcd   :  { %v3778_v5 = vpop.eup %3777 }
0x1dce   :  { %v2156_v40 = vsub.f32 1.0, %v3778_v5 }
0x1dd0   :  { %v2157_v7 = vmul.f32 %v2156_v40, %v1992_v35 }
0x1e2c   :  { %v2153_v41 = vpop.permute.xlu0 %2152 }
0x1e2d   :  { %v2155_v42 = vmul.f32 %v3778_v5, %v2153_v41 }
0x1e2f   :  { %v2158_v45 = vadd.f32 %v2157_v7, %v2155_v42 }
0x1e31   :  { %3579 = vmatmul.mubr.msk.f32.vlgmr.msra.gmra.mxu0 %vm132_vm1, %v2158_v45 }
0x1e32   :  { %3593 = vmatpush3.msra.mxu0 %v4379_v13  ;;  %3600 = vmatprep.mubr.msk.f32.mxu0 %vm3997_vm0, %v3996_v0 }
0x1e33   :  { %3594 = vmatprep.subr.mxu0 %v3996_v0 }
0x1e34   :  { %3595 = vmatpush3.msra.mxu0 %v4385_v27 }
0x1e35   :  { %3596 = vmatprep.subr.mxu0 %v3996_v0 }
0x1e36   :  { %3597 = vmatpush3.msra.mxu0 %v4389_v28 }
0x1e37   :  { %3598 = vmatprep.subr.mxu0 %v3996_v0 }
0x1e38   :  { %3599 = vmatpush3.msra.mxu0 %v4393_v29 }
0x1e39   :  { %3614 = vmatprep.subr.mxu0 %v3996_v0  ;;  %3601 = vmatmul.mubr.msk.f32.vlgmr.msra.gmra.mxu0 %vm132_vm1, %v2370_v37 }
0x1e3a   :  { %3615 = vmatpush3.msra.mxu0 %v4423_v12  ;;  %3622 = vmatprep.mubr.msk.f32.mxu0 %vm3997_vm0, %v3996_v0 }
0x1e3b   :  { %3616 = vmatprep.subr.mxu0 %v3996_v0 }
0x1e3c   :  { %3617 = vmatpush3.msra.mxu0 %v4429_v14 }
0x1e3d   :  { %3618 = vmatprep.subr.mxu0 %v3996_v0 }
0x1e3e   :  { %3619 = vmatpush3.msra.mxu0 %v4433_v15 }
0x1e3f   :  { %3620 = vmatprep.subr.mxu0 %v3996_v0 }
0x1e40   :  { %3621 = vmatpush3.msra.mxu0 %v4437_v20 }
0x1e41   :  { %3636 = vmatprep.subr.mxu0 %v3996_v0 }
0x1ef1   :  { %v2228_v6 = vpop.f32.mrf.mxu0 }
0x1ef2   :  { %v2238_v46 = vmax.f32 %v2228_v6, 0.0  ;;  %v2232_v8 = vsub.f32 0.0, %v2228_v6 }
0x1ef3   :  { %v3580_v47 = vpop.f32.mrf.mxu0 }
0x1ef4   :  { %2240 = vrot.lane.b32.xlu0 %v2238_v46, %s3998_s8  ;;  %v2233_v48 = vmul.f32 1.442695, %v2232_v8 }
0x1ef6   :  { %3779 = vpow2.f32 %v2233_v48 }
0x1ef9   :  { %v2440_v41 = vpop.f32.mrf.mxu0 }
0x1efb   :  { %v3602_v42 = vpop.f32.mrf.mxu0 }
0x1f03   :  { %v3780_v49 = vpop.eup %3779 }
0x1f04   :  { %v2235_v50 = vadd.f32 1.0, %v3780_v49 }
0x1f06   :  { %3781 = vrcp.f32 %v2235_v50 }
0x1f13   :  { %v3782_v51 = vpop.eup %3781 }
0x1f14   :  { %v2244_v52 = vsub.f32 1.0, %v3782_v51 }
0x1f16   :  { %v2245_v55 = vmul.f32 %v2244_v52, %v2158_v45 }
0x1f66   :  { %v2241_v53 = vpop.permute.xlu0 %2240 }
0x1f67   :  { %v2243_v54 = vmul.f32 %v3782_v51, %v2241_v53 }
0x1f69   :  { %v2246_v56 = vadd.f32 %v2245_v55, %v2243_v54 }
0x1f6b   :  { %3590 = vmatmul.mubr.msk.f32.vlgmr.msra.gmra.mxu1 %vm132_vm1, %v2246_v56 }
0x1f6c   :  { %3604 = vmatpush3.msra.mxu1 %v4399_v2  ;;  %3611 = vmatprep.mubr.msk.f32.mxu1 %vm3997_vm0, %v3996_v0 }
0x1f6d   :  { %3605 = vmatprep.subr.mxu1 %v3996_v0 }
0x1f6e   :  { %3606 = vmatpush3.msra.mxu1 %v4405_v43 }
0x1f6f   :  { %3607 = vmatprep.subr.mxu1 %v3996_v0 }
0x1f70   :  { %3608 = vmatpush3.msra.mxu1 %v4409_v4 }
0x1f71   :  { %3609 = vmatprep.subr.mxu1 %v3996_v0 }
0x1f72   :  { %3610 = vmatpush3.msra.mxu1 %v4413_v44 }
0x1f73   :  { %3625 = vmatprep.subr.mxu1 %v3996_v0 }
0x202b   :  { %v2326_v57 = vpop.f32.mrf.mxu1 }
0x202c   :  { %2337 = vrot.lane.b32.xlu0 %v2326_v57, %s3998_s8  ;;  %v2330_v59 = vsub.f32 0.0, %v2326_v57 }
0x202d   :  { %v3591_v58 = vpop.f32.mrf.mxu1 }
0x202e   :  { %v2331_v60 = vmul.f32 1.442695, %v2330_v59 }
0x2030   :  { %2248 = vrot.lane.b32.xlu0 %v3782_v51, %s3998_s8  ;;  %3783 = vpow2.f32 %v2331_v60 }
0x2034   :  { %2252 = vrot.lane.b32.xlu0 %v2158_v45, %s3999_s9  ;;  %v2441_v45 = vadd.f32 %v4465_v25, %v2440_v41  ;;  %v2743_v41 = vld [vmem:[#allocation5 + $0x38] sm:$0xff] }
0x203d   :  { %v3784_v61 = vpop.eup %3783 }
0x203e   :  { %v2333_v62 = vadd.f32 1.0, %v3784_v61 }
0x2040   :  { %3785 = vrcp.f32 %v2333_v62 }
0x204d   :  { %v3786_v11 = vpop.eup %3785 }
0x204e   :  { %v2341_v63 = vsub.f32 1.0, %v3786_v11 }
0x2050   :  { %v2342_v21 = vmul.f32 %v2341_v63, %v2246_v56 }
0x209e   :  { %v2338_v9 = vpop.permute.xlu0 %2337 }
0x209f   :  { %v2340_v10 = vmul.f32 %v3786_v11, %v2338_v9 }
0x20a1   :  { %v2343_v33 = vadd.f32 %v2342_v21, %v2340_v10 }
0x20a2   :  { %v2249_v16 = vpop.permute.xlu0 %2248 }
0x20a3   :  { %2345 = vrot.lane.b32.xlu0 %v2343_v33, %s3999_s9  ;;  %v2251_v18 = vmul.f32 %v3782_v51, %v2249_v16 }
0x20a6   :  { %v2253_v17 = vpop.permute.xlu0 %2252 }
0x20a7   :  { %v2255_v34 = vmul.f32 %v2253_v17, %v2244_v52 }
0x20a9   :  { %v2256_v19 = vadd.f32 %v2255_v34, %v2251_v18 }
0x2115   :  { %v2346_v35 = vpop.permute.xlu0 %2345 }
0x2116   :  { %v2348_v26 = vadd.f32 %v2346_v35, %v2256_v19 }
0x2118   :  { %v2349_v30 = vmul.f32 0.5, %v2348_v26 }
0x211a   :  { %v2350_v1 = vmul.f32 %v2349_v30, %v2349_v30 }
0x211c   :  { %2352 = vrot.lane.b32.xlu1 %v2350_v1, %s3999_s9 }
0x218e   :  { %v2353_v31 = vpop.permute.xlu1 %2352 }
0x218f   :  { %v2355_v32 = vsel %vm132_vm1, %v2353_v31, 0.0 }
0x2190   :  { %2356 = vadd.xlane.f32.xlu0 %v2355_v32 }
0x2219   :  { %v2357_v3 = vpop.xlane.xlu0 %2356 }
0x221a   :  { %3787 = vrcp.f32 %v2357_v3  ;;  %vm2358_vm7 = vcmp.gt.f32.partialorder %v2357_v3, 625.0 }
0x2227   :  { %v3788_v38 = vpop.eup %3787 }
0x2228   :  { %v2360_v39 = vmul.f32 625.0, %v3788_v38 }
0x222a   :  { %v2361_v5 = vsel %vm2358_vm7, %v2360_v39, 1.0 }
0x222b   :  { %v2362_v40 = vmul.f32 %v2361_v5, %v2349_v30 }
0x222d   :  { %2364 = vrot.lane.b32.xlu1 %v2362_v40, %s3999_s9 }
0x229f   :  { %v2365_v7 = vpop.permute.xlu1 %2364 }
0x22a0   :  { %2368 = vst.msk [vmem:[#allocation13 + $0x28] sm:$0xff] %vm132_vm1, %v2365_v7  ;;  %3612 = vmatmul.mubr.msk.f32.vlgmr.msra.gmra.mxu1 %vm132_vm1, %v2365_v7 }
0x22a1   :  { %3626 = vmatpush3.msra.mxu1 %v4444_v22  ;;  %3633 = vmatprep.mubr.msk.f32.mxu1 %vm3997_vm0, %v3996_v0 }
0x22a2   :  { %3627 = vmatprep.subr.mxu1 %v3996_v0 }
0x22a3   :  { %3628 = vmatpush3.msra.mxu1 %v4450_v23 }
0x22a4   :  { %3629 = vmatprep.subr.mxu1 %v3996_v0 }
0x22a5   :  { %3630 = vmatpush3.msra.mxu1 %v4454_v36 }
0x22a6   :  { %3631 = vmatprep.subr.mxu1 %v3996_v0 }
0x22a7   :  { %3632 = vmatpush3.msra.mxu1 %v4458_v24 }
0x22a8   :  { %3647 = vmatprep.subr.mxu1 %v3996_v0 }
0x2360   :  { %v2512_v6 = vpop.f32.mrf.mxu1 }
0x2361   :  { %v2516_v46 = vadd.f32 %v2512_v6, %v2441_v45 }
0x2362   :  { %v3613_v47 = vpop.f32.mrf.mxu1 }
0x2363   :  { %3789 = vtanh.f32 %v2516_v46  ;;  %v2517_v48 = vsub.f32 0.0, %v2516_v46 }
0x2365   :  { %v2518_v49 = vmul.f32 1.442695, %v2517_v48 }
0x2367   :  { %3791 = vpow2.f32 %v2518_v49 }
0x2370   :  { %v3790_v8 = vpop.eup %3789 }
0x2371   :  { %2525 = vrot.lane.b32.xlu1 %v3790_v8, %s3998_s8 }
0x2374   :  { %v3792_v50 = vpop.eup %3791 }
0x2375   :  { %v2520_v51 = vadd.f32 1.0, %v3792_v50 }
0x2377   :  { %3793 = vrcp.f32 %v2520_v51 }
0x2384   :  { %v3794_v52 = vpop.eup %3793 }
0x2385   :  { %v2529_v53 = vsub.f32 1.0, %v3794_v52 }
0x2387   :  { %v2530_v56 = vmul.f32 %v2529_v53, %v2365_v7 }
0x23e3   :  { %v2526_v54 = vpop.permute.xlu1 %2525 }
0x23e4   :  { %v2528_v55 = vmul.f32 %v3794_v52, %v2526_v54 }
0x23e6   :  { %v2531_v57 = vadd.f32 %v2530_v56, %v2528_v55 }
0x23e8   :  { %2625 = vrot.lane.b32.xlu0 %v2531_v57, %s3999_s9  ;;  %3623 = vmatmul.mubr.msk.f32.vlgmr.msra.gmra.mxu0 %vm132_vm1, %v2531_v57 }
0x23e9   :  { %3637 = vmatpush3.msra.mxu0 %v4379_v13  ;;  %3644 = vmatprep.mubr.msk.f32.mxu0 %vm3997_vm0, %v3996_v0 }
0x23ea   :  { %3638 = vmatprep.subr.mxu0 %v3996_v0 }
0x23eb   :  { %3639 = vmatpush3.msra.mxu0 %v4385_v27 }
0x23ec   :  { %3640 = vmatprep.subr.mxu0 %v3996_v0 }
0x23ed   :  { %3641 = vmatpush3.msra.mxu0 %v4389_v28 }
0x23ee   :  { %3642 = vmatprep.subr.mxu0 %v3996_v0 }
0x23ef   :  { %3643 = vmatpush3.msra.mxu0 %v4393_v29 }
0x23f0   :  { %3658 = vmatprep.subr.mxu0 %v3996_v0  ;;  %3645 = vmatmul.mubr.msk.f32.vlgmr.msra.gmra.mxu0 %vm132_vm1, %v2743_v41 }
0x23f1   :  { %3659 = vmatpush3.msra.mxu0 %v4423_v12  ;;  %3666 = vmatprep.mubr.msk.f32.mxu0 %vm3997_vm0, %v3996_v0 }
0x23f2   :  { %3660 = vmatprep.subr.mxu0 %v3996_v0 }
0x23f3   :  { %3661 = vmatpush3.msra.mxu0 %v4429_v14 }
0x23f4   :  { %3662 = vmatprep.subr.mxu0 %v3996_v0 }
0x23f5   :  { %3663 = vmatpush3.msra.mxu0 %v4433_v15 }
0x23f6   :  { %3664 = vmatprep.subr.mxu0 %v3996_v0 }
0x23f7   :  { %3665 = vmatpush3.msra.mxu0 %v4437_v20 }
0x245a   :  { %v2626_v1 = vpop.permute.xlu0 %2625 }
0x24a8   :  { %v2601_v58 = vpop.f32.mrf.mxu0 }
0x24a9   :  { %v2611_v59 = vmax.f32 %v2601_v58, 0.0  ;;  %v2605_v60 = vsub.f32 0.0, %v2601_v58 }
0x24aa   :  { %v3624_v13 = vpop.f32.mrf.mxu0 }
0x24ab   :  { %2613 = vrot.lane.b32.xlu1 %v2611_v59, %s3998_s8  ;;  %v2606_v61 = vmul.f32 1.442695, %v2605_v60 }
0x24ad   :  { %3795 = vpow2.f32 %v2606_v61 }
0x24b0   :  { %v2813_v46 = vpop.f32.mrf.mxu0 }
0x24b1   :  { %v2814_v15 = vadd.f32 %v4465_v25, %v2813_v46 }
0x24b2   :  { %v3646_v47 = vpop.f32.mrf.mxu0 }
0x24ba   :  { %v3796_v62 = vpop.eup %3795 }
0x24bb   :  { %v2608_v27 = vadd.f32 1.0, %v3796_v62 }
0x24bd   :  { %3797 = vrcp.f32 %v2608_v27 }
0x24ca   :  { %v3798_v11 = vpop.eup %3797 }
0x24cb   :  { %v2617_v63 = vsub.f32 1.0, %v3798_v11 }
0x24cd   :  { %v2618_v10 = vmul.f32 %v2617_v63, %v2531_v57  ;;  %v2628_v31 = vmul.f32 %v2626_v1, %v2617_v63 }
0x251d   :  { %v2614_v28 = vpop.permute.xlu1 %2613 }
0x251e   :  { %v2616_v9 = vmul.f32 %v3798_v11, %v2614_v28 }
0x2520   :  { %v2619_v21 = vadd.f32 %v2618_v10, %v2616_v9 }
0x2522   :  { %3634 = vmatmul.mubr.msk.f32.vlgmr.msra.gmra.mxu1 %vm132_vm1, %v2619_v21 }
0x2523   :  { %3648 = vmatpush3.msra.mxu1 %v4399_v2  ;;  %3655 = vmatprep.mubr.msk.f32.mxu1 %vm3997_vm0, %v3996_v0 }
0x2524   :  { %3649 = vmatprep.subr.mxu1 %v3996_v0 }
0x2525   :  { %3650 = vmatpush3.msra.mxu1 %v4405_v43 }
0x2526   :  { %3651 = vmatprep.subr.mxu1 %v3996_v0 }
0x2527   :  { %3652 = vmatpush3.msra.mxu1 %v4409_v4 }
0x2528   :  { %3653 = vmatprep.subr.mxu1 %v3996_v0 }
0x2529   :  { %3654 = vmatpush3.msra.mxu1 %v4413_v44 }
0x252a   :  { %3669 = vmatprep.subr.mxu1 %v3996_v0 }
0x25e2   :  { %v2699_v29 = vpop.f32.mrf.mxu1 }
0x25e3   :  { %2710 = vrot.lane.b32.xlu1 %v2699_v29, %s3998_s8  ;;  %v2703_v33 = vsub.f32 0.0, %v2699_v29 }
0x25e4   :  { %v3635_v2 = vpop.f32.mrf.mxu1 }
0x25e5   :  { %v2704_v16 = vmul.f32 1.442695, %v2703_v33 }
0x25e7   :  { %2621 = vrot.lane.b32.xlu1 %v3798_v11, %s3998_s8  ;;  %3799 = vpow2.f32 %v2704_v16 }
0x25f4   :  { %v3800_v43 = vpop.eup %3799 }
0x25f5   :  { %v2706_v17 = vadd.f32 1.0, %v3800_v43 }
0x25f7   :  { %3801 = vrcp.f32 %v2706_v17 }
0x2604   :  { %v3802_v34 = vpop.eup %3801 }
0x2605   :  { %v2714_v4 = vsub.f32 1.0, %v3802_v34 }
0x2607   :  { %v2715_v35 = vmul.f32 %v2714_v4, %v2619_v21 }
0x2655   :  { %v2711_v18 = vpop.permute.xlu1 %2710 }
0x2656   :  { %v2713_v19 = vmul.f32 %v3802_v34, %v2711_v18 }
0x2658   :  { %v2716_v44 = vadd.f32 %v2715_v35, %v2713_v19 }
0x2659   :  { %v2622_v26 = vpop.permute.xlu1 %2621 }
0x265a   :  { %2718 = vrot.lane.b32.xlu1 %v2716_v44, %s3999_s9  ;;  %v2624_v30 = vmul.f32 %v3798_v11, %v2622_v26 }
0x265c   :  { %v2629_v32 = vadd.f32 %v2628_v31, %v2624_v30 }
0x26cc   :  { %v2719_v37 = vpop.permute.xlu1 %2718 }
0x26cd   :  { %v2721_v3 = vadd.f32 %v2719_v37, %v2629_v32 }
0x26cf   :  { %v2722_v38 = vmul.f32 0.5, %v2721_v3 }
0x26d1   :  { %v2723_v39 = vmul.f32 %v2722_v38, %v2722_v38 }
0x26d3   :  { %2725 = vrot.lane.b32.xlu1 %v2723_v39, %s3999_s9 }
0x2745   :  { %v2726_v5 = vpop.permute.xlu1 %2725 }
0x2746   :  { %v2728_v40 = vsel %vm132_vm1, %v2726_v5, 0.0 }
0x2747   :  { %2729 = vadd.xlane.f32.xlu1 %v2728_v40 }
0x27d0   :  { %v2730_v42 = vpop.xlane.xlu1 %2729 }
0x27d1   :  { %3803 = vrcp.f32 %v2730_v42  ;;  %vm2731_vm8 = vcmp.gt.f32.partialorder %v2730_v42, 625.0 }
0x27de   :  { %v3804_v7 = vpop.eup %3803 }
0x27df   :  { %v2733_v45 = vmul.f32 625.0, %v3804_v7 }
0x27e1   :  { %v2734_v12 = vsel %vm2731_vm8, %v2733_v45, 1.0 }
0x27e2   :  { %v2735_v6 = vmul.f32 %v2734_v12, %v2722_v38 }
0x27e4   :  { %2737 = vrot.lane.b32.xlu0 %v2735_v6, %s3999_s9 }
0x2856   :  { %v2738_v14 = vpop.permute.xlu0 %2737 }
0x2857   :  { %2741 = vst.msk [vmem:[#allocation13 + $0x30] sm:$0xff] %vm132_vm1, %v2738_v14  ;;  %3656 = vmatmul.mubr.msk.f32.vlgmr.msra.gmra.mxu1 %vm132_vm1, %v2738_v14 }
0x2858   :  { %3670 = vmatpush3.msra.mxu1 %v4444_v22  ;;  %3677 = vmatprep.mubr.msk.f32.mxu1 %vm3997_vm0, %v3996_v0 }
0x2859   :  { %3671 = vmatprep.subr.mxu1 %v3996_v0 }
0x285a   :  { %3672 = vmatpush3.msra.mxu1 %v4450_v23 }
0x285b   :  { %3673 = vmatprep.subr.mxu1 %v3996_v0 }
0x285c   :  { %3674 = vmatpush3.msra.mxu1 %v4454_v36 }
0x285d   :  { %3675 = vmatprep.subr.mxu1 %v3996_v0 }
0x285e   :  { %3676 = vmatpush3.msra.mxu1 %v4458_v24 }
0x2917   :  { %v2885_v20 = vpop.f32.mrf.mxu1 }
0x2918   :  { %v2889_v8 = vadd.f32 %v2885_v20, %v2814_v15 }
0x2919   :  { %v3657_v22 = vpop.f32.mrf.mxu1 }
0x291a   :  { %3805 = vtanh.f32 %v2889_v8  ;;  %v2890_v49 = vsub.f32 0.0, %v2889_v8 }
0x291c   :  { %v2891_v50 = vmul.f32 1.442695, %v2890_v49 }
0x291e   :  { %3807 = vpow2.f32 %v2891_v50 }
0x2927   :  { %v3806_v48 = vpop.eup %3805 }
0x2928   :  { %2898 = vrot.lane.b32.xlu0 %v3806_v48, %s3998_s8 }
0x292b   :  { %v3808_v23 = vpop.eup %3807 }
0x292c   :  { %v2893_v51 = vadd.f32 1.0, %v3808_v23 }
0x292e   :  { %3809 = vrcp.f32 %v2893_v51 }
0x293b   :  { %v3810_v36 = vpop.eup %3809 }
0x293c   :  { %v2902_v52 = vsub.f32 1.0, %v3810_v36 }
0x293e   :  { %v2903_v24 = vmul.f32 %v2902_v52, %v2738_v14 }
0x299a   :  { %v2899_v0 = vpop.permute.xlu0 %2898 }
0x299b   :  { %v2901_v53 = vmul.f32 %v3810_v36, %v2899_v0 }
0x299d   :  { %v2904_v54 = vadd.f32 %v2903_v24, %v2901_v53 }
0x299f   :  { %3667 = vmatmul.mubr.msk.f32.vlgmr.msra.gmra.mxu0 %vm132_vm1, %v2904_v54 }
0x2a5f   :  { %v2974_v25 = vpop.f32.mrf.mxu0 }
0x2a60   :  { %v2984_v55 = vmax.f32 %v2974_v25, 0.0  ;;  %v2978_v57 = vsub.f32 0.0, %v2974_v25 }
0x2a61   :  { %v3668_v56 = vpop.f32.mrf.mxu0 }
0x2a62   :  { %2986 = vrot.lane.b32.xlu0 %v2984_v55, %s3998_s8  ;;  %v2979_v58 = vmul.f32 1.442695, %v2978_v57 }
0x2a64   :  { %3811 = vpow2.f32 %v2979_v58 }
0x2a71   :  { %v3812_v59 = vpop.eup %3811 }
0x2a72   :  { %v2981_v13 = vadd.f32 1.0, %v3812_v59 }
0x2a74   :  { %3813 = vrcp.f32 %v2981_v13 }
0x2a81   :  { %v3814_v60 = vpop.eup %3813 }
0x2a82   :  { %v2990_v61 = vsub.f32 1.0, %v3814_v60 }
0x2a84   :  { %v2991_v11 = vmul.f32 %v2990_v61, %v2904_v54 }
0x2ad4   :  { %v2987_v62 = vpop.permute.xlu0 %2986 }
0x2ad5   :  { %v2989_v27 = vmul.f32 %v3814_v60, %v2987_v62 }
0x2ad7   :  { %v2992_v63 = vadd.f32 %v2991_v11, %v2989_v27 }
0x2ad9   :  { %3678 = vmatmul.mubr.msk.f32.vlgmr.msra.gmra.mxu1 %vm132_vm1, %v2992_v63 }
0x2b99   :  { %v3072_v28 = vpop.f32.mrf.mxu1 }
0x2b9a   :  { %3083 = vrot.lane.b32.xlu0 %v3072_v28, %s3998_s8  ;;  %v3076_v10 = vsub.f32 0.0, %v3072_v28 }
0x2b9b   :  { %v3679_v9 = vpop.f32.mrf.mxu1 }
0x2b9c   :  { %v3077_v21 = vmul.f32 1.442695, %v3076_v10 }
0x2b9e   :  { %2994 = vrot.lane.b32.xlu0 %v3814_v60, %s3998_s8  ;;  %3815 = vpow2.f32 %v3077_v21 }
0x2ba2   :  { %2998 = vrot.lane.b32.xlu0 %v2904_v54, %s3999_s9 }
0x2bab   :  { %v3816_v29 = vpop.eup %3815 }
0x2bac   :  { %v3079_v2 = vadd.f32 1.0, %v3816_v29 }
0x2bae   :  { %3817 = vrcp.f32 %v3079_v2 }
0x2bbb   :  { %v3818_v33 = vpop.eup %3817 }
0x2bbc   :  { %v3087_v16 = vsub.f32 1.0, %v3818_v33 }
0x2bbe   :  { %v3088_v34 = vmul.f32 %v3087_v16, %v2992_v63 }
0x2c0c   :  { %v3084_v43 = vpop.permute.xlu0 %3083 }
0x2c0d   :  { %v3086_v17 = vmul.f32 %v3818_v33, %v3084_v43 }
0x2c0f   :  { %v3089_v4 = vadd.f32 %v3088_v34, %v3086_v17 }
0x2c10   :  { %v2995_v18 = vpop.permute.xlu0 %2994 }
0x2c11   :  { %3091 = vrot.lane.b32.xlu0 %v3089_v4, %s3999_s9  ;;  %v2997_v44 = vmul.f32 %v3814_v60, %v2995_v18 }
0x2c14   :  { %v2999_v19 = vpop.permute.xlu0 %2998 }
0x2c15   :  { %v3001_v35 = vmul.f32 %v2999_v19, %v2990_v61 }
0x2c17   :  { %v3002_v26 = vadd.f32 %v3001_v35, %v2997_v44 }
0x2c83   :  { %v3092_v30 = vpop.permute.xlu0 %3091 }
0x2c84   :  { %v3094_v1 = vadd.f32 %v3092_v30, %v3002_v26 }
0x2c86   :  { %v3095_v31 = vmul.f32 0.5, %v3094_v1 }
0x2c88   :  { %v3096_v32 = vmul.f32 %v3095_v31, %v3095_v31 }
0x2c8a   :  { %3098 = vrot.lane.b32.xlu1 %v3096_v32, %s3999_s9 }
0x2cfc   :  { %v3099_v37 = vpop.permute.xlu1 %3098 }
0x2cfd   :  { %v3101_v3 = vsel %vm132_vm1, %v3099_v37, 0.0 }
0x2cfe   :  { %3102 = vadd.xlane.f32.xlu0 %v3101_v3 }
0x2d87   :  { %v3103_v38 = vpop.xlane.xlu0 %3102 }
0x2d88   :  { %3819 = vrcp.f32 %v3103_v38  ;;  %vm3104_vm9 = vcmp.gt.f32.partialorder %v3103_v38, 625.0 }
0x2d95   :  { %v3820_v39 = vpop.eup %3819 }
0x2d96   :  { %v3106_v5 = vmul.f32 625.0, %v3820_v39 }
0x2d98   :  { %v3107_v40 = vsel %vm3104_vm9, %v3106_v5, 1.0 }
0x2d99   :  { %v3108_v41 = vmul.f32 %v3107_v40, %v3095_v31 }
0x2d9b   :  { %3110 = vrot.lane.b32.xlu1 %v3108_v41, %s3999_s9 }
0x2e0d   :  { %v3111_v42 = vpop.permute.xlu1 %3110 }
0x2e0e   :  { %3114 = vst.msk [vmem:[#allocation13 + $0x38] sm:$0xff] %vm132_vm1, %v3111_v42 }
0x2e0f   :  { %3969 = shalt.err (!%p3966_p6)
}
0x2e10   :  { %3126 = dma.vmem_to_hbm [thread:$0]  %s3121_s12, 1024, %s4601_s7, [#allocation4], %s3989_s27, %s3989_s27, %s3990_s28  }
0x2e11   :  { %3986 = dma.done.wait [#allocation4], 1024  }
0x2e12   :  { %3987 = vsyncadd [#allocation4], 4294966272 }
0x2e13   :  { %3130 = vsyncpa [#allocation3], 1 }
0x2e14   :  { %3131 = vsyncpa [#allocation6], 1 }
0x2e15   :  { %3132 = vsyncpa [#allocation9], 1 }
0x2e16   :  { %3133 = vsyncpa [#allocation12], 1 }
0x2e17   :  { %3134 = vsyncpa [#allocation4], 1 }

</bundles_post_ra>
